<compile_context>
chip_gen: v5e
topology: v5e:2x2
jax: 0.10.0
libtpu: 0.0.40
codegen_flags: <defaults>
</compile_context>

<pallas_src>
import functools
import math

import numpy as np
import jax
import jax.numpy as jnp
from jax.experimental import pallas as pl

# ----------------------------- small config ---------------------------------
VOCAB = 33                    # ESM vocab size
VOCAB_PAD = 40                # padded vocab rows; row 33 is the all-zero row
HIDDEN = 32
NUM_LAYERS = 2
NUM_HEADS = 4
HEAD_DIM = HIDDEN // NUM_HEADS        # 8
INTERMEDIATE = 64
NUM_LABELS = 4
LORA_R = 8
LORA_ALPHA = 32
LORA_SCALING = LORA_ALPHA / LORA_R
LN_EPS = 1e-5
NEG_INF = -1e30
OUT_LANES = 128               # lane-dense kernel output width

# ------------------ packed-slab layout (static constants) -------------------
GRP = 128                                  # one full lane tile per (tensor, head)
QOFF = 0 * NUM_HEADS * GRP                 # q      groups: lanes [0,    512)
KOFF = 1 * NUM_HEADS * GRP                 # k      groups: lanes [512, 1024)
VOFF = 2 * NUM_HEADS * GRP                 # v      groups: lanes [1024,1536)
QROFF = 3 * NUM_HEADS * GRP                # q@R    groups: lanes [1536,2048)
KROFF = 4 * NUM_HEADS * GRP                # k@R    groups: lanes [2048,2560)
QKV_LANES = 5 * NUM_HEADS * GRP            # 2560
QKV_ROWS = 40                              # 32 weight rows + 1 bias row + pad

WO_ROW = 0                                 # out-proj, per head, 128-row padded
WI_ROW = NUM_HEADS * GRP                   # 512
WOUT_ROW = WI_ROW + HIDDEN                 # 544
LN1G_ROW = WOUT_ROW + INTERMEDIATE         # 608
LN1B_ROW = LN1G_ROW + 1
LN2G_ROW = LN1G_ROW + 2
LN2B_ROW = LN1G_ROW + 3
BO_ROW = LN1G_ROW + 4
BI_ROW = LN1G_ROW + 5
BOUT_ROW = LN1G_ROW + 6
WLYR_ROWS = ((BOUT_ROW + 1 + 7) // 8) * 8  # 616


def _misc_offsets(seq):
    cos = VOCAB_PAD
    sin = cos + seq
    flng = sin + seq
    flnb = flng + 1
    clsw = flnb + 1
    clsb = clsw + HIDDEN
    rows = ((clsb + 1 + 7) // 8) * 8
    return dict(cos=cos, sin=sin, flng=flng, flnb=flnb, clsw=clsw, clsb=clsb,
                rows=rows)


# ------------------------- fused whole-model kernel --------------------------
def _esm_kernel(ids_ref, bias_ref, wqkv_ref, wlyr_ref, misc_ref, out_ref,
                *, batch, seq):
    """Embedding -> 2x (LN, QKV+rotary, attention, out-proj, LN, FFN) -> LN ->
    classifier, all inside one program.  Every intermediate stays in VMEM."""
    bs = batch * seq
    mo = _misc_offsets(seq)

    # --- embedding: gather-free one-hot matmul (masked ids point at zero row)
    ids = ids_ref[...]                                             # (BS, 1) i32
    iota = jax.lax.broadcasted_iota(jnp.int32, (bs, VOCAB_PAD), 1)
    onehot = (ids == iota).astype(jnp.float32)                     # (BS, VP)
    table = misc_ref[0:VOCAB_PAD, 0:HIDDEN]                        # (VP, H)
    h = jnp.dot(onehot, table, preferred_element_type=jnp.float32) # (BS, H)
    # TODO(synk): ESM token-dropout / mask-ratio embedding rescaling not implemented.

    attn_bias = bias_ref[...]                                      # (BS, BS)

    # rotary tables (lane offset 0, lanes >= HEAD_DIM are zero), tiled to BS rows
    cos1 = misc_ref[mo["cos"]:mo["cos"] + seq, :]                  # (S, 128)
    sin1 = misc_ref[mo["sin"]:mo["sin"] + seq, :]
    cos = jnp.concatenate([cos1] * batch, axis=0)                  # (BS, 128)
    sin = jnp.concatenate([sin1] * batch, axis=0)

    def layer_norm(x, g, b):
        mu = jnp.mean(x, axis=-1, keepdims=True)
        var = jnp.mean(jnp.square(x - mu), axis=-1, keepdims=True)
        return (x - mu) * jax.lax.rsqrt(var + LN_EPS) * g + b

    for l in range(NUM_LAYERS):
        # ---------------- self-attention block (ESM pre-LN) -----------------
        x = layer_norm(h,
                       wlyr_ref[l, LN1G_ROW:LN1G_ROW + 1, 0:HIDDEN],
                       wlyr_ref[l, LN1B_ROW:LN1B_ROW + 1, 0:HIDDEN])
        # one fused projection; every (tensor, head) group owns a 128-lane tile
        qkv = (jnp.dot(x, wqkv_ref[l, 0:HIDDEN, :],
                       preferred_element_type=jnp.float32)
               + wqkv_ref[l, HIDDEN:HIDDEN + 1, :])                # (BS, 2560)

        attn = None
        for hh in range(NUM_HEADS):
            o = hh * GRP
            # rotary: plain + pre-rotated columns, 1/sqrt(d) folded into weights
            qh = (qkv[:, QOFF + o:QOFF + o + GRP] * cos
                  + qkv[:, QROFF + o:QROFF + o + GRP] * sin)       # (BS, 128)
            kh = (qkv[:, KOFF + o:KOFF + o + GRP] * cos
                  + qkv[:, KROFF + o:KROFF + o + GRP] * sin)
            vh = qkv[:, VOFF + o:VOFF + o + GRP]

            # flat (BS, BS) scores; block-diagonal bias keeps sequences apart
            s = jax.lax.dot_general(qh, kh, (((1,), (1,)), ((), ())),
                                    preferred_element_type=jnp.float32)
            s = s + attn_bias
            s = s - jnp.max(s, axis=-1, keepdims=True)
            p = jnp.exp(s)
            p = p * pl.reciprocal(jnp.sum(p, axis=-1, keepdims=True),
                                  approx=True)
            ctx = jnp.dot(p, vh, preferred_element_type=jnp.float32)  # (BS,128)

            # per-head out-projection contribution (rows >= HEAD_DIM are zero)
            wo_h = wlyr_ref[l, WO_ROW + o:WO_ROW + o + GRP, 0:HIDDEN]
            head_out = jnp.dot(ctx, wo_h, preferred_element_type=jnp.float32)
            attn = head_out if attn is None else attn + head_out

        attn_out = attn + wlyr_ref[l, BO_ROW:BO_ROW + 1, 0:HIDDEN] + h

        # ------------------------- feed-forward block ------------------------
        x2 = layer_norm(attn_out,
                        wlyr_ref[l, LN2G_ROW:LN2G_ROW + 1, 0:HIDDEN],
                        wlyr_ref[l, LN2B_ROW:LN2B_ROW + 1, 0:HIDDEN])
        inter = (jnp.dot(x2, wlyr_ref[l, WI_ROW:WI_ROW + HIDDEN, 0:INTERMEDIATE],
                         preferred_element_type=jnp.float32)
                 + wlyr_ref[l, BI_ROW:BI_ROW + 1, 0:INTERMEDIATE])
        # TODO(synk): ESM uses exact (erf) GELU; tanh approximation used for
        # Mosaic-safe lowering.
        inter = jax.nn.gelu(inter, approximate=True)
        h = (jnp.dot(inter, wlyr_ref[l, WOUT_ROW:WOUT_ROW + INTERMEDIATE, 0:HIDDEN],
                     preferred_element_type=jnp.float32)
             + wlyr_ref[l, BOUT_ROW:BOUT_ROW + 1, 0:HIDDEN] + attn_out)

    # final LayerNorm + classifier on all rows (per-row ops; CLS row selected
    # outside).  Output is a lane-dense (BS, 128) slab; lanes >= NUM_LABELS = 0.
    hf = layer_norm(h,
                    misc_ref[mo["flng"]:mo["flng"] + 1, 0:HIDDEN],
                    misc_ref[mo["flnb"]:mo["flnb"] + 1, 0:HIDDEN])
    logits = (jnp.dot(hf, misc_ref[mo["clsw"]:mo["clsw"] + HIDDEN, :],
                      preferred_element_type=jnp.float32)
              + misc_ref[mo["clsb"]:mo["clsb"] + 1, :])            # (BS, 128)
    out_ref[...] = logits.astype(out_ref.dtype)


# ----------------------------- weight prep ----------------------------------
def _rotate_half_mat(d):
    """(d, d) matrix R such that x @ R == rotate_half(x) for one head."""
    half = d // 2
    r = np.zeros((d, d), np.float32)
    r[half:, :half] = -np.eye(half, dtype=np.float32)   # out[:half] = -x[half:]
    r[:half, half:] = np.eye(half, dtype=np.float32)    # out[half:] =  x[:half]
    return r


def init_params(key):
    keys = iter(jax.random.split(key, 8 + NUM_LAYERS * 32))
    nk = lambda: next(keys)

    def nrm(shape, scale=0.02):
        return (scale * jax.random.normal(nk(), shape)).astype(jnp.float32)

    def lora_lin(din, dout):
        # note: real PEFT initializes LoRA-B to zeros; random here to exercise
        # the merged-LoRA path.
        return dict(w=nrm((din, dout)), b=jnp.zeros((dout,), jnp.float32),
                    a=nrm((din, LORA_R), 0.1), bmat=nrm((LORA_R, dout), 0.1))

    params = {
        "word_embeddings": nrm((VOCAB, HIDDEN)),
        "layers": [],
        "final_ln_g": jnp.ones((HIDDEN,), jnp.float32),
        "final_ln_b": jnp.zeros((HIDDEN,), jnp.float32),
        "cls_w": nrm((HIDDEN, NUM_LABELS)),
        "cls_b": jnp.zeros((NUM_LABELS,), jnp.float32),
    }
    for _ in range(NUM_LAYERS):
        params["layers"].append(dict(
            attn_ln_g=jnp.ones((HIDDEN,), jnp.float32),
            attn_ln_b=jnp.zeros((HIDDEN,), jnp.float32),
            q=lora_lin(HIDDEN, HIDDEN),
            k=lora_lin(HIDDEN, HIDDEN),
            v=lora_lin(HIDDEN, HIDDEN),
            attn_out=lora_lin(HIDDEN, HIDDEN),
            ffn_ln_g=jnp.ones((HIDDEN,), jnp.float32),
            ffn_ln_b=jnp.zeros((HIDDEN,), jnp.float32),
            inter=lora_lin(HIDDEN, INTERMEDIATE),
            out=lora_lin(INTERMEDIATE, HIDDEN),
        ))
    return params


def build_inference_weights(params, seq):
    """Merge LoRA (W' = W + (a/r) A@B), fold 1/sqrt(d) + rotate_half into the
    fused QKV weights, and pack everything into three f32 slabs."""
    scale = 1.0 / math.sqrt(HEAD_DIM)
    R = _rotate_half_mat(HEAD_DIM)

    def merged(p):
        w = np.asarray(p["w"], np.float32) + LORA_SCALING * (
            np.asarray(p["a"], np.float32) @ np.asarray(p["bmat"], np.float32))
        return w.astype(np.float32), np.asarray(p["b"], np.float32)

    wqkv = np.zeros((NUM_LAYERS, QKV_ROWS, QKV_LANES), np.float32)
    wlyr = np.zeros((NUM_LAYERS, WLYR_ROWS, 128), np.float32)

    for l, layer in enumerate(params["layers"]):
        wq, bq = merged(layer["q"])
        wq = wq * scale                      # fold 1/sqrt(head_dim) into q side
        bq = bq * scale
        wk, bk = merged(layer["k"])
        wv, bv = merged(layer["v"])
        wo, bo = merged(layer["attn_out"])
        wi, bi = merged(layer["inter"])
        wf, bf = merged(layer["out"])

        for hh in range(NUM_HEADS):
            cs = slice(hh * HEAD_DIM, (hh + 1) * HEAD_DIM)
            o = hh * GRP
            wqkv[l, 0:HIDDEN, QOFF + o:QOFF + o + HEAD_DIM] = wq[:, cs]
            wqkv[l, 0:HIDDEN, KOFF + o:KOFF + o + HEAD_DIM] = wk[:, cs]
            wqkv[l, 0:HIDDEN, VOFF + o:VOFF + o + HEAD_DIM] = wv[:, cs]
            wqkv[l, 0:HIDDEN, QROFF + o:QROFF + o + HEAD_DIM] = wq[:, cs] @ R
            wqkv[l, 0:HIDDEN, KROFF + o:KROFF + o + HEAD_DIM] = wk[:, cs] @ R
            wqkv[l, HIDDEN, QOFF + o:QOFF + o + HEAD_DIM] = bq[cs]
            wqkv[l, HIDDEN, KOFF + o:KOFF + o + HEAD_DIM] = bk[cs]
            wqkv[l, HIDDEN, VOFF + o:VOFF + o + HEAD_DIM] = bv[cs]
            wqkv[l, HIDDEN, QROFF + o:QROFF + o + HEAD_DIM] = bq[cs] @ R
            wqkv[l, HIDDEN, KROFF + o:KROFF + o + HEAD_DIM] = bk[cs] @ R
            # out-projection rows for this head, padded to a 128-row group
            wlyr[l, WO_ROW + o:WO_ROW + o + HEAD_DIM, 0:HIDDEN] = wo[cs, :]

        wlyr[l, WI_ROW:WI_ROW + HIDDEN, 0:INTERMEDIATE] = wi
        wlyr[l, WOUT_ROW:WOUT_ROW + INTERMEDIATE, 0:HIDDEN] = wf
        wlyr[l, LN1G_ROW, 0:HIDDEN] = np.asarray(layer["attn_ln_g"])
        wlyr[l, LN1B_ROW, 0:HIDDEN] = np.asarray(layer["attn_ln_b"])
        wlyr[l, LN2G_ROW, 0:HIDDEN] = np.asarray(layer["ffn_ln_g"])
        wlyr[l, LN2B_ROW, 0:HIDDEN] = np.asarray(layer["ffn_ln_b"])
        wlyr[l, BO_ROW, 0:HIDDEN] = bo
        wlyr[l, BI_ROW, 0:INTERMEDIATE] = bi
        wlyr[l, BOUT_ROW, 0:HIDDEN] = bf

    # misc slab: vocab table, rotary tables, final LN, classifier head
    mo = _misc_offsets(seq)
    misc = np.zeros((mo["rows"], 128), np.float32)
    misc[0:VOCAB, 0:HIDDEN] = np.asarray(params["word_embeddings"], np.float32)
    inv_freq = 1.0 / (10000.0 ** (np.arange(0, HEAD_DIM, 2, dtype=np.float32)
                                  / HEAD_DIM))
    t = np.arange(seq, dtype=np.float32)
    freqs = np.outer(t, inv_freq)                         # (S, d/2)
    emb = np.concatenate([freqs, freqs], axis=-1)         # (S, d)
    misc[mo["cos"]:mo["cos"] + seq, 0:HEAD_DIM] = np.cos(emb)
    misc[mo["sin"]:mo["sin"] + seq, 0:HEAD_DIM] = np.sin(emb)
    misc[mo["flng"], 0:HIDDEN] = np.asarray(params["final_ln_g"])
    misc[mo["flnb"], 0:HIDDEN] = np.asarray(params["final_ln_b"])
    misc[mo["clsw"]:mo["clsw"] + HIDDEN, 0:NUM_LABELS] = np.asarray(params["cls_w"])
    misc[mo["clsb"], 0:NUM_LABELS] = np.asarray(params["cls_b"])

    return {"wqkv": jnp.asarray(wqkv), "wlyr": jnp.asarray(wlyr),
            "misc": jnp.asarray(misc)}


# ----------------------------- model forward --------------------------------
@jax.jit
def forward(weights, input_ids, attention_mask=None, labels=None):
    B, S = input_ids.shape
    BS = B * S
    if attention_mask is None:
        attention_mask = jnp.ones((B, S), jnp.int32)
    maskf = attention_mask.astype(jnp.float32)

    # masked tokens -> sentinel id (zero-padded embedding row): fuses the
    # HF-ESM `embeddings * attention_mask` into the in-kernel one-hot lookup.
    ids_eff = jnp.where(attention_mask > 0, input_ids, VOCAB)
    ids_eff = ids_eff.astype(jnp.int32).reshape(BS, 1)

    # additive attention bias: key-padding mask + block-diagonal mask that
    # keeps the flattened (B*S) attention from mixing different sequences.
    block = np.where(np.kron(np.eye(B, dtype=np.float32),
                             np.ones((S, S), np.float32)) > 0, 0.0, NEG_INF)
    attn_bias = jnp.asarray(block, jnp.float32) + \
        (1.0 - maskf).reshape(1, BS) * NEG_INF                    # (BS, BS)

    kern = functools.partial(_esm_kernel, batch=B, seq=S)
    # Gridless: at B*S = 16 the model is dispatch/DMA-count bound; a batch grid
    # with 'parallel' dimension_semantics only pays off at realistic batch sizes.
    out = pl.pallas_call(
        kern,
        out_shape=jax.ShapeDtypeStruct((BS, OUT_LANES), jnp.float32),
    )(ids_eff, attn_bias, weights["wqkv"], weights["wlyr"], weights["misc"])

    # CustomEsmClassificationHead: dropout(p=0.4) is identity at inference.
    logits = out.reshape(B, S, OUT_LANES)[:, 0, :NUM_LABELS]       # (B, L)

    if labels is None:
        return {"logits": logits}
    logp = jax.nn.log_softmax(logits.astype(jnp.float32), axis=-1)
    loss = -jnp.mean(jnp.take_along_axis(logp, labels.reshape(-1, 1), axis=-1))
    return {"loss": loss, "logits": logits}


# ----------------------------- main ------------------------------------------
if __name__ == "__main__":
    key = jax.random.PRNGKey(0)
    pkey, dkey = jax.random.split(key)
    params = init_params(pkey)

    B, S = 2, 8
    weights = build_inference_weights(params, S)

    input_ids = jax.random.randint(dkey, (B, S), 0, VOCAB, dtype=jnp.int32)
    attention_mask = jnp.ones((B, S), jnp.int32).at[1, 6:].set(0)  # pad tail of seq 1
    labels = jnp.array([1, 2], dtype=jnp.int32)

    out = forward(weights, input_ids, attention_mask, labels)
    logits = jax.block_until_ready(out["logits"])
    loss = jax.block_until_ready(out["loss"])
    assert logits.shape == (B, NUM_LABELS)
    assert loss.shape == ()
    assert bool(jnp.all(jnp.isfinite(logits)))
    assert bool(jnp.isfinite(loss))
    print("KERNEL_OK")
</pallas_src>

<mosaic_0001>
module attributes {stable_mosaic.version = 11 : i64} {
  func.func @_esm_kernel(%arg0: memref<16x1xi32, #tpu.memory_space<vmem>>, %arg1: memref<16x16xf32, #tpu.memory_space<vmem>>, %arg2: memref<2x40x2560xf32, #tpu.memory_space<vmem>>, %arg3: memref<2x616x128xf32, #tpu.memory_space<vmem>>, %arg4: memref<96x128xf32, #tpu.memory_space<vmem>>, %arg5: memref<16x128xf32, #tpu.memory_space<vmem>>) attributes {dimension_semantics = [], scalar_prefetch = 0 : i64, scratch_operands = 0 : i64, tpu.core_type = #tpu.core_type<tc>} {
    %c0 = arith.constant 0 : index
    %c0_0 = arith.constant 0 : index
    %0 = vector.load %arg0[%c0, %c0_0] : memref<16x1xi32, #tpu.memory_space<vmem>>, vector<16x1xi32>
    %1 = tpu.iota {dimensions = array<i32: 1>} : vector<16x40xi32>
    %2 = vector.broadcast %0 : vector<16x1xi32> to vector<16x40xi32>
    %3 = arith.cmpi eq, %2, %1 : vector<16x40xi32>
    %4 = arith.extui %3 : vector<16x40xi1> to vector<16x40xi32>
    %5 = arith.sitofp %4 : vector<16x40xi32> to vector<16x40xf32>
    %c0_1 = arith.constant 0 : index
    %c0_2 = arith.constant 0 : index
    %6 = vector.load %arg4[%c0_1, %c0_2] : memref<96x128xf32, #tpu.memory_space<vmem>>, vector<40x32xf32>
    %cst = arith.constant dense<0.000000e+00> : vector<16x32xf32>
    %7 = tpu.matmul %5, %6, %cst {dimension_numbers = #tpu.dot_dimension_numbers<[1], [0], [0], [1], [0, 0, 1, 1], [], []>} : vector<16x40xf32>, vector<40x32xf32>, vector<16x32xf32> -> vector<16x32xf32>
    %c0_3 = arith.constant 0 : index
    %c0_4 = arith.constant 0 : index
    %8 = vector.load %arg1[%c0_3, %c0_4] : memref<16x16xf32, #tpu.memory_space<vmem>>, vector<16x16xf32>
    %c40 = arith.constant 40 : index
    %c0_5 = arith.constant 0 : index
    %9 = vector.load %arg4[%c40, %c0_5] : memref<96x128xf32, #tpu.memory_space<vmem>>, vector<8x128xf32>
    %c48 = arith.constant 48 : index
    %c0_6 = arith.constant 0 : index
    %10 = vector.load %arg4[%c48, %c0_6] : memref<96x128xf32, #tpu.memory_space<vmem>>, vector<8x128xf32>
    %11 = tpu.concatenate %9, %9 in 0 : vector<8x128xf32>, vector<8x128xf32> -> vector<16x128xf32>
    %12 = tpu.concatenate %10, %10 in 0 : vector<8x128xf32>, vector<8x128xf32> -> vector<16x128xf32>
    %c0_7 = arith.constant 0 : index
    %c608 = arith.constant 608 : index
    %c0_8 = arith.constant 0 : index
    %13 = vector.load %arg3[%c0_7, %c608, %c0_8] : memref<2x616x128xf32, #tpu.memory_space<vmem>>, vector<1x1x32xf32>
    %14 = vector.shape_cast %13 : vector<1x1x32xf32> to vector<1x32xf32>
    %c0_9 = arith.constant 0 : index
    %c609 = arith.constant 609 : index
    %c0_10 = arith.constant 0 : index
    %15 = vector.load %arg3[%c0_9, %c609, %c0_10] : memref<2x616x128xf32, #tpu.memory_space<vmem>>, vector<1x1x32xf32>
    %16 = vector.shape_cast %15 : vector<1x1x32xf32> to vector<1x32xf32>
    %cst_11 = arith.constant dense<0.000000e+00> : vector<16xf32>
    %17 = vector.multi_reduction <add>, %7, %cst_11 [1] : vector<16x32xf32> to vector<16xf32>
    %18 = vector.shape_cast %17 : vector<16xf32> to vector<16x1xf32>
    %cst_12 = arith.constant 3.200000e+01 : f32
    %19 = vector.broadcast %cst_12 : f32 to vector<16x1xf32>
    %20 = arith.divf %18, %19 : vector<16x1xf32>
    %21 = vector.broadcast %20 : vector<16x1xf32> to vector<16x32xf32>
    %22 = arith.subf %7, %21 : vector<16x32xf32>
    %23 = arith.mulf %22, %22 : vector<16x32xf32>
    %cst_13 = arith.constant dense<0.000000e+00> : vector<16xf32>
    %24 = vector.multi_reduction <add>, %23, %cst_13 [1] : vector<16x32xf32> to vector<16xf32>
    %25 = vector.shape_cast %24 : vector<16xf32> to vector<16x1xf32>
    %cst_14 = arith.constant 3.200000e+01 : f32
    %26 = vector.broadcast %cst_14 : f32 to vector<16x1xf32>
    %27 = arith.divf %25, %26 : vector<16x1xf32>
    %28 = vector.broadcast %20 : vector<16x1xf32> to vector<16x32xf32>
    %29 = arith.subf %7, %28 : vector<16x32xf32>
    %cst_15 = arith.constant 9.99999974E-6 : f32
    %30 = vector.broadcast %cst_15 : f32 to vector<16x1xf32>
    %31 = arith.addf %27, %30 : vector<16x1xf32>
    %32 = math.rsqrt %31 : vector<16x1xf32>
    %33 = vector.broadcast %32 : vector<16x1xf32> to vector<16x32xf32>
    %34 = arith.mulf %29, %33 : vector<16x32xf32>
    %35 = vector.broadcast %14 : vector<1x32xf32> to vector<16x32xf32>
    %36 = arith.mulf %34, %35 : vector<16x32xf32>
    %37 = vector.broadcast %16 : vector<1x32xf32> to vector<16x32xf32>
    %38 = arith.addf %36, %37 : vector<16x32xf32>
    %c0_16 = arith.constant 0 : index
    %c0_17 = arith.constant 0 : index
    %c0_18 = arith.constant 0 : index
    %39 = vector.load %arg2[%c0_16, %c0_17, %c0_18] : memref<2x40x2560xf32, #tpu.memory_space<vmem>>, vector<1x32x2560xf32>
    %40 = vector.shape_cast %39 : vector<1x32x2560xf32> to vector<32x2560xf32>
    %cst_19 = arith.constant dense<0.000000e+00> : vector<16x2560xf32>
    %41 = tpu.matmul %38, %40, %cst_19 {dimension_numbers = #tpu.dot_dimension_numbers<[1], [0], [0], [1], [0, 0, 1, 1], [], []>} : vector<16x32xf32>, vector<32x2560xf32>, vector<16x2560xf32> -> vector<16x2560xf32>
    %c0_20 = arith.constant 0 : index
    %c32 = arith.constant 32 : index
    %c0_21 = arith.constant 0 : index
    %42 = vector.load %arg2[%c0_20, %c32, %c0_21] : memref<2x40x2560xf32, #tpu.memory_space<vmem>>, vector<1x1x2560xf32>
    %43 = vector.shape_cast %42 : vector<1x1x2560xf32> to vector<1x2560xf32>
    %44 = vector.broadcast %43 : vector<1x2560xf32> to vector<16x2560xf32>
    %45 = arith.addf %41, %44 : vector<16x2560xf32>
    %46 = vector.extract_strided_slice %45 {offsets = [0, 0], sizes = [16, 128], strides = [1, 1]} : vector<16x2560xf32> to vector<16x128xf32>
    %47 = arith.mulf %46, %11 : vector<16x128xf32>
    %48 = vector.extract_strided_slice %45 {offsets = [0, 1536], sizes = [16, 128], strides = [1, 1]} : vector<16x2560xf32> to vector<16x128xf32>
    %49 = arith.mulf %48, %12 : vector<16x128xf32>
    %50 = arith.addf %47, %49 : vector<16x128xf32>
    %51 = vector.extract_strided_slice %45 {offsets = [0, 512], sizes = [16, 128], strides = [1, 1]} : vector<16x2560xf32> to vector<16x128xf32>
    %52 = arith.mulf %51, %11 : vector<16x128xf32>
    %53 = vector.extract_strided_slice %45 {offsets = [0, 2048], sizes = [16, 128], strides = [1, 1]} : vector<16x2560xf32> to vector<16x128xf32>
    %54 = arith.mulf %53, %12 : vector<16x128xf32>
    %55 = arith.addf %52, %54 : vector<16x128xf32>
    %56 = vector.extract_strided_slice %45 {offsets = [0, 1024], sizes = [16, 128], strides = [1, 1]} : vector<16x2560xf32> to vector<16x128xf32>
    %cst_22 = arith.constant dense<0.000000e+00> : vector<16x16xf32>
    %57 = tpu.matmul %50, %55, %cst_22 {dimension_numbers = #tpu.dot_dimension_numbers<[1], [1], [0], [0], [0, 0, 1, 0], [], []>} : vector<16x128xf32>, vector<16x128xf32>, vector<16x16xf32> -> vector<16x16xf32>
    %58 = arith.addf %57, %8 : vector<16x16xf32>
    %cst_23 = arith.constant dense<0xFF800000> : vector<16xf32>
    %59 = vector.multi_reduction <maximumf>, %58, %cst_23 [1] : vector<16x16xf32> to vector<16xf32>
    %60 = vector.shape_cast %59 : vector<16xf32> to vector<16x1xf32>
    %61 = vector.broadcast %60 : vector<16x1xf32> to vector<16x16xf32>
    %62 = arith.subf %58, %61 : vector<16x16xf32>
    %63 = math.exp %62 : vector<16x16xf32>
    %cst_24 = arith.constant dense<0.000000e+00> : vector<16xf32>
    %64 = vector.multi_reduction <add>, %63, %cst_24 [1] : vector<16x16xf32> to vector<16xf32>
    %65 = vector.shape_cast %64 : vector<16xf32> to vector<16x1xf32>
    %66 = tpu.reciprocal %65 {approx = true} : vector<16x1xf32> -> vector<16x1xf32>
    %67 = vector.broadcast %66 : vector<16x1xf32> to vector<16x16xf32>
    %68 = arith.mulf %63, %67 : vector<16x16xf32>
    %cst_25 = arith.constant dense<0.000000e+00> : vector<16x128xf32>
    %69 = tpu.matmul %68, %56, %cst_25 {dimension_numbers = #tpu.dot_dimension_numbers<[1], [0], [0], [1], [0, 0, 1, 1], [], []>} : vector<16x16xf32>, vector<16x128xf32>, vector<16x128xf32> -> vector<16x128xf32>
    %c0_26 = arith.constant 0 : index
    %c0_27 = arith.constant 0 : index
    %c0_28 = arith.constant 0 : index
    %70 = vector.load %arg3[%c0_26, %c0_27, %c0_28] : memref<2x616x128xf32, #tpu.memory_space<vmem>>, vector<1x128x32xf32>
    %71 = vector.shape_cast %70 : vector<1x128x32xf32> to vector<128x32xf32>
    %cst_29 = arith.constant dense<0.000000e+00> : vector<16x32xf32>
    %72 = tpu.matmul %69, %71, %cst_29 {dimension_numbers = #tpu.dot_dimension_numbers<[1], [0], [0], [1], [0, 0, 1, 1], [], []>} : vector<16x128xf32>, vector<128x32xf32>, vector<16x32xf32> -> vector<16x32xf32>
    %73 = vector.extract_strided_slice %45 {offsets = [0, 128], sizes = [16, 128], strides = [1, 1]} : vector<16x2560xf32> to vector<16x128xf32>
    %74 = arith.mulf %73, %11 : vector<16x128xf32>
    %75 = vector.extract_strided_slice %45 {offsets = [0, 1664], sizes = [16, 128], strides = [1, 1]} : vector<16x2560xf32> to vector<16x128xf32>
    %76 = arith.mulf %75, %12 : vector<16x128xf32>
    %77 = arith.addf %74, %76 : vector<16x128xf32>
    %78 = vector.extract_strided_slice %45 {offsets = [0, 640], sizes = [16, 128], strides = [1, 1]} : vector<16x2560xf32> to vector<16x128xf32>
    %79 = arith.mulf %78, %11 : vector<16x128xf32>
    %80 = vector.extract_strided_slice %45 {offsets = [0, 2176], sizes = [16, 128], strides = [1, 1]} : vector<16x2560xf32> to vector<16x128xf32>
    %81 = arith.mulf %80, %12 : vector<16x128xf32>
    %82 = arith.addf %79, %81 : vector<16x128xf32>
    %83 = vector.extract_strided_slice %45 {offsets = [0, 1152], sizes = [16, 128], strides = [1, 1]} : vector<16x2560xf32> to vector<16x128xf32>
    %cst_30 = arith.constant dense<0.000000e+00> : vector<16x16xf32>
    %84 = tpu.matmul %77, %82, %cst_30 {dimension_numbers = #tpu.dot_dimension_numbers<[1], [1], [0], [0], [0, 0, 1, 0], [], []>} : vector<16x128xf32>, vector<16x128xf32>, vector<16x16xf32> -> vector<16x16xf32>
    %85 = arith.addf %84, %8 : vector<16x16xf32>
    %cst_31 = arith.constant dense<0xFF800000> : vector<16xf32>
    %86 = vector.multi_reduction <maximumf>, %85, %cst_31 [1] : vector<16x16xf32> to vector<16xf32>
    %87 = vector.shape_cast %86 : vector<16xf32> to vector<16x1xf32>
    %88 = vector.broadcast %87 : vector<16x1xf32> to vector<16x16xf32>
    %89 = arith.subf %85, %88 : vector<16x16xf32>
    %90 = math.exp %89 : vector<16x16xf32>
    %cst_32 = arith.constant dense<0.000000e+00> : vector<16xf32>
    %91 = vector.multi_reduction <add>, %90, %cst_32 [1] : vector<16x16xf32> to vector<16xf32>
    %92 = vector.shape_cast %91 : vector<16xf32> to vector<16x1xf32>
    %93 = tpu.reciprocal %92 {approx = true} : vector<16x1xf32> -> vector<16x1xf32>
    %94 = vector.broadcast %93 : vector<16x1xf32> to vector<16x16xf32>
    %95 = arith.mulf %90, %94 : vector<16x16xf32>
    %cst_33 = arith.constant dense<0.000000e+00> : vector<16x128xf32>
    %96 = tpu.matmul %95, %83, %cst_33 {dimension_numbers = #tpu.dot_dimension_numbers<[1], [0], [0], [1], [0, 0, 1, 1], [], []>} : vector<16x16xf32>, vector<16x128xf32>, vector<16x128xf32> -> vector<16x128xf32>
    %c0_34 = arith.constant 0 : index
    %c128 = arith.constant 128 : index
    %c0_35 = arith.constant 0 : index
    %97 = vector.load %arg3[%c0_34, %c128, %c0_35] : memref<2x616x128xf32, #tpu.memory_space<vmem>>, vector<1x128x32xf32>
    %98 = vector.shape_cast %97 : vector<1x128x32xf32> to vector<128x32xf32>
    %cst_36 = arith.constant dense<0.000000e+00> : vector<16x32xf32>
    %99 = tpu.matmul %96, %98, %cst_36 {dimension_numbers = #tpu.dot_dimension_numbers<[1], [0], [0], [1], [0, 0, 1, 1], [], []>} : vector<16x128xf32>, vector<128x32xf32>, vector<16x32xf32> -> vector<16x32xf32>
    %100 = arith.addf %72, %99 : vector<16x32xf32>
    %101 = vector.extract_strided_slice %45 {offsets = [0, 256], sizes = [16, 128], strides = [1, 1]} : vector<16x2560xf32> to vector<16x128xf32>
    %102 = arith.mulf %101, %11 : vector<16x128xf32>
    %103 = vector.extract_strided_slice %45 {offsets = [0, 1792], sizes = [16, 128], strides = [1, 1]} : vector<16x2560xf32> to vector<16x128xf32>
    %104 = arith.mulf %103, %12 : vector<16x128xf32>
    %105 = arith.addf %102, %104 : vector<16x128xf32>
    %106 = vector.extract_strided_slice %45 {offsets = [0, 768], sizes = [16, 128], strides = [1, 1]} : vector<16x2560xf32> to vector<16x128xf32>
    %107 = arith.mulf %106, %11 : vector<16x128xf32>
    %108 = vector.extract_strided_slice %45 {offsets = [0, 2304], sizes = [16, 128], strides = [1, 1]} : vector<16x2560xf32> to vector<16x128xf32>
    %109 = arith.mulf %108, %12 : vector<16x128xf32>
    %110 = arith.addf %107, %109 : vector<16x128xf32>
    %111 = vector.extract_strided_slice %45 {offsets = [0, 1280], sizes = [16, 128], strides = [1, 1]} : vector<16x2560xf32> to vector<16x128xf32>
    %cst_37 = arith.constant dense<0.000000e+00> : vector<16x16xf32>
    %112 = tpu.matmul %105, %110, %cst_37 {dimension_numbers = #tpu.dot_dimension_numbers<[1], [1], [0], [0], [0, 0, 1, 0], [], []>} : vector<16x128xf32>, vector<16x128xf32>, vector<16x16xf32> -> vector<16x16xf32>
    %113 = arith.addf %112, %8 : vector<16x16xf32>
    %cst_38 = arith.constant dense<0xFF800000> : vector<16xf32>
    %114 = vector.multi_reduction <maximumf>, %113, %cst_38 [1] : vector<16x16xf32> to vector<16xf32>
    %115 = vector.shape_cast %114 : vector<16xf32> to vector<16x1xf32>
    %116 = vector.broadcast %115 : vector<16x1xf32> to vector<16x16xf32>
    %117 = arith.subf %113, %116 : vector<16x16xf32>
    %118 = math.exp %117 : vector<16x16xf32>
    %cst_39 = arith.constant dense<0.000000e+00> : vector<16xf32>
    %119 = vector.multi_reduction <add>, %118, %cst_39 [1] : vector<16x16xf32> to vector<16xf32>
    %120 = vector.shape_cast %119 : vector<16xf32> to vector<16x1xf32>
    %121 = tpu.reciprocal %120 {approx = true} : vector<16x1xf32> -> vector<16x1xf32>
    %122 = vector.broadcast %121 : vector<16x1xf32> to vector<16x16xf32>
    %123 = arith.mulf %118, %122 : vector<16x16xf32>
    %cst_40 = arith.constant dense<0.000000e+00> : vector<16x128xf32>
    %124 = tpu.matmul %123, %111, %cst_40 {dimension_numbers = #tpu.dot_dimension_numbers<[1], [0], [0], [1], [0, 0, 1, 1], [], []>} : vector<16x16xf32>, vector<16x128xf32>, vector<16x128xf32> -> vector<16x128xf32>
    %c0_41 = arith.constant 0 : index
    %c256 = arith.constant 256 : index
    %c0_42 = arith.constant 0 : index
    %125 = vector.load %arg3[%c0_41, %c256, %c0_42] : memref<2x616x128xf32, #tpu.memory_space<vmem>>, vector<1x128x32xf32>
    %126 = vector.shape_cast %125 : vector<1x128x32xf32> to vector<128x32xf32>
    %cst_43 = arith.constant dense<0.000000e+00> : vector<16x32xf32>
    %127 = tpu.matmul %124, %126, %cst_43 {dimension_numbers = #tpu.dot_dimension_numbers<[1], [0], [0], [1], [0, 0, 1, 1], [], []>} : vector<16x128xf32>, vector<128x32xf32>, vector<16x32xf32> -> vector<16x32xf32>
    %128 = arith.addf %100, %127 : vector<16x32xf32>
    %129 = vector.extract_strided_slice %45 {offsets = [0, 384], sizes = [16, 128], strides = [1, 1]} : vector<16x2560xf32> to vector<16x128xf32>
    %130 = arith.mulf %129, %11 : vector<16x128xf32>
    %131 = vector.extract_strided_slice %45 {offsets = [0, 1920], sizes = [16, 128], strides = [1, 1]} : vector<16x2560xf32> to vector<16x128xf32>
    %132 = arith.mulf %131, %12 : vector<16x128xf32>
    %133 = arith.addf %130, %132 : vector<16x128xf32>
    %134 = vector.extract_strided_slice %45 {offsets = [0, 896], sizes = [16, 128], strides = [1, 1]} : vector<16x2560xf32> to vector<16x128xf32>
    %135 = arith.mulf %134, %11 : vector<16x128xf32>
    %136 = vector.extract_strided_slice %45 {offsets = [0, 2432], sizes = [16, 128], strides = [1, 1]} : vector<16x2560xf32> to vector<16x128xf32>
    %137 = arith.mulf %136, %12 : vector<16x128xf32>
    %138 = arith.addf %135, %137 : vector<16x128xf32>
    %139 = vector.extract_strided_slice %45 {offsets = [0, 1408], sizes = [16, 128], strides = [1, 1]} : vector<16x2560xf32> to vector<16x128xf32>
    %cst_44 = arith.constant dense<0.000000e+00> : vector<16x16xf32>
    %140 = tpu.matmul %133, %138, %cst_44 {dimension_numbers = #tpu.dot_dimension_numbers<[1], [1], [0], [0], [0, 0, 1, 0], [], []>} : vector<16x128xf32>, vector<16x128xf32>, vector<16x16xf32> -> vector<16x16xf32>
    %141 = arith.addf %140, %8 : vector<16x16xf32>
    %cst_45 = arith.constant dense<0xFF800000> : vector<16xf32>
    %142 = vector.multi_reduction <maximumf>, %141, %cst_45 [1] : vector<16x16xf32> to vector<16xf32>
    %143 = vector.shape_cast %142 : vector<16xf32> to vector<16x1xf32>
    %144 = vector.broadcast %143 : vector<16x1xf32> to vector<16x16xf32>
    %145 = arith.subf %141, %144 : vector<16x16xf32>
    %146 = math.exp %145 : vector<16x16xf32>
    %cst_46 = arith.constant dense<0.000000e+00> : vector<16xf32>
    %147 = vector.multi_reduction <add>, %146, %cst_46 [1] : vector<16x16xf32> to vector<16xf32>
    %148 = vector.shape_cast %147 : vector<16xf32> to vector<16x1xf32>
    %149 = tpu.reciprocal %148 {approx = true} : vector<16x1xf32> -> vector<16x1xf32>
    %150 = vector.broadcast %149 : vector<16x1xf32> to vector<16x16xf32>
    %151 = arith.mulf %146, %150 : vector<16x16xf32>
    %cst_47 = arith.constant dense<0.000000e+00> : vector<16x128xf32>
    %152 = tpu.matmul %151, %139, %cst_47 {dimension_numbers = #tpu.dot_dimension_numbers<[1], [0], [0], [1], [0, 0, 1, 1], [], []>} : vector<16x16xf32>, vector<16x128xf32>, vector<16x128xf32> -> vector<16x128xf32>
    %c0_48 = arith.constant 0 : index
    %c384 = arith.constant 384 : index
    %c0_49 = arith.constant 0 : index
    %153 = vector.load %arg3[%c0_48, %c384, %c0_49] : memref<2x616x128xf32, #tpu.memory_space<vmem>>, vector<1x128x32xf32>
    %154 = vector.shape_cast %153 : vector<1x128x32xf32> to vector<128x32xf32>
    %cst_50 = arith.constant dense<0.000000e+00> : vector<16x32xf32>
    %155 = tpu.matmul %152, %154, %cst_50 {dimension_numbers = #tpu.dot_dimension_numbers<[1], [0], [0], [1], [0, 0, 1, 1], [], []>} : vector<16x128xf32>, vector<128x32xf32>, vector<16x32xf32> -> vector<16x32xf32>
    %156 = arith.addf %128, %155 : vector<16x32xf32>
    %c0_51 = arith.constant 0 : index
    %c612 = arith.constant 612 : index
    %c0_52 = arith.constant 0 : index
    %157 = vector.load %arg3[%c0_51, %c612, %c0_52] : memref<2x616x128xf32, #tpu.memory_space<vmem>>, vector<1x1x32xf32>
    %158 = vector.shape_cast %157 : vector<1x1x32xf32> to vector<1x32xf32>
    %159 = vector.broadcast %158 : vector<1x32xf32> to vector<16x32xf32>
    %160 = arith.addf %156, %159 : vector<16x32xf32>
    %161 = arith.addf %160, %7 : vector<16x32xf32>
    %c0_53 = arith.constant 0 : index
    %c610 = arith.constant 610 : index
    %c0_54 = arith.constant 0 : index
    %162 = vector.load %arg3[%c0_53, %c610, %c0_54] : memref<2x616x128xf32, #tpu.memory_space<vmem>>, vector<1x1x32xf32>
    %163 = vector.shape_cast %162 : vector<1x1x32xf32> to vector<1x32xf32>
    %c0_55 = arith.constant 0 : index
    %c611 = arith.constant 611 : index
    %c0_56 = arith.constant 0 : index
    %164 = vector.load %arg3[%c0_55, %c611, %c0_56] : memref<2x616x128xf32, #tpu.memory_space<vmem>>, vector<1x1x32xf32>
    %165 = vector.shape_cast %164 : vector<1x1x32xf32> to vector<1x32xf32>
    %cst_57 = arith.constant dense<0.000000e+00> : vector<16xf32>
    %166 = vector.multi_reduction <add>, %161, %cst_57 [1] : vector<16x32xf32> to vector<16xf32>
    %167 = vector.shape_cast %166 : vector<16xf32> to vector<16x1xf32>
    %cst_58 = arith.constant 3.200000e+01 : f32
    %168 = vector.broadcast %cst_58 : f32 to vector<16x1xf32>
    %169 = arith.divf %167, %168 : vector<16x1xf32>
    %170 = vector.broadcast %169 : vector<16x1xf32> to vector<16x32xf32>
    %171 = arith.subf %161, %170 : vector<16x32xf32>
    %172 = arith.mulf %171, %171 : vector<16x32xf32>
    %cst_59 = arith.constant dense<0.000000e+00> : vector<16xf32>
    %173 = vector.multi_reduction <add>, %172, %cst_59 [1] : vector<16x32xf32> to vector<16xf32>
    %174 = vector.shape_cast %173 : vector<16xf32> to vector<16x1xf32>
    %cst_60 = arith.constant 3.200000e+01 : f32
    %175 = vector.broadcast %cst_60 : f32 to vector<16x1xf32>
    %176 = arith.divf %174, %175 : vector<16x1xf32>
    %177 = vector.broadcast %169 : vector<16x1xf32> to vector<16x32xf32>
    %178 = arith.subf %161, %177 : vector<16x32xf32>
    %cst_61 = arith.constant 9.99999974E-6 : f32
    %179 = vector.broadcast %cst_61 : f32 to vector<16x1xf32>
    %180 = arith.addf %176, %179 : vector<16x1xf32>
    %181 = math.rsqrt %180 : vector<16x1xf32>
    %182 = vector.broadcast %181 : vector<16x1xf32> to vector<16x32xf32>
    %183 = arith.mulf %178, %182 : vector<16x32xf32>
    %184 = vector.broadcast %163 : vector<1x32xf32> to vector<16x32xf32>
    %185 = arith.mulf %183, %184 : vector<16x32xf32>
    %186 = vector.broadcast %165 : vector<1x32xf32> to vector<16x32xf32>
    %187 = arith.addf %185, %186 : vector<16x32xf32>
    %c0_62 = arith.constant 0 : index
    %c512 = arith.constant 512 : index
    %c0_63 = arith.constant 0 : index
    %188 = vector.load %arg3[%c0_62, %c512, %c0_63] : memref<2x616x128xf32, #tpu.memory_space<vmem>>, vector<1x32x64xf32>
    %189 = vector.shape_cast %188 : vector<1x32x64xf32> to vector<32x64xf32>
    %cst_64 = arith.constant dense<0.000000e+00> : vector<16x64xf32>
    %190 = tpu.matmul %187, %189, %cst_64 {dimension_numbers = #tpu.dot_dimension_numbers<[1], [0], [0], [1], [0, 0, 1, 1], [], []>} : vector<16x32xf32>, vector<32x64xf32>, vector<16x64xf32> -> vector<16x64xf32>
    %c0_65 = arith.constant 0 : index
    %c613 = arith.constant 613 : index
    %c0_66 = arith.constant 0 : index
    %191 = vector.load %arg3[%c0_65, %c613, %c0_66] : memref<2x616x128xf32, #tpu.memory_space<vmem>>, vector<1x1x64xf32>
    %192 = vector.shape_cast %191 : vector<1x1x64xf32> to vector<1x64xf32>
    %193 = vector.broadcast %192 : vector<1x64xf32> to vector<16x64xf32>
    %194 = arith.addf %190, %193 : vector<16x64xf32>
    %195 = arith.mulf %194, %194 : vector<16x64xf32>
    %196 = arith.mulf %194, %195 : vector<16x64xf32>
    %cst_67 = arith.constant 4.471500e-02 : f32
    %197 = vector.broadcast %cst_67 : f32 to vector<16x64xf32>
    %198 = arith.mulf %197, %196 : vector<16x64xf32>
    %199 = arith.addf %194, %198 : vector<16x64xf32>
    %cst_68 = arith.constant 0.797884583 : f32
    %200 = vector.broadcast %cst_68 : f32 to vector<16x64xf32>
    %201 = arith.mulf %200, %199 : vector<16x64xf32>
    %202 = math.tanh %201 : vector<16x64xf32>
    %cst_69 = arith.constant 1.000000e+00 : f32
    %203 = vector.broadcast %cst_69 : f32 to vector<16x64xf32>
    %204 = arith.addf %203, %202 : vector<16x64xf32>
    %cst_70 = arith.constant 5.000000e-01 : f32
    %205 = vector.broadcast %cst_70 : f32 to vector<16x64xf32>
    %206 = arith.mulf %205, %204 : vector<16x64xf32>
    %207 = arith.mulf %194, %206 : vector<16x64xf32>
    %c0_71 = arith.constant 0 : index
    %c544 = arith.constant 544 : index
    %c0_72 = arith.constant 0 : index
    %208 = vector.load %arg3[%c0_71, %c544, %c0_72] : memref<2x616x128xf32, #tpu.memory_space<vmem>>, vector<1x64x32xf32>
    %209 = vector.shape_cast %208 : vector<1x64x32xf32> to vector<64x32xf32>
    %cst_73 = arith.constant dense<0.000000e+00> : vector<16x32xf32>
    %210 = tpu.matmul %207, %209, %cst_73 {dimension_numbers = #tpu.dot_dimension_numbers<[1], [0], [0], [1], [0, 0, 1, 1], [], []>} : vector<16x64xf32>, vector<64x32xf32>, vector<16x32xf32> -> vector<16x32xf32>
    %c0_74 = arith.constant 0 : index
    %c614 = arith.constant 614 : index
    %c0_75 = arith.constant 0 : index
    %211 = vector.load %arg3[%c0_74, %c614, %c0_75] : memref<2x616x128xf32, #tpu.memory_space<vmem>>, vector<1x1x32xf32>
    %212 = vector.shape_cast %211 : vector<1x1x32xf32> to vector<1x32xf32>
    %213 = vector.broadcast %212 : vector<1x32xf32> to vector<16x32xf32>
    %214 = arith.addf %210, %213 : vector<16x32xf32>
    %215 = arith.addf %214, %161 : vector<16x32xf32>
    %c1 = arith.constant 1 : index
    %c608_76 = arith.constant 608 : index
    %c0_77 = arith.constant 0 : index
    %216 = vector.load %arg3[%c1, %c608_76, %c0_77] : memref<2x616x128xf32, #tpu.memory_space<vmem>>, vector<1x1x32xf32>
    %217 = vector.shape_cast %216 : vector<1x1x32xf32> to vector<1x32xf32>
    %c1_78 = arith.constant 1 : index
    %c609_79 = arith.constant 609 : index
    %c0_80 = arith.constant 0 : index
    %218 = vector.load %arg3[%c1_78, %c609_79, %c0_80] : memref<2x616x128xf32, #tpu.memory_space<vmem>>, vector<1x1x32xf32>
    %219 = vector.shape_cast %218 : vector<1x1x32xf32> to vector<1x32xf32>
    %cst_81 = arith.constant dense<0.000000e+00> : vector<16xf32>
    %220 = vector.multi_reduction <add>, %215, %cst_81 [1] : vector<16x32xf32> to vector<16xf32>
    %221 = vector.shape_cast %220 : vector<16xf32> to vector<16x1xf32>
    %cst_82 = arith.constant 3.200000e+01 : f32
    %222 = vector.broadcast %cst_82 : f32 to vector<16x1xf32>
    %223 = arith.divf %221, %222 : vector<16x1xf32>
    %224 = vector.broadcast %223 : vector<16x1xf32> to vector<16x32xf32>
    %225 = arith.subf %215, %224 : vector<16x32xf32>
    %226 = arith.mulf %225, %225 : vector<16x32xf32>
    %cst_83 = arith.constant dense<0.000000e+00> : vector<16xf32>
    %227 = vector.multi_reduction <add>, %226, %cst_83 [1] : vector<16x32xf32> to vector<16xf32>
    %228 = vector.shape_cast %227 : vector<16xf32> to vector<16x1xf32>
    %cst_84 = arith.constant 3.200000e+01 : f32
    %229 = vector.broadcast %cst_84 : f32 to vector<16x1xf32>
    %230 = arith.divf %228, %229 : vector<16x1xf32>
    %231 = vector.broadcast %223 : vector<16x1xf32> to vector<16x32xf32>
    %232 = arith.subf %215, %231 : vector<16x32xf32>
    %cst_85 = arith.constant 9.99999974E-6 : f32
    %233 = vector.broadcast %cst_85 : f32 to vector<16x1xf32>
    %234 = arith.addf %230, %233 : vector<16x1xf32>
    %235 = math.rsqrt %234 : vector<16x1xf32>
    %236 = vector.broadcast %235 : vector<16x1xf32> to vector<16x32xf32>
    %237 = arith.mulf %232, %236 : vector<16x32xf32>
    %238 = vector.broadcast %217 : vector<1x32xf32> to vector<16x32xf32>
    %239 = arith.mulf %237, %238 : vector<16x32xf32>
    %240 = vector.broadcast %219 : vector<1x32xf32> to vector<16x32xf32>
    %241 = arith.addf %239, %240 : vector<16x32xf32>
    %c1_86 = arith.constant 1 : index
    %c0_87 = arith.constant 0 : index
    %c0_88 = arith.constant 0 : index
    %242 = vector.load %arg2[%c1_86, %c0_87, %c0_88] : memref<2x40x2560xf32, #tpu.memory_space<vmem>>, vector<1x32x2560xf32>
    %243 = vector.shape_cast %242 : vector<1x32x2560xf32> to vector<32x2560xf32>
    %cst_89 = arith.constant dense<0.000000e+00> : vector<16x2560xf32>
    %244 = tpu.matmul %241, %243, %cst_89 {dimension_numbers = #tpu.dot_dimension_numbers<[1], [0], [0], [1], [0, 0, 1, 1], [], []>} : vector<16x32xf32>, vector<32x2560xf32>, vector<16x2560xf32> -> vector<16x2560xf32>
    %c1_90 = arith.constant 1 : index
    %c32_91 = arith.constant 32 : index
    %c0_92 = arith.constant 0 : index
    %245 = vector.load %arg2[%c1_90, %c32_91, %c0_92] : memref<2x40x2560xf32, #tpu.memory_space<vmem>>, vector<1x1x2560xf32>
    %246 = vector.shape_cast %245 : vector<1x1x2560xf32> to vector<1x2560xf32>
    %247 = vector.broadcast %246 : vector<1x2560xf32> to vector<16x2560xf32>
    %248 = arith.addf %244, %247 : vector<16x2560xf32>
    %249 = vector.extract_strided_slice %248 {offsets = [0, 0], sizes = [16, 128], strides = [1, 1]} : vector<16x2560xf32> to vector<16x128xf32>
    %250 = arith.mulf %249, %11 : vector<16x128xf32>
    %251 = vector.extract_strided_slice %248 {offsets = [0, 1536], sizes = [16, 128], strides = [1, 1]} : vector<16x2560xf32> to vector<16x128xf32>
    %252 = arith.mulf %251, %12 : vector<16x128xf32>
    %253 = arith.addf %250, %252 : vector<16x128xf32>
    %254 = vector.extract_strided_slice %248 {offsets = [0, 512], sizes = [16, 128], strides = [1, 1]} : vector<16x2560xf32> to vector<16x128xf32>
    %255 = arith.mulf %254, %11 : vector<16x128xf32>
    %256 = vector.extract_strided_slice %248 {offsets = [0, 2048], sizes = [16, 128], strides = [1, 1]} : vector<16x2560xf32> to vector<16x128xf32>
    %257 = arith.mulf %256, %12 : vector<16x128xf32>
    %258 = arith.addf %255, %257 : vector<16x128xf32>
    %259 = vector.extract_strided_slice %248 {offsets = [0, 1024], sizes = [16, 128], strides = [1, 1]} : vector<16x2560xf32> to vector<16x128xf32>
    %cst_93 = arith.constant dense<0.000000e+00> : vector<16x16xf32>
    %260 = tpu.matmul %253, %258, %cst_93 {dimension_numbers = #tpu.dot_dimension_numbers<[1], [1], [0], [0], [0, 0, 1, 0], [], []>} : vector<16x128xf32>, vector<16x128xf32>, vector<16x16xf32> -> vector<16x16xf32>
    %261 = arith.addf %260, %8 : vector<16x16xf32>
    %cst_94 = arith.constant dense<0xFF800000> : vector<16xf32>
    %262 = vector.multi_reduction <maximumf>, %261, %cst_94 [1] : vector<16x16xf32> to vector<16xf32>
    %263 = vector.shape_cast %262 : vector<16xf32> to vector<16x1xf32>
    %264 = vector.broadcast %263 : vector<16x1xf32> to vector<16x16xf32>
    %265 = arith.subf %261, %264 : vector<16x16xf32>
    %266 = math.exp %265 : vector<16x16xf32>
    %cst_95 = arith.constant dense<0.000000e+00> : vector<16xf32>
    %267 = vector.multi_reduction <add>, %266, %cst_95 [1] : vector<16x16xf32> to vector<16xf32>
    %268 = vector.shape_cast %267 : vector<16xf32> to vector<16x1xf32>
    %269 = tpu.reciprocal %268 {approx = true} : vector<16x1xf32> -> vector<16x1xf32>
    %270 = vector.broadcast %269 : vector<16x1xf32> to vector<16x16xf32>
    %271 = arith.mulf %266, %270 : vector<16x16xf32>
    %cst_96 = arith.constant dense<0.000000e+00> : vector<16x128xf32>
    %272 = tpu.matmul %271, %259, %cst_96 {dimension_numbers = #tpu.dot_dimension_numbers<[1], [0], [0], [1], [0, 0, 1, 1], [], []>} : vector<16x16xf32>, vector<16x128xf32>, vector<16x128xf32> -> vector<16x128xf32>
    %c1_97 = arith.constant 1 : index
    %c0_98 = arith.constant 0 : index
    %c0_99 = arith.constant 0 : index
    %273 = vector.load %arg3[%c1_97, %c0_98, %c0_99] : memref<2x616x128xf32, #tpu.memory_space<vmem>>, vector<1x128x32xf32>
    %274 = vector.shape_cast %273 : vector<1x128x32xf32> to vector<128x32xf32>
    %cst_100 = arith.constant dense<0.000000e+00> : vector<16x32xf32>
    %275 = tpu.matmul %272, %274, %cst_100 {dimension_numbers = #tpu.dot_dimension_numbers<[1], [0], [0], [1], [0, 0, 1, 1], [], []>} : vector<16x128xf32>, vector<128x32xf32>, vector<16x32xf32> -> vector<16x32xf32>
    %276 = vector.extract_strided_slice %248 {offsets = [0, 128], sizes = [16, 128], strides = [1, 1]} : vector<16x2560xf32> to vector<16x128xf32>
    %277 = arith.mulf %276, %11 : vector<16x128xf32>
    %278 = vector.extract_strided_slice %248 {offsets = [0, 1664], sizes = [16, 128], strides = [1, 1]} : vector<16x2560xf32> to vector<16x128xf32>
    %279 = arith.mulf %278, %12 : vector<16x128xf32>
    %280 = arith.addf %277, %279 : vector<16x128xf32>
    %281 = vector.extract_strided_slice %248 {offsets = [0, 640], sizes = [16, 128], strides = [1, 1]} : vector<16x2560xf32> to vector<16x128xf32>
    %282 = arith.mulf %281, %11 : vector<16x128xf32>
    %283 = vector.extract_strided_slice %248 {offsets = [0, 2176], sizes = [16, 128], strides = [1, 1]} : vector<16x2560xf32> to vector<16x128xf32>
    %284 = arith.mulf %283, %12 : vector<16x128xf32>
    %285 = arith.addf %282, %284 : vector<16x128xf32>
    %286 = vector.extract_strided_slice %248 {offsets = [0, 1152], sizes = [16, 128], strides = [1, 1]} : vector<16x2560xf32> to vector<16x128xf32>
    %cst_101 = arith.constant dense<0.000000e+00> : vector<16x16xf32>
    %287 = tpu.matmul %280, %285, %cst_101 {dimension_numbers = #tpu.dot_dimension_numbers<[1], [1], [0], [0], [0, 0, 1, 0], [], []>} : vector<16x128xf32>, vector<16x128xf32>, vector<16x16xf32> -> vector<16x16xf32>
    %288 = arith.addf %287, %8 : vector<16x16xf32>
    %cst_102 = arith.constant dense<0xFF800000> : vector<16xf32>
    %289 = vector.multi_reduction <maximumf>, %288, %cst_102 [1] : vector<16x16xf32> to vector<16xf32>
    %290 = vector.shape_cast %289 : vector<16xf32> to vector<16x1xf32>
    %291 = vector.broadcast %290 : vector<16x1xf32> to vector<16x16xf32>
    %292 = arith.subf %288, %291 : vector<16x16xf32>
    %293 = math.exp %292 : vector<16x16xf32>
    %cst_103 = arith.constant dense<0.000000e+00> : vector<16xf32>
    %294 = vector.multi_reduction <add>, %293, %cst_103 [1] : vector<16x16xf32> to vector<16xf32>
    %295 = vector.shape_cast %294 : vector<16xf32> to vector<16x1xf32>
    %296 = tpu.reciprocal %295 {approx = true} : vector<16x1xf32> -> vector<16x1xf32>
    %297 = vector.broadcast %296 : vector<16x1xf32> to vector<16x16xf32>
    %298 = arith.mulf %293, %297 : vector<16x16xf32>
    %cst_104 = arith.constant dense<0.000000e+00> : vector<16x128xf32>
    %299 = tpu.matmul %298, %286, %cst_104 {dimension_numbers = #tpu.dot_dimension_numbers<[1], [0], [0], [1], [0, 0, 1, 1], [], []>} : vector<16x16xf32>, vector<16x128xf32>, vector<16x128xf32> -> vector<16x128xf32>
    %c1_105 = arith.constant 1 : index
    %c128_106 = arith.constant 128 : index
    %c0_107 = arith.constant 0 : index
    %300 = vector.load %arg3[%c1_105, %c128_106, %c0_107] : memref<2x616x128xf32, #tpu.memory_space<vmem>>, vector<1x128x32xf32>
    %301 = vector.shape_cast %300 : vector<1x128x32xf32> to vector<128x32xf32>
    %cst_108 = arith.constant dense<0.000000e+00> : vector<16x32xf32>
    %302 = tpu.matmul %299, %301, %cst_108 {dimension_numbers = #tpu.dot_dimension_numbers<[1], [0], [0], [1], [0, 0, 1, 1], [], []>} : vector<16x128xf32>, vector<128x32xf32>, vector<16x32xf32> -> vector<16x32xf32>
    %303 = arith.addf %275, %302 : vector<16x32xf32>
    %304 = vector.extract_strided_slice %248 {offsets = [0, 256], sizes = [16, 128], strides = [1, 1]} : vector<16x2560xf32> to vector<16x128xf32>
    %305 = arith.mulf %304, %11 : vector<16x128xf32>
    %306 = vector.extract_strided_slice %248 {offsets = [0, 1792], sizes = [16, 128], strides = [1, 1]} : vector<16x2560xf32> to vector<16x128xf32>
    %307 = arith.mulf %306, %12 : vector<16x128xf32>
    %308 = arith.addf %305, %307 : vector<16x128xf32>
    %309 = vector.extract_strided_slice %248 {offsets = [0, 768], sizes = [16, 128], strides = [1, 1]} : vector<16x2560xf32> to vector<16x128xf32>
    %310 = arith.mulf %309, %11 : vector<16x128xf32>
    %311 = vector.extract_strided_slice %248 {offsets = [0, 2304], sizes = [16, 128], strides = [1, 1]} : vector<16x2560xf32> to vector<16x128xf32>
    %312 = arith.mulf %311, %12 : vector<16x128xf32>
    %313 = arith.addf %310, %312 : vector<16x128xf32>
    %314 = vector.extract_strided_slice %248 {offsets = [0, 1280], sizes = [16, 128], strides = [1, 1]} : vector<16x2560xf32> to vector<16x128xf32>
    %cst_109 = arith.constant dense<0.000000e+00> : vector<16x16xf32>
    %315 = tpu.matmul %308, %313, %cst_109 {dimension_numbers = #tpu.dot_dimension_numbers<[1], [1], [0], [0], [0, 0, 1, 0], [], []>} : vector<16x128xf32>, vector<16x128xf32>, vector<16x16xf32> -> vector<16x16xf32>
    %316 = arith.addf %315, %8 : vector<16x16xf32>
    %cst_110 = arith.constant dense<0xFF800000> : vector<16xf32>
    %317 = vector.multi_reduction <maximumf>, %316, %cst_110 [1] : vector<16x16xf32> to vector<16xf32>
    %318 = vector.shape_cast %317 : vector<16xf32> to vector<16x1xf32>
    %319 = vector.broadcast %318 : vector<16x1xf32> to vector<16x16xf32>
    %320 = arith.subf %316, %319 : vector<16x16xf32>
    %321 = math.exp %320 : vector<16x16xf32>
    %cst_111 = arith.constant dense<0.000000e+00> : vector<16xf32>
    %322 = vector.multi_reduction <add>, %321, %cst_111 [1] : vector<16x16xf32> to vector<16xf32>
    %323 = vector.shape_cast %322 : vector<16xf32> to vector<16x1xf32>
    %324 = tpu.reciprocal %323 {approx = true} : vector<16x1xf32> -> vector<16x1xf32>
    %325 = vector.broadcast %324 : vector<16x1xf32> to vector<16x16xf32>
    %326 = arith.mulf %321, %325 : vector<16x16xf32>
    %cst_112 = arith.constant dense<0.000000e+00> : vector<16x128xf32>
    %327 = tpu.matmul %326, %314, %cst_112 {dimension_numbers = #tpu.dot_dimension_numbers<[1], [0], [0], [1], [0, 0, 1, 1], [], []>} : vector<16x16xf32>, vector<16x128xf32>, vector<16x128xf32> -> vector<16x128xf32>
    %c1_113 = arith.constant 1 : index
    %c256_114 = arith.constant 256 : index
    %c0_115 = arith.constant 0 : index
    %328 = vector.load %arg3[%c1_113, %c256_114, %c0_115] : memref<2x616x128xf32, #tpu.memory_space<vmem>>, vector<1x128x32xf32>
    %329 = vector.shape_cast %328 : vector<1x128x32xf32> to vector<128x32xf32>
    %cst_116 = arith.constant dense<0.000000e+00> : vector<16x32xf32>
    %330 = tpu.matmul %327, %329, %cst_116 {dimension_numbers = #tpu.dot_dimension_numbers<[1], [0], [0], [1], [0, 0, 1, 1], [], []>} : vector<16x128xf32>, vector<128x32xf32>, vector<16x32xf32> -> vector<16x32xf32>
    %331 = arith.addf %303, %330 : vector<16x32xf32>
    %332 = vector.extract_strided_slice %248 {offsets = [0, 384], sizes = [16, 128], strides = [1, 1]} : vector<16x2560xf32> to vector<16x128xf32>
    %333 = arith.mulf %332, %11 : vector<16x128xf32>
    %334 = vector.extract_strided_slice %248 {offsets = [0, 1920], sizes = [16, 128], strides = [1, 1]} : vector<16x2560xf32> to vector<16x128xf32>
    %335 = arith.mulf %334, %12 : vector<16x128xf32>
    %336 = arith.addf %333, %335 : vector<16x128xf32>
    %337 = vector.extract_strided_slice %248 {offsets = [0, 896], sizes = [16, 128], strides = [1, 1]} : vector<16x2560xf32> to vector<16x128xf32>
    %338 = arith.mulf %337, %11 : vector<16x128xf32>
    %339 = vector.extract_strided_slice %248 {offsets = [0, 2432], sizes = [16, 128], strides = [1, 1]} : vector<16x2560xf32> to vector<16x128xf32>
    %340 = arith.mulf %339, %12 : vector<16x128xf32>
    %341 = arith.addf %338, %340 : vector<16x128xf32>
    %342 = vector.extract_strided_slice %248 {offsets = [0, 1408], sizes = [16, 128], strides = [1, 1]} : vector<16x2560xf32> to vector<16x128xf32>
    %cst_117 = arith.constant dense<0.000000e+00> : vector<16x16xf32>
    %343 = tpu.matmul %336, %341, %cst_117 {dimension_numbers = #tpu.dot_dimension_numbers<[1], [1], [0], [0], [0, 0, 1, 0], [], []>} : vector<16x128xf32>, vector<16x128xf32>, vector<16x16xf32> -> vector<16x16xf32>
    %344 = arith.addf %343, %8 : vector<16x16xf32>
    %cst_118 = arith.constant dense<0xFF800000> : vector<16xf32>
    %345 = vector.multi_reduction <maximumf>, %344, %cst_118 [1] : vector<16x16xf32> to vector<16xf32>
    %346 = vector.shape_cast %345 : vector<16xf32> to vector<16x1xf32>
    %347 = vector.broadcast %346 : vector<16x1xf32> to vector<16x16xf32>
    %348 = arith.subf %344, %347 : vector<16x16xf32>
    %349 = math.exp %348 : vector<16x16xf32>
    %cst_119 = arith.constant dense<0.000000e+00> : vector<16xf32>
    %350 = vector.multi_reduction <add>, %349, %cst_119 [1] : vector<16x16xf32> to vector<16xf32>
    %351 = vector.shape_cast %350 : vector<16xf32> to vector<16x1xf32>
    %352 = tpu.reciprocal %351 {approx = true} : vector<16x1xf32> -> vector<16x1xf32>
    %353 = vector.broadcast %352 : vector<16x1xf32> to vector<16x16xf32>
    %354 = arith.mulf %349, %353 : vector<16x16xf32>
    %cst_120 = arith.constant dense<0.000000e+00> : vector<16x128xf32>
    %355 = tpu.matmul %354, %342, %cst_120 {dimension_numbers = #tpu.dot_dimension_numbers<[1], [0], [0], [1], [0, 0, 1, 1], [], []>} : vector<16x16xf32>, vector<16x128xf32>, vector<16x128xf32> -> vector<16x128xf32>
    %c1_121 = arith.constant 1 : index
    %c384_122 = arith.constant 384 : index
    %c0_123 = arith.constant 0 : index
    %356 = vector.load %arg3[%c1_121, %c384_122, %c0_123] : memref<2x616x128xf32, #tpu.memory_space<vmem>>, vector<1x128x32xf32>
    %357 = vector.shape_cast %356 : vector<1x128x32xf32> to vector<128x32xf32>
    %cst_124 = arith.constant dense<0.000000e+00> : vector<16x32xf32>
    %358 = tpu.matmul %355, %357, %cst_124 {dimension_numbers = #tpu.dot_dimension_numbers<[1], [0], [0], [1], [0, 0, 1, 1], [], []>} : vector<16x128xf32>, vector<128x32xf32>, vector<16x32xf32> -> vector<16x32xf32>
    %359 = arith.addf %331, %358 : vector<16x32xf32>
    %c1_125 = arith.constant 1 : index
    %c612_126 = arith.constant 612 : index
    %c0_127 = arith.constant 0 : index
    %360 = vector.load %arg3[%c1_125, %c612_126, %c0_127] : memref<2x616x128xf32, #tpu.memory_space<vmem>>, vector<1x1x32xf32>
    %361 = vector.shape_cast %360 : vector<1x1x32xf32> to vector<1x32xf32>
    %362 = vector.broadcast %361 : vector<1x32xf32> to vector<16x32xf32>
    %363 = arith.addf %359, %362 : vector<16x32xf32>
    %364 = arith.addf %363, %215 : vector<16x32xf32>
    %c1_128 = arith.constant 1 : index
    %c610_129 = arith.constant 610 : index
    %c0_130 = arith.constant 0 : index
    %365 = vector.load %arg3[%c1_128, %c610_129, %c0_130] : memref<2x616x128xf32, #tpu.memory_space<vmem>>, vector<1x1x32xf32>
    %366 = vector.shape_cast %365 : vector<1x1x32xf32> to vector<1x32xf32>
    %c1_131 = arith.constant 1 : index
    %c611_132 = arith.constant 611 : index
    %c0_133 = arith.constant 0 : index
    %367 = vector.load %arg3[%c1_131, %c611_132, %c0_133] : memref<2x616x128xf32, #tpu.memory_space<vmem>>, vector<1x1x32xf32>
    %368 = vector.shape_cast %367 : vector<1x1x32xf32> to vector<1x32xf32>
    %cst_134 = arith.constant dense<0.000000e+00> : vector<16xf32>
    %369 = vector.multi_reduction <add>, %364, %cst_134 [1] : vector<16x32xf32> to vector<16xf32>
    %370 = vector.shape_cast %369 : vector<16xf32> to vector<16x1xf32>
    %cst_135 = arith.constant 3.200000e+01 : f32
    %371 = vector.broadcast %cst_135 : f32 to vector<16x1xf32>
    %372 = arith.divf %370, %371 : vector<16x1xf32>
    %373 = vector.broadcast %372 : vector<16x1xf32> to vector<16x32xf32>
    %374 = arith.subf %364, %373 : vector<16x32xf32>
    %375 = arith.mulf %374, %374 : vector<16x32xf32>
    %cst_136 = arith.constant dense<0.000000e+00> : vector<16xf32>
    %376 = vector.multi_reduction <add>, %375, %cst_136 [1] : vector<16x32xf32> to vector<16xf32>
    %377 = vector.shape_cast %376 : vector<16xf32> to vector<16x1xf32>
    %cst_137 = arith.constant 3.200000e+01 : f32
    %378 = vector.broadcast %cst_137 : f32 to vector<16x1xf32>
    %379 = arith.divf %377, %378 : vector<16x1xf32>
    %380 = vector.broadcast %372 : vector<16x1xf32> to vector<16x32xf32>
    %381 = arith.subf %364, %380 : vector<16x32xf32>
    %cst_138 = arith.constant 9.99999974E-6 : f32
    %382 = vector.broadcast %cst_138 : f32 to vector<16x1xf32>
    %383 = arith.addf %379, %382 : vector<16x1xf32>
    %384 = math.rsqrt %383 : vector<16x1xf32>
    %385 = vector.broadcast %384 : vector<16x1xf32> to vector<16x32xf32>
    %386 = arith.mulf %381, %385 : vector<16x32xf32>
    %387 = vector.broadcast %366 : vector<1x32xf32> to vector<16x32xf32>
    %388 = arith.mulf %386, %387 : vector<16x32xf32>
    %389 = vector.broadcast %368 : vector<1x32xf32> to vector<16x32xf32>
    %390 = arith.addf %388, %389 : vector<16x32xf32>
    %c1_139 = arith.constant 1 : index
    %c512_140 = arith.constant 512 : index
    %c0_141 = arith.constant 0 : index
    %391 = vector.load %arg3[%c1_139, %c512_140, %c0_141] : memref<2x616x128xf32, #tpu.memory_space<vmem>>, vector<1x32x64xf32>
    %392 = vector.shape_cast %391 : vector<1x32x64xf32> to vector<32x64xf32>
    %cst_142 = arith.constant dense<0.000000e+00> : vector<16x64xf32>
    %393 = tpu.matmul %390, %392, %cst_142 {dimension_numbers = #tpu.dot_dimension_numbers<[1], [0], [0], [1], [0, 0, 1, 1], [], []>} : vector<16x32xf32>, vector<32x64xf32>, vector<16x64xf32> -> vector<16x64xf32>
    %c1_143 = arith.constant 1 : index
    %c613_144 = arith.constant 613 : index
    %c0_145 = arith.constant 0 : index
    %394 = vector.load %arg3[%c1_143, %c613_144, %c0_145] : memref<2x616x128xf32, #tpu.memory_space<vmem>>, vector<1x1x64xf32>
    %395 = vector.shape_cast %394 : vector<1x1x64xf32> to vector<1x64xf32>
    %396 = vector.broadcast %395 : vector<1x64xf32> to vector<16x64xf32>
    %397 = arith.addf %393, %396 : vector<16x64xf32>
    %398 = arith.mulf %397, %397 : vector<16x64xf32>
    %399 = arith.mulf %397, %398 : vector<16x64xf32>
    %cst_146 = arith.constant 4.471500e-02 : f32
    %400 = vector.broadcast %cst_146 : f32 to vector<16x64xf32>
    %401 = arith.mulf %400, %399 : vector<16x64xf32>
    %402 = arith.addf %397, %401 : vector<16x64xf32>
    %cst_147 = arith.constant 0.797884583 : f32
    %403 = vector.broadcast %cst_147 : f32 to vector<16x64xf32>
    %404 = arith.mulf %403, %402 : vector<16x64xf32>
    %405 = math.tanh %404 : vector<16x64xf32>
    %cst_148 = arith.constant 1.000000e+00 : f32
    %406 = vector.broadcast %cst_148 : f32 to vector<16x64xf32>
    %407 = arith.addf %406, %405 : vector<16x64xf32>
    %cst_149 = arith.constant 5.000000e-01 : f32
    %408 = vector.broadcast %cst_149 : f32 to vector<16x64xf32>
    %409 = arith.mulf %408, %407 : vector<16x64xf32>
    %410 = arith.mulf %397, %409 : vector<16x64xf32>
    %c1_150 = arith.constant 1 : index
    %c544_151 = arith.constant 544 : index
    %c0_152 = arith.constant 0 : index
    %411 = vector.load %arg3[%c1_150, %c544_151, %c0_152] : memref<2x616x128xf32, #tpu.memory_space<vmem>>, vector<1x64x32xf32>
    %412 = vector.shape_cast %411 : vector<1x64x32xf32> to vector<64x32xf32>
    %cst_153 = arith.constant dense<0.000000e+00> : vector<16x32xf32>
    %413 = tpu.matmul %410, %412, %cst_153 {dimension_numbers = #tpu.dot_dimension_numbers<[1], [0], [0], [1], [0, 0, 1, 1], [], []>} : vector<16x64xf32>, vector<64x32xf32>, vector<16x32xf32> -> vector<16x32xf32>
    %c1_154 = arith.constant 1 : index
    %c614_155 = arith.constant 614 : index
    %c0_156 = arith.constant 0 : index
    %414 = vector.load %arg3[%c1_154, %c614_155, %c0_156] : memref<2x616x128xf32, #tpu.memory_space<vmem>>, vector<1x1x32xf32>
    %415 = vector.shape_cast %414 : vector<1x1x32xf32> to vector<1x32xf32>
    %416 = vector.broadcast %415 : vector<1x32xf32> to vector<16x32xf32>
    %417 = arith.addf %413, %416 : vector<16x32xf32>
    %418 = arith.addf %417, %364 : vector<16x32xf32>
    %c56 = arith.constant 56 : index
    %c0_157 = arith.constant 0 : index
    %419 = vector.load %arg4[%c56, %c0_157] : memref<96x128xf32, #tpu.memory_space<vmem>>, vector<1x32xf32>
    %c57 = arith.constant 57 : index
    %c0_158 = arith.constant 0 : index
    %420 = vector.load %arg4[%c57, %c0_158] : memref<96x128xf32, #tpu.memory_space<vmem>>, vector<1x32xf32>
    %cst_159 = arith.constant dense<0.000000e+00> : vector<16xf32>
    %421 = vector.multi_reduction <add>, %418, %cst_159 [1] : vector<16x32xf32> to vector<16xf32>
    %422 = vector.shape_cast %421 : vector<16xf32> to vector<16x1xf32>
    %cst_160 = arith.constant 3.200000e+01 : f32
    %423 = vector.broadcast %cst_160 : f32 to vector<16x1xf32>
    %424 = arith.divf %422, %423 : vector<16x1xf32>
    %425 = vector.broadcast %424 : vector<16x1xf32> to vector<16x32xf32>
    %426 = arith.subf %418, %425 : vector<16x32xf32>
    %427 = arith.mulf %426, %426 : vector<16x32xf32>
    %cst_161 = arith.constant dense<0.000000e+00> : vector<16xf32>
    %428 = vector.multi_reduction <add>, %427, %cst_161 [1] : vector<16x32xf32> to vector<16xf32>
    %429 = vector.shape_cast %428 : vector<16xf32> to vector<16x1xf32>
    %cst_162 = arith.constant 3.200000e+01 : f32
    %430 = vector.broadcast %cst_162 : f32 to vector<16x1xf32>
    %431 = arith.divf %429, %430 : vector<16x1xf32>
    %432 = vector.broadcast %424 : vector<16x1xf32> to vector<16x32xf32>
    %433 = arith.subf %418, %432 : vector<16x32xf32>
    %cst_163 = arith.constant 9.99999974E-6 : f32
    %434 = vector.broadcast %cst_163 : f32 to vector<16x1xf32>
    %435 = arith.addf %431, %434 : vector<16x1xf32>
    %436 = math.rsqrt %435 : vector<16x1xf32>
    %437 = vector.broadcast %436 : vector<16x1xf32> to vector<16x32xf32>
    %438 = arith.mulf %433, %437 : vector<16x32xf32>
    %439 = vector.broadcast %419 : vector<1x32xf32> to vector<16x32xf32>
    %440 = arith.mulf %438, %439 : vector<16x32xf32>
    %441 = vector.broadcast %420 : vector<1x32xf32> to vector<16x32xf32>
    %442 = arith.addf %440, %441 : vector<16x32xf32>
    %c58 = arith.constant 58 : index
    %c0_164 = arith.constant 0 : index
    %443 = vector.load %arg4[%c58, %c0_164] : memref<96x128xf32, #tpu.memory_space<vmem>>, vector<32x128xf32>
    %cst_165 = arith.constant dense<0.000000e+00> : vector<16x128xf32>
    %444 = tpu.matmul %442, %443, %cst_165 {dimension_numbers = #tpu.dot_dimension_numbers<[1], [0], [0], [1], [0, 0, 1, 1], [], []>} : vector<16x32xf32>, vector<32x128xf32>, vector<16x128xf32> -> vector<16x128xf32>
    %c90 = arith.constant 90 : index
    %c0_166 = arith.constant 0 : index
    %445 = vector.load %arg4[%c90, %c0_166] : memref<96x128xf32, #tpu.memory_space<vmem>>, vector<1x128xf32>
    %446 = vector.broadcast %445 : vector<1x128xf32> to vector<16x128xf32>
    %447 = arith.addf %444, %446 : vector<16x128xf32>
    %c0_167 = arith.constant 0 : index
    %c0_168 = arith.constant 0 : index
    %448 = vector.load %arg5[%c0_167, %c0_168] : memref<16x128xf32, #tpu.memory_space<vmem>>, vector<16x128xf32>
    tpu.vector_store %arg5[%c0_167, %c0_168], %447 {strides = array<i32>} : memref<16x128xf32, #tpu.memory_space<vmem>>, vector<16x128xf32>,
    return
  }
}

</mosaic_0001>

<bundles_post_ra>
// kernel: forward.1
= control target key start
LH: loop header
LB: loop body
LE: loop exit
PB: predicated region body
PF: predicated region fallthrough
CT: control target
= control target key end

     0   :  { %10 = vsyncpa [#allocation3], 0  ;;  %s3856_s0 = inlined_call_operand.vmem [shape: s32[16,1], index: 0, kind: input, shape index: {}]   ;;  %s3857_s1 = inlined_call_operand.vmem [shape: f32[16,16], index: 1, kind: input, shape index: {}]   ;;  %s3858_s2 = inlined_call_operand.hbm [shape: f32[2,40,2560], index: 2, kind: input, shape index: {}]   ;;  %s3859_s3 = inlined_call_operand.hbm [shape: f32[2,616,128], index: 3, kind: input, shape index: {}]   ;;  %s3860_s4 = inlined_call_operand.hbm [shape: f32[96,128], index: 4, kind: input, shape index: {}]   ;;  %s3861_s5 = inlined_call_operand.vmem [shape: f32[16,128], index: 5, kind: output, shape index: {}]  }
   0x1   :  { %11 = vsyncpa [#allocation5], 0  ;;  %s33_s20 = sshll.u32 %s3859_s3, 4  ;;  %s3166_s21 = smov [#allocation4]   ;;  %s34_s20 = int_to_ptr.hbm [resolvable:$true] %s33_s20 }
   0x2   :  { %s35_s22 = sshll.u32 %s3166_s21, 4  ;;  %s20_s25 = sshll.u32 %s3858_s2, 4  ;;  %s36_s22 = int_to_ptr.vmem [resolvable:$true] %s35_s22  ;;  %s21_s25 = int_to_ptr.hbm [resolvable:$true] %s20_s25 }
   0x3   :  { %s3167_s26 = smov 128   ;;  %s3168_s27 = smov 8  }
   0x4   :  { %41 = dma.hbm_to_vmem [thread:$0]  %s34_s20, 19712, %s36_s22, [#allocation5], %s3167_s26, %s3167_s26, %s3168_s27  }
   0x5   :  { %s3169_s28 = smov [#allocation2]   ;;  %s3170_s30 = smov 2560  }
   0x6   :  { %s22_s29 = sshll.u32 %s3169_s28, 4  ;;  %s3171_s6 = smov 160   ;;  %s23_s29 = int_to_ptr.vmem [resolvable:$true] %s22_s29 }
   0x7   :  { %28 = dma.hbm_to_vmem [thread:$0]  %s21_s25, 25600, %s23_s29, [#allocation3], %s3170_s30, %s3170_s30, %s3171_s6  }
   0x8   :  { %s46_s8 = sshll.u32 %s3860_s4, 4  ;;  %s3172_s9 = smov [#allocation6]   ;;  %s47_s8 = int_to_ptr.hbm [resolvable:$true] %s46_s8 }
   0x9   :  { %s48_s10 = sshll.u32 %s3172_s9, 4  ;;  %s49_s10 = int_to_ptr.vmem [resolvable:$true] %s48_s10 }
   0xa   :  { %54 = dma.hbm_to_vmem [thread:$0]  %s47_s8, 1536, %s49_s10, [#allocation5], %s3167_s26, %s3167_s26, %s3168_s27  }
   0xb   :  { %3162 = dma.done.wait [#allocation3], 25600  }
   0xc   :  { %3163 = vsyncadd [#allocation3], 4294941696 }
   0xd   :  { %3164 = dma.done.wait [#allocation5], 21248  }
   0xe   :  { %3165 = vsyncadd [#allocation5], 4294946048  ;;  %v3173_v0 = vmov 0   ;;  %v67_v1 = vld [vmem:[%s3856_s0] sm:$0xff]  ;;  %v87_v2 = vld [vmem:[#allocation6 + $0x20] sm:$0xff]  ;;  %v69_v8 = vlaneseq  ;;  %vm88_vm0 = vcmask 326656  }
   0xf   :  { %2974 = vset.pattern.permute.xlu0 %v3173_v0  ;;  %106 = vmatpush.msra.mxu0 %v87_v2  ;;  %v86_v3 = vld [vmem:[#allocation6 + $0x18] sm:$0xff]  ;;  %v85_v4 = vld [vmem:[#allocation6 + $0x10] sm:$0xff]  ;;  %v84_v5 = vld [vmem:[#allocation6 + $0x8] sm:$0xff]  ;;  %v3174_v11 = vmov 0.0   ;;  %vm124_vm3 = vcmask 261120   ;;  %v3175_v19 = vmov 32.0  }
  0x10   :  { %72 = vperm.xlu0 %2974, %v67_v1   ;;  %v68_v6 = vld [vmem:[%s3856_s0 + $0x8] sm:$0xff]  ;;  %v83_v7 = vld [vmem:[#allocation6] sm:$0xff]  ;;  %v70_v9 = vand.u32 127, %v69_v8  ;;  %2992 = vrcp.f32 %v3175_v19  ;;  %v242_v36 = vld [vmem:[#allocation2 + $0x1e0] sm:$0xff]  ;;  %vm816_vm11 = vcmask 130048  }
  0x11   :  { %107 = vmatpush.msra.mxu0 %v86_v3  ;;  %v243_v37 = vld [vmem:[#allocation2 + $0x1e8] sm:$0xff]  ;;  %2956 = vmatpush.msra.mxu3 %v242_v36  ;;  %v222_v38 = vld [vmem:[#allocation2 + $0x140] sm:$0xff]  ;;  %v244_v44 = vld [vmem:[#allocation2 + $0x1f0] sm:$0xff] }
  0x12   :  { %2960 = vmatpush.msra.mxu2 %v243_v37  ;;  %v223_v39 = vld [vmem:[#allocation2 + $0x148] sm:$0xff]  ;;  %333 = vmatpush.msra.mxu1 %v242_v36  ;;  %v202_v40 = vld [vmem:[#allocation2 + $0xa0] sm:$0xff]  ;;  %v224_v46 = vld [vmem:[#allocation2 + $0x150] sm:$0xff] }
  0x13   :  { %108 = vmatpush.msra.mxu0 %v85_v4  ;;  %2957 = vmatpush.msra.mxu3 %v222_v38  ;;  %v203_v41 = vld [vmem:[#allocation2 + $0xa8] sm:$0xff]  ;;  %v182_v42 = vld [vmem:[#allocation2] sm:$0xff]  ;;  %v204_v50 = vld [vmem:[#allocation2 + $0xb0] sm:$0xff] }
  0x14   :  { %2961 = vmatpush.msra.mxu2 %v223_v39  ;;  %334 = vmatpush.msra.mxu1 %v222_v38  ;;  %v183_v43 = vld [vmem:[#allocation2 + $0x8] sm:$0xff]  ;;  %v246_v45 = vld [vmem:[#allocation2 + $0x200] sm:$0xff]  ;;  %v184_v53 = vld [vmem:[#allocation2 + $0x10] sm:$0xff] }
  0x15   :  { %109 = vmatpush.msra.mxu0 %v84_v5  ;;  %2958 = vmatpush.msra.mxu3 %v202_v40  ;;  %v226_v47 = vld [vmem:[#allocation2 + $0x160] sm:$0xff]  ;;  %v245_v55 = vld [vmem:[#allocation2 + $0x1f8] sm:$0xff]  ;;  %v248_v56 = vld [vmem:[#allocation2 + $0x210] sm:$0xff] }
  0x16   :  { %v2993_v20 = vpop.eup %2992  ;;  %2962 = vmatpush.msra.mxu2 %v203_v41  ;;  %335 = vmatpush.msra.mxu1 %v202_v40  ;;  %v206_v51 = vld [vmem:[#allocation2 + $0xc0] sm:$0xff]  ;;  %v225_v57 = vld [vmem:[#allocation2 + $0x158] sm:$0xff]  ;;  %v228_v58 = vld [vmem:[#allocation2 + $0x170] sm:$0xff] }
  0x17   :  { %110 = vmatpush.msra.mxu0 %v83_v7  ;;  %v132_v21 = vmul.f32 32.0, %v2993_v20  ;;  %vm136_vm4 = vweird.f32 %v2993_v20  ;;  %2959 = vmatpush.msra.mxu3 %v182_v42  ;;  %v186_v54 = vld [vmem:[#allocation2 + $0x20] sm:$0xff]  ;;  %v205_v60 = vld [vmem:[#allocation2 + $0xb8] sm:$0xff]  ;;  %v208_v61 = vld [vmem:[#allocation2 + $0xd0] sm:$0xff] }
  0x18   :  { %75 = vperm.xlu0 %2974, %v68_v6   ;;  %2963 = vmatpush.msra.mxu2 %v183_v43  ;;  %v185_v63 = vld [vmem:[#allocation2 + $0x18] sm:$0xff]  ;;  %v188_v0 = vld [vmem:[#allocation2 + $0x30] sm:$0xff]  ;;  %v254_v38 = vld [vmem:[#allocation2 + $0x240] sm:$0xff] }
  0x19   :  { %v133_v22 = vsub.f32 1.0, %v132_v21  ;;  %356 = vmatpush.msrb.mxu0 %v243_v37  ;;  %336 = vmatpush.msra.mxu1 %v182_v42  ;;  %v247_v21 = vld [vmem:[#allocation2 + $0x208] sm:$0xff]  ;;  %v249_v36 = vld [vmem:[#allocation2 + $0x218] sm:$0xff]  ;;  %v252_v37 = vld [vmem:[#allocation2 + $0x230] sm:$0xff] }
  0x1a   :  { %379 = vmatpush.msrb.mxu3 %v244_v44  ;;  %425 = vmatpush.msrb.mxu2 %v246_v45  ;;  %v232_v40 = vld [vmem:[#allocation2 + $0x190] sm:$0xff]  ;;  %v234_v42 = vld [vmem:[#allocation2 + $0x1a0] sm:$0xff]  ;;  %v211_v45 = vld [vmem:[#allocation2 + $0xe8] sm:$0xff] }
  0x1b   :  { %v134_v23 = vmul.f32 %v2993_v20, %v133_v22  ;;  %357 = vmatpush.msrb.mxu0 %v223_v39  ;;  %402 = vmatpush.msrb.mxu1 %v245_v55  ;;  %v250_v22 = vld [vmem:[#allocation2 + $0x220] sm:$0xff]  ;;  %v229_v39 = vld [vmem:[#allocation2 + $0x178] sm:$0xff]  ;;  %v212_v44 = vld [vmem:[#allocation2 + $0xf0] sm:$0xff] }
  0x1c   :  { %380 = vmatpush.msrb.mxu3 %v224_v46  ;;  %426 = vmatpush.msrb.mxu2 %v226_v47  ;;  %v214_v46 = vld [vmem:[#allocation2 + $0x100] sm:$0xff]  ;;  %v189_v47 = vld [vmem:[#allocation2 + $0x38] sm:$0xff] }
  0x1d   :  { %v135_v24 = vadd.f32 %v2993_v20, %v134_v23  ;;  %358 = vmatpush.msrb.mxu0 %v203_v41  ;;  %403 = vmatpush.msrb.mxu1 %v225_v57  ;;  %v231_v41 = vld [vmem:[#allocation2 + $0x188] sm:$0xff]  ;;  %v213_v55 = vld [vmem:[#allocation2 + $0xf8] sm:$0xff] }
  0x1e   :  { %381 = vmatpush.msrb.mxu3 %v204_v50  ;;  %427 = vmatpush.msrb.mxu2 %v206_v51  ;;  %v194_v50 = vld [vmem:[#allocation2 + $0x60] sm:$0xff]  ;;  %v253_v51 = vld [vmem:[#allocation2 + $0x238] sm:$0xff]  ;;  %v255_v57 = vld [vmem:[#allocation2 + $0x248] sm:$0xff] }
  0x1f   :  { %v3229_v25 = vsel %vm136_vm4, %v2993_v20, %v135_v24  ;;  %359 = vmatpush.msrb.mxu0 %v183_v43  ;;  %404 = vmatpush.msrb.mxu1 %v205_v60  ;;  %v227_v24 = vld [vmem:[#allocation2 + $0x168] sm:$0xff]  ;;  %v209_v43 = vld [vmem:[#allocation2 + $0xd8] sm:$0xff]  ;;  %v196_v60 = vld [vmem:[#allocation2 + $0x70] sm:$0xff] }
  0x20   :  { %382 = vmatpush.msrb.mxu3 %v184_v53  ;;  %428 = vmatpush.msrb.mxu2 %v186_v54  ;;  %v233_v53 = vld [vmem:[#allocation2 + $0x198] sm:$0xff]  ;;  %v236_v54 = vld [vmem:[#allocation2 + $0x1b0] sm:$0xff] }
  0x21   :  { %405 = vmatpush.msrb.mxu1 %v185_v63  ;;  %v215_v63 = vld [vmem:[#allocation2 + $0x108] sm:$0xff] }
  0x82   :  { %v73_v10 = vpop.permute.xlu0 %72 }
  0x83   :  { %vm77_vm1 = vcmp.eq.s32.totalorder %v73_v10, %v70_v9  ;;  %v2975_v10 = vld [vmem:[#allocation4 + $0x260] ss:$0 sm:$0xff] }
  0x84   :  { %v2846_v12 = vsel %vm77_vm1, 1.0, %v3174_v11 }
  0x85   :  { %2848 = vmatmul.msk.f32.vlgmr.msra.gmra.mxu0 %vm88_vm0, %v2846_v12 }
  0x86   :  { %471 = vmatpush.msra.mxu0 %v248_v56  ;;  %v216_v56 = vld [vmem:[#allocation2 + $0x110] sm:$0xff] }
  0x88   :  { %472 = vmatpush.msra.mxu0 %v228_v58  ;;  %v258_v58 = vld [vmem:[#allocation2 + $0x260] sm:$0xff] }
  0x8a   :  { %v76_v13 = vpop.permute.xlu0 %75  ;;  %473 = vmatpush.msra.mxu0 %v208_v61  ;;  %v235_v61 = vld [vmem:[#allocation2 + $0x1a8] sm:$0xff] }
  0x8b   :  { %vm78_vm2 = vcmp.eq.s32.totalorder %v76_v13, %v70_v9  ;;  %v2976_v13 = vld [vmem:[#allocation4 + $0x261] ss:$0 sm:$0xff] }
  0x8c   :  { %v2847_v14 = vsel %vm78_vm2, 1.0, %v3174_v11  ;;  %474 = vmatpush.msra.mxu0 %v188_v0  ;;  %v218_v0 = vld [vmem:[#allocation2 + $0x120] sm:$0xff]  ;;  %vm1407_vm2 = vcmask 523264  }
  0x8d   :  { %2849 = vmatmul.msk.f32.gmra.mxu0 %vm88_vm0, %v2847_v14 }
 0x102   :  { %v3221_v15 = vpop.f32.mrf.mxu0 }
 0x103   :  { %v125_v18 = vsel %vm124_vm3, %v3221_v15, 0.0 }
 0x10a   :  { %v3223_v16 = vpop.f32.mrf.mxu0 }
 0x10b   :  { %v128_v17 = vsel %vm124_vm3, %v3223_v16, 0.0 }
 0x10c   :  { %129 = vadd.xlane.f32.xlu1 %v128_v17 }
 0x114   :  { %126 = vadd.xlane.f32.xlu1 %v125_v18 }
 0x17f   :  { %v130_v26 = vpop.xlane.xlu1 %129 }
 0x180   :  { %v139_v27 = vmul.f32 %v3229_v25, %v130_v26  ;;  %v230_v26 = vld [vmem:[#allocation2 + $0x180] sm:$0xff] }
 0x182   :  { %v3233_v28 = vsub.f32 %v3223_v16, %v139_v27 }
 0x184   :  { %v143_v29 = vmul.f32 %v3233_v28, %v3233_v28 }
 0x186   :  { %v147_v30 = vsel %vm124_vm3, %v143_v29, 0.0  ;;  %v207_v29 = vld [vmem:[#allocation2 + $0xc8] sm:$0xff] }
 0x187   :  { %148 = vadd.xlane.f32.xlu2 %v147_v30  ;;  %v127_v31 = vpop.xlane.xlu1 %126  ;;  %v210_v30 = vld [vmem:[#allocation2 + $0xe0] sm:$0xff] }
 0x188   :  { %v138_v32 = vmul.f32 %v3229_v25, %v127_v31 }
 0x18a   :  { %v3240_v33 = vsub.f32 %v3221_v15, %v138_v32  ;;  %v187_v32 = vld [vmem:[#allocation2 + $0x28] sm:$0xff] }
 0x18c   :  { %v142_v34 = vmul.f32 %v3240_v33, %v3240_v33 }
 0x18e   :  { %v144_v35 = vsel %vm124_vm3, %v142_v34, 0.0  ;;  %v190_v34 = vld [vmem:[#allocation2 + $0x40] sm:$0xff] }
 0x18f   :  { %145 = vadd.xlane.f32.xlu2 %v144_v35 }
 0x1fa   :  { %v149_v48 = vpop.xlane.xlu2 %148 }
 0x1fb   :  { %v151_v49 = vmul.f32 %v149_v48, %v3229_v25  ;;  %v192_v48 = vld [vmem:[#allocation2 + $0x50] sm:$0xff] }
 0x1fd   :  { %v153_v52 = vadd.f32 1e-05, %v151_v49  ;;  %v191_v49 = vld [vmem:[#allocation2 + $0x48] sm:$0xff] }
 0x1ff   :  { %2994 = vrsqrt.f32 %v153_v52  ;;  %vm170_vm6 = vweird.f32 %v153_v52 }
 0x202   :  { %v146_v59 = vpop.xlane.xlu2 %145 }
 0x203   :  { %v150_v62 = vmul.f32 %v146_v59, %v3229_v25  ;;  %v193_v59 = vld [vmem:[#allocation2 + $0x58] sm:$0xff] }
 0x205   :  { %v2995_v1 = vpop.eup %2994  ;;  %v152_v2 = vadd.f32 1e-05, %v150_v62  ;;  %v238_v62 = vld [vmem:[#allocation2 + $0x1c0] sm:$0xff] }
 0x206   :  { %v165_v3 = vmul.f32 %v2995_v1, %v153_v52  ;;  %vm171_vm5 = vweird.f32 %v2995_v1  ;;  %v256_v52 = vld [vmem:[#allocation2 + $0x250] sm:$0xff] }
 0x207   :  { %2996 = vrsqrt.f32 %v152_v2  ;;  %vm172_vm7 = vmor %vm170_vm6, %vm171_vm5  ;;  %vm160_vm9 = vweird.f32 %v152_v2 }
 0x208   :  { %v166_v4 = vmul.f32 %v2995_v1, %v165_v3  ;;  %v257_v3 = vld [vmem:[#allocation2 + $0x258] sm:$0xff] }
 0x20a   :  { %v167_v5 = vmul.f32 0.5, %v166_v4  ;;  %v260_v4 = vld [vmem:[#allocation2 + $0x270] sm:$0xff] }
 0x20c   :  { %v168_v6 = vsub.f32 1.5, %v167_v5  ;;  %v237_v5 = vld [vmem:[#allocation2 + $0x1b8] sm:$0xff] }
 0x20d   :  { %v2997_v7 = vpop.eup %2996 }
 0x20e   :  { %v169_v8 = vmul.f32 %v2995_v1, %v168_v6  ;;  %v155_v9 = vmul.f32 %v2997_v7, %v152_v2  ;;  %vm161_vm8 = vweird.f32 %v2997_v7  ;;  %v198_v2 = vld [vmem:[#allocation2 + $0x80] sm:$0xff]  ;;  %v240_v6 = vld [vmem:[#allocation2 + $0x1d0] sm:$0xff] }
 0x20f   :  { %vm162_vm10 = vmor %vm160_vm9, %vm161_vm8 }
 0x210   :  { %v173_v11 = vsel %vm172_vm7, %v2995_v1, %v169_v8  ;;  %v156_v12 = vmul.f32 %v2997_v7, %v155_v9  ;;  %v195_v1 = vld [vmem:[#allocation2 + $0x68] sm:$0xff]  ;;  %v220_v8 = vld [vmem:[#allocation2 + $0x130] sm:$0xff]  ;;  %v197_v9 = vld [vmem:[#allocation2 + $0x78] sm:$0xff] }
 0x211   :  { %v175_v14 = vmul.f32 %v173_v11, %v3233_v28  ;;  %v259_v11 = vld [vmem:[#allocation2 + $0x268] sm:$0xff] }
 0x212   :  { %v157_v17 = vmul.f32 0.5, %v156_v12  ;;  %v239_v12 = vld [vmem:[#allocation2 + $0x1c8] sm:$0xff] }
 0x213   :  { %v178_v18 = vmul.f32 %v2975_v10, %v175_v14  ;;  %v199_v14 = vld [vmem:[#allocation2 + $0x88] sm:$0xff] }
 0x214   :  { %v158_v19 = vsub.f32 1.5, %v157_v17  ;;  %v261_v17 = vld [vmem:[#allocation2 + $0x278] sm:$0xff] }
 0x215   :  { %v3248_v20 = vadd.f32 %v2976_v13, %v178_v18  ;;  %v241_v18 = vld [vmem:[#allocation2 + $0x1d8] sm:$0xff] }
 0x216   :  { %v159_v23 = vmul.f32 %v2997_v7, %v158_v19  ;;  %v221_v19 = vld [vmem:[#allocation2 + $0x138] sm:$0xff] }
 0x217   :  { %2851 = vmatmul.msk.f32.vlgmr.msra.gmra.mxu3 %vm124_vm3, %v3248_v20  ;;  %2853 = vmatmul.msk.f32.vlgmr.msra.gmra.mxu2 %vm124_vm3, %v3248_v20 }
 0x218   :  { %v163_v27 = vsel %vm162_vm10, %v2997_v7, %v159_v23  ;;  %448 = vmatpush.msra.mxu3 %v247_v21  ;;  %517 = vmatpush.msra.mxu2 %v250_v22  ;;  %v217_v7 = vld [vmem:[#allocation2 + $0x118] sm:$0xff] }
 0x219   :  { %v174_v28 = vmul.f32 %v163_v27, %v3240_v33  ;;  %v251_v33 = vld [vmem:[#allocation2 + $0x228] sm:$0xff]  ;;  %v201_v21 = vld [vmem:[#allocation2 + $0x98] sm:$0xff] }
 0x21a   :  { %449 = vmatpush.msra.mxu3 %v227_v24  ;;  %518 = vmatpush.msra.mxu2 %v230_v26 }
 0x21b   :  { %v177_v31 = vmul.f32 %v2975_v10, %v174_v28  ;;  %v200_v10 = vld [vmem:[#allocation2 + $0x90] sm:$0xff] }
 0x21c   :  { %450 = vmatpush.msra.mxu3 %v207_v29  ;;  %519 = vmatpush.msra.mxu2 %v210_v30 }
 0x21d   :  { %v3255_v35 = vadd.f32 %v2976_v13, %v177_v31  ;;  %v219_v13 = vld [vmem:[#allocation2 + $0x128] sm:$0xff] }
 0x21e   :  { %451 = vmatpush.msra.mxu3 %v187_v32  ;;  %520 = vmatpush.msra.mxu2 %v190_v34  ;;  %v267_v34 = vld [vmem:[#allocation2 + $0x2c0] ss:$8 sm:$0xf] }
 0x21f   :  { %2850 = vmatmul.msk.f32.vlgmr.msra.gmra.mxu1 %vm124_vm3, %v3255_v35  ;;  %2852 = vmatmul.msk.f32.vlgmr.msrb.gmra.mxu0 %vm124_vm3, %v3255_v35 }
 0x220   :  { %2854 = vmatmul.msk.f32.vlgmr.msrb.gmra.mxu3 %vm124_vm3, %v3255_v35  ;;  %2858 = vmatmul.msk.f32.vlgmr.msrb.gmra.mxu2 %vm124_vm3, %v3255_v35 }
 0x221   :  { %494 = vmatpush.msra.mxu1 %v249_v36  ;;  %563 = vmatpush.msrb.mxu0 %v252_v37 }
 0x222   :  { %540 = vmatpush.msrb.mxu3 %v251_v33  ;;  %609 = vmatpush.msrb.mxu2 %v254_v38 }
 0x223   :  { %495 = vmatpush.msra.mxu1 %v229_v39  ;;  %564 = vmatpush.msrb.mxu0 %v232_v40 }
 0x224   :  { %541 = vmatpush.msrb.mxu3 %v231_v41  ;;  %610 = vmatpush.msrb.mxu2 %v234_v42 }
 0x225   :  { %496 = vmatpush.msra.mxu1 %v209_v43  ;;  %565 = vmatpush.msrb.mxu0 %v212_v44 }
 0x226   :  { %542 = vmatpush.msrb.mxu3 %v211_v45  ;;  %611 = vmatpush.msrb.mxu2 %v214_v46 }
 0x227   :  { %2856 = vmatmul.msk.f32.vlgmr.msrb.gmra.mxu1 %vm124_vm3, %v3255_v35  ;;  %2862 = vmatmul.msk.f32.vlgmr.msra.gmra.mxu0 %vm124_vm3, %v3255_v35 }
 0x228   :  { %2855 = vmatmul.msk.f32.gmra.mxu3 %vm124_vm3, %v3248_v20  ;;  %2859 = vmatmul.msk.f32.gmra.mxu2 %vm124_vm3, %v3248_v20 }
 0x229   :  { %497 = vmatpush.msra.mxu1 %v189_v47  ;;  %566 = vmatpush.msrb.mxu0 %v192_v48 }
 0x22a   :  { %543 = vmatpush.msrb.mxu3 %v191_v49  ;;  %612 = vmatpush.msrb.mxu2 %v194_v50 }
 0x22b   :  { %586 = vmatpush.msrb.mxu1 %v253_v51  ;;  %655 = vmatpush.msra.mxu0 %v256_v52 }
 0x22d   :  { %587 = vmatpush.msrb.mxu1 %v233_v53  ;;  %656 = vmatpush.msra.mxu0 %v236_v54 }
 0x22f   :  { %2857 = vmatmul.msk.f32.gmra.mxu1 %vm124_vm3, %v3248_v20  ;;  %2863 = vmatmul.msk.f32.gmra.mxu0 %vm124_vm3, %v3248_v20 }
 0x230   :  { %2860 = vmatmul.msk.f32.vlgmr.msra.gmra.mxu3 %vm124_vm3, %v3255_v35  ;;  %2866 = vmatmul.msk.f32.vlgmr.msra.gmra.mxu2 %vm124_vm3, %v3255_v35 }
 0x231   :  { %588 = vmatpush.msrb.mxu1 %v213_v55  ;;  %657 = vmatpush.msra.mxu0 %v216_v56  ;;  %v263_v56 = vld [vmem:[#allocation2 + $0x280] ss:$8 sm:$0xf] }
 0x232   :  { %632 = vmatpush.msra.mxu3 %v255_v57  ;;  %701 = vmatpush.msra.mxu2 %v258_v58  ;;  %v264_v57 = vld [vmem:[#allocation2 + $0x280] ss:$8 sm:$0xf0] }
 0x233   :  { %589 = vmatpush.msrb.mxu1 %v193_v59  ;;  %658 = vmatpush.msra.mxu0 %v196_v60  ;;  %v3362_v60 = vld [vmem:[#allocation2 + $0x300] ss:$8 sm:$0xf] }
 0x234   :  { %633 = vmatpush.msra.mxu3 %v235_v61  ;;  %702 = vmatpush.msra.mxu2 %v238_v62  ;;  %v3364_v61 = vor.u32 %v264_v57, %v263_v56 }
 0x236   :  { %634 = vmatpush.msra.mxu3 %v215_v63  ;;  %703 = vmatpush.msra.mxu2 %v218_v0  ;;  %v279_v63 = vperm.slane %v3364_v61, 4  ;;  %v291_v0 = vperm.slane %v3362_v60, 0  ;;  %v281_v57 = vperm.slane %v3364_v61, 6 }
 0x237   :  { %2864 = vmatmul.msk.f32.vlgmr.msra.gmra.mxu1 %vm124_vm3, %v3255_v35  ;;  %2870 = vmatmul.msk.f32.vlgmr.msrb.gmra.mxu0 %vm124_vm3, %v3255_v35 }
 0x238   :  { %2861 = vmatmul.msk.f32.gmra.mxu3 %vm124_vm3, %v3248_v20  ;;  %2867 = vmatmul.msk.f32.gmra.mxu2 %vm124_vm3, %v3248_v20 }
 0x239   :  { %635 = vmatpush.msra.mxu3 %v195_v1  ;;  %704 = vmatpush.msra.mxu2 %v198_v2 }
 0x23a   :  { %678 = vmatpush.msra.mxu1 %v257_v3  ;;  %747 = vmatpush.msrb.mxu0 %v260_v4 }
 0x23c   :  { %679 = vmatpush.msra.mxu1 %v237_v5  ;;  %748 = vmatpush.msrb.mxu0 %v240_v6 }
 0x23e   :  { %680 = vmatpush.msra.mxu1 %v217_v7  ;;  %749 = vmatpush.msrb.mxu0 %v220_v8  ;;  %v3375_v8 = vld [vmem:[#allocation6 + $0x28] sm:$0xff] }
 0x23f   :  { %2865 = vmatmul.msk.f32.gmra.mxu1 %vm124_vm3, %v3248_v20  ;;  %2871 = vmatmul.msk.f32.gmra.mxu0 %vm124_vm3, %v3248_v20 }
 0x240   :  { %2868 = vmatmul.msk.f32.vlgmr.msrb.gmra.mxu3 %vm124_vm3, %v3255_v35  ;;  %2874 = vmatmul.msk.f32.vlgmr.msrb.gmra.mxu2 %vm124_vm3, %v3255_v35 }
 0x241   :  { %681 = vmatpush.msra.mxu1 %v197_v9  ;;  %750 = vmatpush.msrb.mxu0 %v200_v10  ;;  %v3377_v9 = vld [vmem:[#allocation6 + $0x30] sm:$0xff] }
 0x242   :  { %724 = vmatpush.msrb.mxu3 %v259_v11 }
 0x244   :  { %725 = vmatpush.msrb.mxu3 %v239_v12 }
 0x246   :  { %726 = vmatpush.msrb.mxu3 %v219_v13  ;;  %v275_v13 = vperm.slane %v3364_v61, 0 }
 0x247   :  { %2872 = vmatmul.msk.f32.vlgmr.msrb.gmra.mxu1 %vm124_vm3, %v3255_v35  ;;  %2878 = vmatmul.msk.f32.vlgmr.msra.gmra.mxu0 %vm124_vm3, %v3255_v35 }
 0x248   :  { %2869 = vmatmul.msk.f32.gmra.mxu3 %vm124_vm3, %v3248_v20  ;;  %2875 = vmatmul.msk.f32.gmra.mxu2 %vm124_vm3, %v3248_v20 }
 0x249   :  { %727 = vmatpush.msrb.mxu3 %v199_v14  ;;  %770 = vmatpush.msrb.mxu1 %v261_v17 }
 0x24b   :  { %771 = vmatpush.msrb.mxu1 %v241_v18 }
 0x24d   :  { %772 = vmatpush.msrb.mxu1 %v221_v19 }
 0x24f   :  { %2873 = vmatmul.msk.f32.gmra.mxu1 %vm124_vm3, %v3248_v20  ;;  %2879 = vmatmul.msk.f32.gmra.mxu0 %vm124_vm3, %v3248_v20 }
 0x250   :  { %2876 = vmatmul.msk.f32.vlgmr.msra.gmra.mxu3 %vm124_vm3, %v3255_v35  ;;  %2882 = vmatmul.msk.f32.vlgmr.msra.gmra.mxu2 %vm124_vm3, %v3255_v35 }
 0x251   :  { %773 = vmatpush.msrb.mxu1 %v201_v21 }
 0x257   :  { %2880 = vmatmul.msk.f32.vlgmr.msra.gmra.mxu1 %vm124_vm3, %v3255_v35  ;;  %2886 = vmatmul.msk.f32.vlgmr.msrb.gmra.mxu0 %vm124_vm3, %v3255_v35 }
 0x258   :  { %2877 = vmatmul.msk.f32.gmra.mxu3 %vm124_vm3, %v3248_v20  ;;  %2883 = vmatmul.msk.f32.gmra.mxu2 %vm124_vm3, %v3248_v20 }
 0x25f   :  { %2881 = vmatmul.msk.f32.gmra.mxu1 %vm124_vm3, %v3248_v20  ;;  %2887 = vmatmul.msk.f32.gmra.mxu0 %vm124_vm3, %v3248_v20 }
 0x260   :  { %2884 = vmatmul.msk.f32.vlgmr.msrb.gmra.mxu3 %vm124_vm3, %v3255_v35 }
 0x267   :  { %2888 = vmatmul.msk.f32.vlgmr.msrb.gmra.mxu1 %vm124_vm3, %v3255_v35 }
 0x268   :  { %2885 = vmatmul.msk.f32.gmra.mxu3 %vm124_vm3, %v3248_v20 }
 0x26f   :  { %2889 = vmatmul.msk.f32.gmra.mxu1 %vm124_vm3, %v3248_v20  ;;  %v268_v20 = vld [vmem:[#allocation2 + $0x2c0] ss:$8 sm:$0xf0] }
 0x270   :  { %v3349_v36 = vor.u32 %v268_v20, %v267_v34 }
 0x272   :  { %v283_v33 = vperm.slane %v3349_v36, 0  ;;  %v284_v46 = vperm.slane %v3349_v36, 1  ;;  %v285_v51 = vperm.slane %v3349_v36, 2  ;;  %v287_v3 = vperm.slane %v3349_v36, 4 }
 0x29a   :  { %v3333_v22 = vpop.f32.mrf.mxu3  ;;  %v3335_v23 = vpop.f32.mrf.mxu2 }
 0x29c   :  { %v3337_v24 = vpop.f32.mrf.mxu0  ;;  %v338_v45 = vpop.f32.mrf.mxu1 }
 0x29d   :  { %v339_v21 = vadd.f32 %v338_v45, %v275_v13  ;;  %v983_v45 = vld [vmem:[#allocation4 + $0xe8] sm:$0xff] }
 0x2a3   :  { %v3339_v26 = vpop.f32.mrf.mxu3  ;;  %v430_v27 = vpop.f32.mrf.mxu2 }
 0x2a4   :  { %v3341_v28 = vpop.f32.mrf.mxu0  ;;  %v3358_v54 = vpop.f32.mrf.mxu1  ;;  %v431_v10 = vadd.f32 %v430_v27, %v279_v63 }
 0x2ab   :  { %v3343_v29 = vpop.f32.mrf.mxu3  ;;  %v433_v30 = vpop.f32.mrf.mxu2 }
 0x2ac   :  { %v3345_v31 = vpop.f32.mrf.mxu0  ;;  %v434_v1 = vadd.f32 %v433_v30, %v279_v63  ;;  %v3370_v2 = vpop.f32.mrf.mxu1  ;;  %v787_v30 = vmul.f32 %v431_v10, %v3375_v8 }
 0x2ae   :  { %v788_v11 = vmul.f32 %v434_v1, %v3375_v8 }
 0x2b3   :  { %v3347_v32 = vpop.f32.mrf.mxu3  ;;  %v522_v35 = vpop.f32.mrf.mxu2 }
 0x2b4   :  { %v568_v37 = vpop.f32.mrf.mxu0  ;;  %v523_v41 = vadd.f32 %v522_v35, %v283_v33  ;;  %v3385_v35 = vpop.f32.mrf.mxu1 }
 0x2b5   :  { %v569_v55 = vadd.f32 %v568_v37, %v285_v51  ;;  %v985_v37 = vld [vmem:[#allocation4 + $0xf8] sm:$0xff] }
 0x2bb   :  { %v3352_v38 = vpop.f32.mrf.mxu3  ;;  %v525_v39 = vpop.f32.mrf.mxu2 }
 0x2bc   :  { %v526_v40 = vadd.f32 %v525_v39, %v283_v33  ;;  %v571_v42 = vpop.f32.mrf.mxu0  ;;  %v781_v33 = vmul.f32 %v339_v21, %v3375_v8  ;;  %v3399_v1 = vpop.f32.mrf.mxu1 }
 0x2bd   :  { %v572_v53 = vadd.f32 %v571_v42, %v285_v51  ;;  %v280_v42 = vperm.slane %v3364_v61, 5  ;;  %v293_v51 = vperm.slane %v3362_v60, 2 }
 0x2be   :  { %859 = vmatpush.msra.mxu3 %v526_v40 }
 0x2c0   :  { %860 = vmatpush.msra.mxu3 %v523_v41  ;;  %v984_v41 = vld [vmem:[#allocation4 + $0xf0] sm:$0xff] }
 0x2c3   :  { %v545_v43 = vpop.f32.mrf.mxu3  ;;  %v614_v44 = vpop.f32.mrf.mxu2 }
 0x2c4   :  { %v3355_v49 = vpop.f32.mrf.mxu0  ;;  %v546_v52 = vadd.f32 %v545_v43, %v284_v46  ;;  %v615_v14 = vadd.f32 %v614_v44, %v287_v3  ;;  %v292_v43 = vperm.slane %v3362_v60, 1  ;;  %v342_v44 = vadd.f32 %v3333_v22, %v275_v13 }
 0x2c6   :  { %v783_v34 = vmul.f32 %v615_v14, %v3377_v9  ;;  %v782_v63 = vmul.f32 %v342_v44, %v3375_v8 }
 0x2c8   :  { %v785_v39 = vadd.f32 %v783_v34, %v781_v33  ;;  %v978_v34 = vld [vmem:[#allocation4 + $0xc0] sm:$0xff] }
 0x2cb   :  { %v548_v47 = vpop.f32.mrf.mxu3  ;;  %v617_v48 = vpop.f32.mrf.mxu2 }
 0x2cc   :  { %v549_v50 = vadd.f32 %v548_v47, %v284_v46  ;;  %v3366_v62 = vpop.f32.mrf.mxu0  ;;  %v618_v40 = vadd.f32 %v617_v48, %v287_v3  ;;  %v457_v46 = vadd.f32 %v3352_v38, %v280_v42  ;;  %v982_v48 = vld [vmem:[#allocation4 + $0xe0] sm:$0xff]  ;;  %v454_v38 = vadd.f32 %v3347_v32, %v280_v42 }
 0x2ce   :  { %961 = vmatpush.msra.mxu1 %v549_v50  ;;  %v288_v50 = vperm.slane %v3349_v36, 5  ;;  %v890_v21 = vmul.f32 %v454_v38, %v3375_v8 }
 0x2d0   :  { %962 = vmatpush.msra.mxu1 %v546_v52 }
 0x2d2   :  { %1109 = vmatpush.msrb.mxu1 %v572_v53  ;;  %v784_v53 = vmul.f32 %v618_v40, %v3377_v9  ;;  %v976_v40 = vld [vmem:[#allocation4 + $0xb0] sm:$0xff] }
 0x2d3   :  { %v3360_v58 = vpop.f32.mrf.mxu3  ;;  %v706_v59 = vpop.f32.mrf.mxu2 }
 0x2d4   :  { %1110 = vmatpush.msrb.mxu1 %v569_v55  ;;  %v707_v6 = vadd.f32 %v706_v59, %v291_v0  ;;  %v752_v18 = vpop.f32.mrf.mxu0  ;;  %v981_v59 = vld [vmem:[#allocation4 + $0xd8] sm:$0xff]  ;;  %v786_v10 = vadd.f32 %v784_v53, %v782_v63 }
 0x2d5   :  { %v753_v14 = vadd.f32 %v752_v18, %v293_v51 }
 0x2d6   :  { %v789_v17 = vmul.f32 %v707_v6, %v3377_v9  ;;  %v480_v6 = vadd.f32 %v3345_v31, %v281_v57  ;;  %v477_v31 = vadd.f32 %v3341_v28, %v281_v57  ;;  %v286_v57 = vperm.slane %v3349_v36, 3 }
 0x2d7   :  { %v1040_v18 = vmul.f32 %v753_v14, %v3377_v9 }
 0x2d8   :  { %v791_v27 = vadd.f32 %v789_v17, %v787_v30  ;;  %v1038_v33 = vmul.f32 %v477_v31, %v3375_v8 }
 0x2da   :  { %v1042_v44 = vadd.f32 %v1040_v18, %v1038_v33 }
 0x2db   :  { %v3373_v4 = vpop.f32.mrf.mxu3  ;;  %v709_v5 = vpop.f32.mrf.mxu2 }
 0x2dc   :  { %v710_v7 = vadd.f32 %v709_v5, %v291_v0  ;;  %v755_v47 = vpop.f32.mrf.mxu0  ;;  %v891_v0 = vmul.f32 %v457_v46, %v3375_v8  ;;  %v276_v5 = vperm.slane %v3364_v61, 1  ;;  %v641_v28 = vadd.f32 %v3373_v4, %v288_v50  ;;  %v974_v46 = vld [vmem:[#allocation4 + $0xa0] sm:$0xff]  ;;  %v973_v4 = vld [vmem:[#allocation4 + $0x98] sm:$0xff] }
 0x2dd   :  { %v756_v22 = vadd.f32 %v755_v47, %v293_v51  ;;  %v277_v51 = vperm.slane %v3364_v61, 2 }
 0x2de   :  { %v790_v12 = vmul.f32 %v710_v7, %v3377_v9  ;;  %v638_v7 = vadd.f32 %v3360_v58, %v288_v50  ;;  %v362_v32 = vadd.f32 %v3337_v24, %v276_v5  ;;  %v1039_v58 = vmul.f32 %v480_v6, %v3375_v8 }
 0x2df   :  { %v1041_v17 = vmul.f32 %v756_v22, %v3377_v9  ;;  %v365_v42 = vadd.f32 %v3335_v23, %v276_v5  ;;  %v887_v47 = vmul.f32 %v641_v28, %v3377_v9  ;;  %v385_v53 = vadd.f32 %v3339_v26, %v277_v51 }
 0x2e0   :  { %v792_v19 = vadd.f32 %v790_v12, %v788_v11  ;;  %v980_v11 = vld [vmem:[#allocation4 + $0xd0] sm:$0xff]  ;;  %v886_v30 = vmul.f32 %v638_v7, %v3377_v9  ;;  %v884_v24 = vmul.f32 %v362_v32, %v3375_v8  ;;  %v388_v26 = vadd.f32 %v3343_v29, %v277_v51  ;;  %v3440_v29 = vld [vmem:[%s3857_s1 + $0x8] sm:$0xff] }
 0x2e1   :  { %v885_v50 = vmul.f32 %v365_v42, %v3375_v8  ;;  %v1032_v63 = vmul.f32 %v385_v53, %v3375_v8 }
 0x2e2   :  { %807 = vmatpush.xpose.msrb.mxu2 %v792_v19  ;;  %v979_v19 = vld [vmem:[#allocation4 + $0xc8] sm:$0xff]  ;;  %v1033_v6 = vmul.f32 %v388_v26, %v3375_v8 }
 0x2e3   :  { %v729_v20 = vpop.f32.mrf.mxu3  ;;  %v889_v23 = vadd.f32 %v887_v47, %v885_v50 }
 0x2e4   :  { %v730_v55 = vadd.f32 %v729_v20, %v292_v43 }
 0x2e6   :  { %808 = vmatpush.xpose.msrb.mxu2 %v791_v27  ;;  %v892_v12 = vmul.f32 %v730_v55, %v3377_v9  ;;  %v1043_v27 = vadd.f32 %v1041_v17, %v1039_v58  ;;  %v971_v55 = vld [vmem:[#allocation4 + $0x88] sm:$0xff] }
 0x2e8   :  { %v894_v20 = vadd.f32 %v892_v12, %v890_v21 }
 0x2e9   :  { %809 = vmatmul.f32.vlgmr.msrb.gmra.mxu2 %v785_v39  ;;  %v888_v39 = vadd.f32 %v886_v30, %v884_v24 }
 0x2ea   :  { %986 = vmatpush.msra.mxu2 %v985_v37  ;;  %v977_v37 = vld [vmem:[#allocation4 + $0xb8] sm:$0xff] }
 0x2eb   :  { %v732_v52 = vpop.f32.mrf.mxu3 }
 0x2ec   :  { %987 = vmatpush.msra.mxu2 %v984_v41  ;;  %v733_v56 = vadd.f32 %v732_v52, %v292_v43  ;;  %v591_v41 = vpop.f32.mrf.mxu1  ;;  %v975_v43 = vld [vmem:[#allocation4 + $0xa8] sm:$0xff] }
 0x2ee   :  { %988 = vmatpush.msra.mxu2 %v983_v45  ;;  %v893_v3 = vmul.f32 %v733_v56, %v3377_v9  ;;  %v289_v45 = vperm.slane %v3349_v36, 6 }
 0x2f0   :  { %989 = vmatpush.msra.mxu2 %v982_v48  ;;  %v895_v13 = vadd.f32 %v893_v3, %v891_v0  ;;  %v661_v52 = vadd.f32 %v3355_v49, %v289_v45  ;;  %v972_v48 = vld [vmem:[#allocation4 + $0x90] sm:$0xff]  ;;  %v592_v49 = vadd.f32 %v591_v41, %v286_v57  ;;  %v664_v3 = vadd.f32 %v3366_v62, %v289_v45 }
 0x2f1   :  { %812 = vmatmul.f32.gmra.mxu2 %v786_v10  ;;  %v3433_v10 = vld [vmem:[%s3857_s1] sm:$0xff] }
 0x2f2   :  { %990 = vmatpush.msra.mxu2 %v981_v59  ;;  %910 = vmatpush.xpose.msra.mxu0 %v895_v13  ;;  %v1034_v22 = vmul.f32 %v661_v52, %v3377_v9  ;;  %v970_v59 = vld [vmem:[#allocation4 + $0x80] sm:$0xff]  ;;  %v1035_v5 = vmul.f32 %v664_v3, %v3377_v9 }
 0x2f4   :  { %991 = vmatpush.msra.mxu2 %v980_v11  ;;  %v594_v56 = vpop.f32.mrf.mxu1  ;;  %v1036_v0 = vadd.f32 %v1034_v22, %v1032_v63  ;;  %v1037_v7 = vadd.f32 %v1035_v5, %v1033_v6 }
 0x2f5   :  { %v595_v38 = vadd.f32 %v594_v56, %v286_v57 }
 0x2f6   :  { %992 = vmatpush.msra.mxu2 %v979_v19  ;;  %911 = vmatpush.xpose.msra.mxu0 %v894_v20 }
 0x2f8   :  { %993 = vmatpush.msra.mxu2 %v978_v34 }
 0x2f9   :  { %912 = vmatmul.f32.vlgmr.msra.gmra.mxu0 %v888_v39 }
 0x2fa   :  { %1058 = vmatpush.xpose.msrb.mxu0 %v1043_v27  ;;  %994 = vmatpush.msra.mxu2 %v977_v37 }
 0x2fc   :  { %995 = vmatpush.msra.mxu2 %v976_v40  ;;  %v683_v57 = vpop.f32.mrf.mxu1 }
 0x2fe   :  { %1059 = vmatpush.xpose.msrb.mxu0 %v1042_v44  ;;  %996 = vmatpush.msra.mxu2 %v975_v43 }
 0x300   :  { %997 = vmatpush.msra.mxu2 %v974_v46 }
 0x301   :  { %915 = vmatmul.f32.gmra.mxu0 %v889_v23 }
 0x302   :  { %998 = vmatpush.msra.mxu2 %v973_v4 }
 0x304   :  { %999 = vmatpush.msra.mxu2 %v972_v48  ;;  %v686_v22 = vpop.f32.mrf.mxu1 }
 0x306   :  { %1000 = vmatpush.msra.mxu2 %v971_v55 }
 0x308   :  { %1001 = vmatpush.msra.mxu2 %v970_v59 }
 0x309   :  { %1060 = vmatmul.f32.vlgmr.msrb.gmra.mxu0 %v1036_v0  ;;  %v282_v0 = vperm.slane %v3364_v61, 7 }
 0x30a   :  { %1236 = vmatpush.msrb.mxu2 %v595_v38  ;;  %v294_v38 = vperm.slane %v3362_v60, 3 }
 0x30b   :  { %v503_v26 = vadd.f32 %v3399_v1, %v282_v0 }
 0x30c   :  { %1237 = vmatpush.msrb.mxu2 %v592_v49  ;;  %v775_v59 = vpop.f32.mrf.mxu1 }
 0x30d   :  { %v776_v5 = vadd.f32 %v775_v59, %v294_v38  ;;  %v1120_v59 = vld [vmem:[#allocation4 + $0x110] sm:$0xff] }
 0x311   :  { %1063 = vmatmul.f32.gmra.mxu0 %v1037_v7 }
 0x314   :  { %v778_v63 = vpop.f32.mrf.mxu1 }
 0x315   :  { %v779_v3 = vadd.f32 %v778_v63, %v294_v38  ;;  %v1119_v63 = vld [vmem:[#allocation4 + $0x108] sm:$0xff] }
 0x317   :  { %v1168_v6 = vmul.f32 %v779_v3, %v3377_v9 }
 0x36c   :  { %v810_v47 = vpop.f32.mrf.mxu2 }
 0x36d   :  { %v3452_v50 = vadd.f32 %v810_v47, %v3433_v10 }
 0x36f   :  { %v817_v48 = vsel %vm816_vm11, %v3452_v50, -inf }
 0x374   :  { %v813_v53 = vpop.f32.mrf.mxu2 }
 0x375   :  { %v814_v55 = vadd.f32 %v813_v53, %v3440_v29  ;;  %v1126_v53 = vld [vmem:[#allocation4 + $0x140] sm:$0xff] }
 0x376   :  { %v913_v11 = vpop.f32.mrf.mxu0 }
 0x377   :  { %v914_v12 = vadd.f32 %v913_v11, %v3433_v10  ;;  %v820_v56 = vsel %vm816_vm11, %v814_v55, -inf  ;;  %v500_v11 = vadd.f32 %v3385_v35, %v282_v0  ;;  %v1133_v35 = vld [vmem:[#allocation4 + $0x178] sm:$0xff] }
 0x378   :  { %1134 = vmatpush.msra.mxu0 %v1133_v35 }
 0x379   :  { %v919_v62 = vsel %vm816_vm11, %v914_v12, -inf }
 0x37a   :  { %920 = vmax.xlane.f32.xlu0 %v919_v62 }
 0x37e   :  { %v916_v13 = vpop.f32.mrf.mxu0 }
 0x37f   :  { %v917_v32 = vadd.f32 %v916_v13, %v3440_v29 }
 0x381   :  { %v922_v14 = vsel %vm816_vm11, %v917_v32, -inf }
 0x382   :  { %923 = vmax.xlane.f32.xlu1 %v922_v14  ;;  %v1165_v14 = vmul.f32 %v500_v11, %v3375_v8 }
 0x386   :  { %v1061_v17 = vpop.f32.mrf.mxu0 }
 0x387   :  { %v1062_v19 = vadd.f32 %v1061_v17, %v3433_v10 }
 0x389   :  { %v1067_v21 = vsel %vm816_vm11, %v1062_v19, -inf }
 0x38a   :  { %1068 = vmax.xlane.f32.xlu2 %v1067_v21 }
 0x38e   :  { %v1064_v31 = vpop.f32.mrf.mxu0 }
 0x38f   :  { %v1065_v58 = vadd.f32 %v1064_v31, %v3440_v29  ;;  %v1132_v31 = vld [vmem:[#allocation4 + $0x170] sm:$0xff] }
 0x390   :  { %1135 = vmatpush.msra.mxu0 %v1132_v31 }
 0x391   :  { %v1070_v30 = vsel %vm816_vm11, %v1065_v58, -inf }
 0x392   :  { %1071 = vmax.xlane.f32.xlu1 %v1070_v30  ;;  %v1130_v30 = vld [vmem:[#allocation4 + $0x160] sm:$0xff] }
 0x3ed   :  { %v921_v34 = vpop.xlane.xlu0 %920 }
 0x3ee   :  { %v925_v20 = vsub.f32 %v914_v12, %v921_v34  ;;  %v1166_v12 = vmul.f32 %v503_v26, %v3375_v8 }
 0x3f0   :  { %v927_v24 = vmul.f32 1.442695, %v925_v20  ;;  %v1170_v60 = vadd.f32 %v1168_v6, %v1166_v12 }
 0x3f2   :  { %2998 = vpow2.f32 %v927_v24 }
 0x3f5   :  { %v924_v18 = vpop.xlane.xlu1 %923 }
 0x3f6   :  { %v926_v27 = vsub.f32 %v917_v32, %v924_v18  ;;  %v1167_v32 = vmul.f32 %v776_v5, %v3377_v9  ;;  %v1129_v18 = vld [vmem:[#allocation4 + $0x158] sm:$0xff] }
 0x3f8   :  { %v2999_v37 = vpop.eup %2998  ;;  %v929_v33 = vmul.f32 1.442695, %v926_v27  ;;  %v1169_v1 = vadd.f32 %v1167_v32, %v1165_v14  ;;  %v1128_v27 = vld [vmem:[#allocation4 + $0x150] sm:$0xff]  ;;  %v883_v14 = vld [vmem:[#allocation4 + $0x78] sm:$0xff] }
 0x3f9   :  { %v931_v39 = vsel %vm816_vm11, %v2999_v37, 0.0  ;;  %1009 = vmatpush.msrb.mxu3 %v883_v14 }
 0x3fa   :  { %3000 = vpow2.f32 %v929_v33  ;;  %932 = vadd.xlane.f32.xlu2 %v931_v39  ;;  %v1127_v33 = vld [vmem:[#allocation4 + $0x148] sm:$0xff]  ;;  %v278_v39 = vperm.slane %v3364_v61, 3 }
 0x3fc   :  { %v411_v61 = vadd.f32 %v3370_v2, %v278_v39  ;;  %v1122_v2 = vld [vmem:[#allocation4 + $0x120] sm:$0xff] }
 0x3fd   :  { %v1069_v28 = vpop.xlane.xlu2 %1068 }
 0x3fe   :  { %v1073_v40 = vsub.f32 %v1062_v19, %v1069_v28 }
 0x400   :  { %v3001_v41 = vpop.eup %3000  ;;  %v1075_v42 = vmul.f32 1.442695, %v1073_v40 }
 0x401   :  { %v934_v43 = vsel %vm816_vm11, %v3001_v41, 0.0 }
 0x402   :  { %3002 = vpow2.f32 %v1075_v42  ;;  %935 = vadd.xlane.f32.xlu1 %v934_v43 }
 0x405   :  { %v1072_v44 = vpop.xlane.xlu1 %1071 }
 0x406   :  { %v1074_v45 = vsub.f32 %v1065_v58, %v1072_v44  ;;  %v1131_v58 = vld [vmem:[#allocation4 + $0x168] sm:$0xff]  ;;  %v408_v44 = vadd.f32 %v3358_v54, %v278_v39 }
 0x407   :  { %1136 = vmatpush.msra.mxu0 %v1131_v58 }
 0x408   :  { %v3003_v46 = vpop.eup %3002  ;;  %v1077_v51 = vmul.f32 1.442695, %v1074_v45 }
 0x409   :  { %v1079_v4 = vsel %vm816_vm11, %v3003_v46, 0.0  ;;  %1137 = vmatpush.msra.mxu0 %v1130_v30 }
 0x40a   :  { %3004 = vpow2.f32 %v1077_v51  ;;  %1080 = vadd.xlane.f32.xlu2 %v1079_v4 }
 0x40b   :  { %1138 = vmatpush.msra.mxu0 %v1129_v18 }
 0x40d   :  { %1139 = vmatpush.msra.mxu0 %v1128_v27 }
 0x40f   :  { %1140 = vmatpush.msra.mxu0 %v1127_v33 }
 0x410   :  { %v3454_v52 = vpop.eup %3004 }
 0x411   :  { %v1082_v23 = vsel %vm816_vm11, %v3454_v52, 0.0  ;;  %1141 = vmatpush.msra.mxu0 %v1126_v53  ;;  %v1256_v53 = vld [vmem:[#allocation4 + $0x1d8] sm:$0xff] }
 0x412   :  { %1083 = vadd.xlane.f32.xlu1 %v1082_v23  ;;  %818 = vmax.xlane.f32.xlu2 %v817_v48  ;;  %v1160_v23 = vmul.f32 %v411_v61, %v3375_v8  ;;  %v868_v61 = vld [vmem:[#allocation4] sm:$0xff] }
 0x41a   :  { %821 = vmax.xlane.f32.xlu1 %v820_v56  ;;  %v1124_v56 = vld [vmem:[#allocation4 + $0x130] sm:$0xff] }
 0x46d   :  { %v933_v49 = vpop.xlane.xlu2 %932 }
 0x46e   :  { %3006 = vrcp.f32 %v933_v49 }
 0x474   :  { %v3007_v7 = vpop.eup %3006 }
 0x475   :  { %v939_v62 = vmul.f32 %v3007_v7, %v2999_v37  ;;  %v936_v13 = vpop.xlane.xlu1 %935  ;;  %v290_v37 = vperm.slane %v3349_v36, 7  ;;  %v1159_v36 = vmul.f32 %v408_v44, %v3375_v8  ;;  %v874_v44 = vld [vmem:[#allocation4 + $0x30] sm:$0xff] }
 0x476   :  { %3008 = vrcp.f32 %v936_v13 }
 0x477   :  { %2892 = vmatmul.msk.f32.vlgmr.msra.gmra.mxu1 %vm816_vm11, %v939_v62  ;;  %v684_v40 = vadd.f32 %v683_v57, %v290_v37  ;;  %v687_v51 = vadd.f32 %v686_v22, %v290_v37  ;;  %v1123_v57 = vld [vmem:[#allocation4 + $0x128] sm:$0xff]  ;;  %v1121_v22 = vld [vmem:[#allocation4 + $0x118] sm:$0xff] }
 0x478   :  { %1185 = vmatpush.xpose.msra.mxu1 %v1170_v60 }
 0x479   :  { %v1162_v54 = vmul.f32 %v687_v51, %v3377_v9  ;;  %v869_v51 = vld [vmem:[#allocation4 + $0x8] sm:$0xff] }
 0x47b   :  { %v1164_v48 = vadd.f32 %v1162_v54, %v1160_v23  ;;  %v1258_v23 = vld [vmem:[#allocation4 + $0x1e8] sm:$0xff] }
 0x47c   :  { %v3009_v17 = vpop.eup %3008  ;;  %1186 = vmatpush.xpose.msra.mxu1 %v1169_v1  ;;  %v881_v1 = vld [vmem:[#allocation4 + $0x68] sm:$0xff] }
 0x47d   :  { %v1081_v19 = vpop.xlane.xlu2 %1080  ;;  %v940_v21 = vmul.f32 %v3009_v17, %v3001_v41 }
 0x47e   :  { %3010 = vrcp.f32 %v1081_v19  ;;  %v879_v19 = vld [vmem:[#allocation4 + $0x58] sm:$0xff] }
 0x47f   :  { %2893 = vmatmul.msk.f32.gmra.mxu1 %vm816_vm11, %v940_v21 }
 0x484   :  { %v3011_v34 = vpop.eup %3010 }
 0x485   :  { %v1087_v20 = vmul.f32 %v3011_v34, %v3003_v46  ;;  %v1084_v24 = vpop.xlane.xlu1 %1083  ;;  %v1161_v46 = vmul.f32 %v684_v40, %v3377_v9  ;;  %v1118_v9 = vld [vmem:[#allocation4 + $0x100] sm:$0xff]  ;;  %v819_v0 = vpop.xlane.xlu2 %818  ;;  %v878_v40 = vld [vmem:[#allocation4 + $0x50] sm:$0xff] }
 0x486   :  { %3012 = vrcp.f32 %v1084_v24  ;;  %v823_v26 = vsub.f32 %v3452_v50, %v819_v0  ;;  %v882_v50 = vld [vmem:[#allocation4 + $0x70] sm:$0xff]  ;;  %v1249_v0 = vld [vmem:[#allocation4 + $0x1a0] sm:$0xff] }
 0x487   :  { %2894 = vmatmul.msk.f32.vlgmr.msrb.gmra.mxu1 %vm816_vm11, %v1087_v20  ;;  %v1163_v47 = vadd.f32 %v1161_v46, %v1159_v36  ;;  %1010 = vmatpush.msrb.mxu3 %v882_v50  ;;  %v872_v46 = vld [vmem:[#allocation4 + $0x20] sm:$0xff]  ;;  %v871_v36 = vld [vmem:[#allocation4 + $0x18] sm:$0xff] }
 0x488   :  { %v825_v5 = vmul.f32 1.442695, %v823_v26 }
 0x489   :  { %1011 = vmatpush.msrb.mxu3 %v881_v1 }
 0x48c   :  { %v3013_v28 = vpop.eup %3012 }
 0x48d   :  { %v822_v41 = vpop.xlane.xlu1 %821  ;;  %v1088_v42 = vmul.f32 %v3013_v28, %v3454_v52 }
 0x48e   :  { %v824_v43 = vsub.f32 %v814_v55, %v822_v41  ;;  %v1125_v55 = vld [vmem:[#allocation4 + $0x138] sm:$0xff]  ;;  %v877_v41 = vld [vmem:[#allocation4 + $0x48] sm:$0xff] }
 0x48f   :  { %2895 = vmatmul.msk.f32.gmra.mxu1 %vm816_vm11, %v1088_v42  ;;  %1142 = vmatpush.msra.mxu0 %v1125_v55  ;;  %v876_v42 = vld [vmem:[#allocation4 + $0x40] sm:$0xff]  ;;  %v1255_v55 = vld [vmem:[#allocation4 + $0x1d0] sm:$0xff] }
 0x490   :  { %v827_v45 = vmul.f32 1.442695, %v824_v43  ;;  %v875_v43 = vld [vmem:[#allocation4 + $0x38] sm:$0xff] }
 0x491   :  { %1143 = vmatpush.msra.mxu0 %v1124_v56 }
 0x492   :  { %3014 = vpow2.f32 %v827_v45  ;;  %v873_v45 = vld [vmem:[#allocation4 + $0x28] sm:$0xff] }
 0x493   :  { %1144 = vmatpush.msra.mxu0 %v1123_v57  ;;  %3016 = vpow2.f32 %v825_v5  ;;  %v1247_v5 = vld [vmem:[#allocation4 + $0x190] sm:$0xff] }
 0x495   :  { %1145 = vmatpush.msra.mxu0 %v1122_v2 }
 0x497   :  { %1187 = vmatmul.f32.vlgmr.msra.gmra.mxu1 %v1163_v47  ;;  %1146 = vmatpush.msra.mxu0 %v1121_v22  ;;  %v870_v47 = vld [vmem:[#allocation4 + $0x10] sm:$0xff]  ;;  %v1254_v22 = vld [vmem:[#allocation4 + $0x1c8] sm:$0xff] }
 0x498   :  { %v3481_v4 = vpop.eup %3014 }
 0x499   :  { %v832_v52 = vsel %vm816_vm11, %v3481_v4, 0.0  ;;  %1147 = vmatpush.msra.mxu0 %v1120_v59  ;;  %v3017_v12 = vpop.eup %3016  ;;  %v1253_v59 = vld [vmem:[#allocation4 + $0x1c0] sm:$0xff] }
 0x49a   :  { %833 = vadd.xlane.f32.xlu0 %v832_v52  ;;  %v829_v60 = vsel %vm816_vm11, %v3017_v12, 0.0  ;;  %v1259_v52 = vld [vmem:[#allocation4 + $0x1f0] sm:$0xff] }
 0x49b   :  { %1148 = vmatpush.msra.mxu0 %v1119_v63  ;;  %v1252_v63 = vld [vmem:[#allocation4 + $0x1b8] sm:$0xff] }
 0x49d   :  { %1149 = vmatpush.msra.mxu0 %v1118_v9  ;;  %v1251_v9 = vld [vmem:[#allocation4 + $0x1b0] sm:$0xff] }
 0x49f   :  { %1190 = vmatmul.f32.gmra.mxu1 %v1164_v48  ;;  %v1257_v48 = vld [vmem:[#allocation4 + $0x1e0] sm:$0xff] }
 0x4f4   :  { %v964_v8 = vpop.f32.mrf.mxu1 }
 0x4f5   :  { %1002 = vmatmul.f32.vlgmr.msra.gmra.mxu2 %v964_v8 }
 0x4fc   :  { %v967_v38 = vpop.f32.mrf.mxu1 }
 0x4fd   :  { %1005 = vmatmul.f32.gmra.mxu2 %v967_v38 }
 0x504   :  { %v1112_v49 = vpop.f32.mrf.mxu1 }
 0x505   :  { %1150 = vmatmul.f32.vlgmr.msra.gmra.mxu0 %v1112_v49  ;;  %v1250_v49 = vld [vmem:[#allocation4 + $0x1a8] sm:$0xff] }
 0x50c   :  { %v1115_v3 = vpop.f32.mrf.mxu1 }
 0x50d   :  { %1153 = vmatmul.f32.gmra.mxu0 %v1115_v3  ;;  %v834_v20 = vpop.xlane.xlu0 %833  ;;  %v1248_v3 = vld [vmem:[#allocation4 + $0x198] sm:$0xff] }
 0x514   :  { %v1188_v6 = vpop.f32.mrf.mxu1 }
 0x515   :  { %v1189_v7 = vadd.f32 %v1188_v6, %v3433_v10  ;;  %v880_v10 = vld [vmem:[#allocation4 + $0x60] sm:$0xff]  ;;  %v1246_v6 = vld [vmem:[#allocation4 + $0x188] sm:$0xff] }
 0x516   :  { %1012 = vmatpush.msrb.mxu3 %v880_v10 }
 0x517   :  { %v1194_v11 = vsel %vm816_vm11, %v1189_v7, -inf }
 0x518   :  { %1195 = vmax.xlane.f32.xlu2 %v1194_v11  ;;  %1013 = vmatpush.msrb.mxu3 %v879_v19  ;;  %v1245_v11 = vld [vmem:[#allocation4 + $0x180] sm:$0xff] }
 0x51a   :  { %1014 = vmatpush.msrb.mxu3 %v878_v40 }
 0x51c   :  { %v1191_v62 = vpop.f32.mrf.mxu1  ;;  %1015 = vmatpush.msrb.mxu3 %v877_v41 }
 0x51d   :  { %v1192_v13 = vadd.f32 %v1191_v62, %v3440_v29 }
 0x51e   :  { %1016 = vmatpush.msrb.mxu3 %v876_v42 }
 0x51f   :  { %v1197_v32 = vsel %vm816_vm11, %v1192_v13, -inf }
 0x520   :  { %1198 = vmax.xlane.f32.xlu1 %v1197_v32  ;;  %830 = vadd.xlane.f32.xlu2 %v829_v60 }
 0x521   :  { %1017 = vmatpush.msrb.mxu3 %v875_v43 }
 0x523   :  { %1018 = vmatpush.msrb.mxu3 %v874_v44 }
 0x525   :  { %1019 = vmatpush.msrb.mxu3 %v873_v45  ;;  %v1347_v45 = vld [vmem:[#allocation4 + $0x218] sm:$0xff] }
 0x526   :  { %1368 = vmatpush.msrb.mxu1 %v1347_v45 }
 0x527   :  { %1020 = vmatpush.msrb.mxu3 %v872_v46  ;;  %v1346_v46 = vld [vmem:[#allocation4 + $0x210] sm:$0xff] }
 0x528   :  { %1369 = vmatpush.msrb.mxu1 %v1346_v46 }
 0x529   :  { %1021 = vmatpush.msrb.mxu3 %v871_v36  ;;  %v1345_v36 = vld [vmem:[#allocation4 + $0x208] sm:$0xff] }
 0x52a   :  { %1370 = vmatpush.msrb.mxu1 %v1345_v36  ;;  %v2981_v36 = vld [vmem:[#allocation4 + $0x266] ss:$0 sm:$0xff] }
 0x52b   :  { %1022 = vmatpush.msrb.mxu3 %v870_v47  ;;  %v1344_v47 = vld [vmem:[#allocation4 + $0x200] sm:$0xff] }
 0x52c   :  { %1371 = vmatpush.msrb.mxu1 %v1344_v47 }
 0x52d   :  { %1023 = vmatpush.msrb.mxu3 %v869_v51 }
 0x52f   :  { %1024 = vmatpush.msrb.mxu3 %v868_v61 }
 0x582   :  { %v1151_v1 = vpop.f32.mrf.mxu0 }
 0x58b   :  { %v1196_v17 = vpop.xlane.xlu2 %1195 }
 0x58c   :  { %v1200_v21 = vsub.f32 %v1189_v7, %v1196_v17  ;;  %v2977_v17 = vld [vmem:[#allocation4 + $0x264] ss:$0 sm:$0xff] }
 0x58e   :  { %v1202_v35 = vmul.f32 1.442695, %v1200_v21 }
 0x590   :  { %3018 = vpow2.f32 %v1202_v35 }
 0x593   :  { %v1199_v29 = vpop.xlane.xlu1 %1198  ;;  %v831_v31 = vpop.xlane.xlu2 %830 }
 0x594   :  { %v1201_v58 = vsub.f32 %v1192_v13, %v1199_v29  ;;  %3020 = vrcp.f32 %v831_v31 }
 0x596   :  { %v3019_v30 = vpop.eup %3018  ;;  %v1204_v34 = vmul.f32 1.442695, %v1201_v58  ;;  %v1154_v58 = vpop.f32.mrf.mxu0 }
 0x597   :  { %v1206_v24 = vsel %vm816_vm11, %v3019_v30, 0.0 }
 0x598   :  { %3022 = vpow2.f32 %v1204_v34  ;;  %1207 = vadd.xlane.f32.xlu1 %v1206_v24 }
 0x599   :  { %3024 = vrcp.f32 %v834_v20 }
 0x59a   :  { %v3021_v18 = vpop.eup %3020 }
 0x59b   :  { %v837_v27 = vmul.f32 %v3021_v18, %v3017_v12  ;;  %v1003_v12 = vpop.f32.mrf.mxu2 }
 0x59d   :  { %2890 = vmatmul.msk.f32.vlgmr.msra.gmra.mxu3 %vm816_vm11, %v837_v27 }
 0x59e   :  { %v3023_v37 = vpop.eup %3022 }
 0x59f   :  { %v1209_v33 = vsel %vm816_vm11, %v3023_v37, 0.0  ;;  %v3025_v39 = vpop.eup %3024 }
 0x5a0   :  { %1210 = vadd.xlane.f32.xlu2 %v1209_v33  ;;  %v838_v28 = vmul.f32 %v3025_v39, %v3481_v4  ;;  %v1260_v4 = vld [vmem:[#allocation4 + $0x1f8] sm:$0xff] }
 0x5a1   :  { %1261 = vmatpush.msra.mxu3 %v1260_v4 }
 0x5a3   :  { %1262 = vmatpush.msra.mxu3 %v1259_v52  ;;  %v1006_v62 = vpop.f32.mrf.mxu2 }
 0x5a5   :  { %2891 = vmatmul.msk.f32.gmra.mxu3 %vm816_vm11, %v838_v28 }
 0x5a6   :  { %1263 = vmatpush.msra.mxu3 %v1258_v23 }
 0x5a8   :  { %1264 = vmatpush.msra.mxu3 %v1257_v48 }
 0x5aa   :  { %1265 = vmatpush.msra.mxu3 %v1256_v53 }
 0x5ac   :  { %1266 = vmatpush.msra.mxu3 %v1255_v55 }
 0x5ae   :  { %1267 = vmatpush.msra.mxu3 %v1254_v22 }
 0x5b0   :  { %1268 = vmatpush.msra.mxu3 %v1253_v59 }
 0x5b2   :  { %1269 = vmatpush.msra.mxu3 %v1252_v63  ;;  %v2978_v63 = vld [vmem:[#allocation4 + $0x262] ss:$0 sm:$0xff] }
 0x5b4   :  { %1270 = vmatpush.msra.mxu3 %v1251_v9 }
 0x5b6   :  { %1271 = vmatpush.msra.mxu3 %v1250_v49  ;;  %v2979_v49 = vld [vmem:[#allocation4 + $0x263] ss:$0 sm:$0xff] }
 0x5b8   :  { %1272 = vmatpush.msra.mxu3 %v1249_v0 }
 0x5ba   :  { %1273 = vmatpush.msra.mxu3 %v1248_v3 }
 0x5bc   :  { %1274 = vmatpush.msra.mxu3 %v1247_v5 }
 0x5be   :  { %1275 = vmatpush.msra.mxu3 %v1246_v6 }
 0x5c0   :  { %1276 = vmatpush.msra.mxu3 %v1245_v11 }
 0x60b   :  { %v1208_v54 = vpop.xlane.xlu1 %1207 }
 0x60c   :  { %3026 = vrcp.f32 %v1208_v54 }
 0x612   :  { %v3027_v56 = vpop.eup %3026 }
 0x613   :  { %v1214_v57 = vmul.f32 %v3027_v56, %v3019_v30  ;;  %v1211_v2 = vpop.xlane.xlu2 %1210 }
 0x614   :  { %3028 = vrcp.f32 %v1211_v2 }
 0x615   :  { %2896 = vmatmul.msk.f32.vlgmr.msrb.gmra.mxu2 %vm816_vm11, %v1214_v57 }
 0x61a   :  { %v3029_v8 = vpop.eup %3028 }
 0x61b   :  { %v1215_v38 = vmul.f32 %v3029_v8, %v3023_v37 }
 0x61d   :  { %2897 = vmatmul.msk.f32.gmra.mxu2 %vm816_vm11, %v1215_v38 }
 0x620   :  { %v862_v26 = vpop.f32.mrf.mxu3 }
 0x621   :  { %1025 = vmatmul.f32.vlgmr.msrb.gmra.mxu3 %v862_v26 }
 0x628   :  { %v865_v7 = vpop.f32.mrf.mxu3 }
 0x629   :  { %1028 = vmatmul.f32.gmra.mxu3 %v865_v7 }
 0x698   :  { %v1239_v13 = vpop.f32.mrf.mxu2 }
 0x699   :  { %1277 = vmatmul.f32.vlgmr.msra.gmra.mxu3 %v1239_v13  ;;  %v1404_v13 = vld [vmem:[#allocation4 + $0x258] sm:$0xff] }
 0x69a   :  { %1422 = vmatpush.msra.mxu2 %v1404_v13  ;;  %v1494_v13 = vld [vmem:[#allocation2 + $0x328] sm:$0xff] }
 0x6a0   :  { %v1242_v32 = vpop.f32.mrf.mxu2 }
 0x6a1   :  { %1280 = vmatmul.f32.gmra.mxu3 %v1242_v32  ;;  %v1403_v32 = vld [vmem:[#allocation4 + $0x250] sm:$0xff] }
 0x6a2   :  { %1423 = vmatpush.msra.mxu2 %v1403_v32  ;;  %v1495_v32 = vld [vmem:[#allocation2 + $0x330] sm:$0xff] }
 0x6a4   :  { %v1026_v60 = vpop.f32.mrf.mxu3 }
 0x6a5   :  { %v1027_v50 = vadd.f32 %v1026_v60, %v1003_v12  ;;  %v1402_v60 = vld [vmem:[#allocation4 + $0x248] sm:$0xff] }
 0x6a6   :  { %1424 = vmatpush.msra.mxu2 %v1402_v60  ;;  %v1496_v60 = vld [vmem:[#allocation2 + $0x338] sm:$0xff] }
 0x6a7   :  { %v1157_v10 = vadd.f32 %v1151_v1, %v1027_v50  ;;  %v1400_v50 = vld [vmem:[#allocation4 + $0x238] sm:$0xff]  ;;  %v1399_v1 = vld [vmem:[#allocation4 + $0x230] sm:$0xff] }
 0x6ac   :  { %v1029_v14 = vpop.f32.mrf.mxu3 }
 0x6ad   :  { %v1030_v35 = vadd.f32 %v1029_v14, %v1006_v62  ;;  %v1401_v14 = vld [vmem:[#allocation4 + $0x240] sm:$0xff] }
 0x6ae   :  { %1425 = vmatpush.msra.mxu2 %v1401_v14 }
 0x6af   :  { %v1158_v34 = vadd.f32 %v1154_v58, %v1030_v35 }
 0x6b0   :  { %1426 = vmatpush.msra.mxu2 %v1400_v50 }
 0x6b2   :  { %1427 = vmatpush.msra.mxu2 %v1399_v1 }
 0x71c   :  { %v1278_v19 = vpop.f32.mrf.mxu3 }
 0x71d   :  { %v1284_v21 = vadd.f32 %v1278_v19, %v1157_v10  ;;  %v1398_v10 = vld [vmem:[#allocation4 + $0x228] sm:$0xff]  ;;  %v2980_v19 = vld [vmem:[#allocation4 + $0x265] ss:$0 sm:$0xff] }
 0x71e   :  { %1428 = vmatpush.msra.mxu2 %v1398_v10  ;;  %v1557_v10 = vld [vmem:[#allocation2 + $0x520] sm:$0xff] }
 0x71f   :  { %v1288_v29 = vadd.f32 %v2977_v17, %v1284_v21 }
 0x721   :  { %v3501_v31 = vadd.f32 %v1288_v29, %v3221_v15 }
 0x723   :  { %v1294_v30 = vsel %vm124_vm3, %v3501_v31, 0.0 }
 0x724   :  { %1295 = vadd.xlane.f32.xlu0 %v1294_v30  ;;  %v1281_v20 = vpop.f32.mrf.mxu3 }
 0x725   :  { %v1285_v24 = vadd.f32 %v1281_v20, %v1158_v34 }
 0x727   :  { %v1289_v18 = vadd.f32 %v2977_v17, %v1285_v24  ;;  %v1397_v17 = vld [vmem:[#allocation4 + $0x220] sm:$0xff] }
 0x728   :  { %1429 = vmatpush.msra.mxu2 %v1397_v17  ;;  %v1558_v17 = vld [vmem:[#allocation2 + $0x528] sm:$0xff] }
 0x729   :  { %v3506_v27 = vadd.f32 %v1289_v18, %v3223_v16 }
 0x72b   :  { %v1297_v37 = vsel %vm124_vm3, %v3506_v27, 0.0 }
 0x72c   :  { %1298 = vadd.xlane.f32.xlu1 %v1297_v37 }
 0x797   :  { %v1296_v33 = vpop.xlane.xlu0 %1295 }
 0x798   :  { %v1300_v15 = vmul.f32 %v1296_v33, %v3229_v25 }
 0x79a   :  { %v1302_v39 = vsub.f32 %v3501_v31, %v1300_v15 }
 0x79c   :  { %v1304_v28 = vmul.f32 %v1302_v39, %v1302_v39 }
 0x79e   :  { %v1306_v40 = vsel %vm124_vm3, %v1304_v28, 0.0 }
 0x79f   :  { %1307 = vadd.xlane.f32.xlu2 %v1306_v40  ;;  %v1299_v41 = vpop.xlane.xlu1 %1298 }
 0x7a0   :  { %v1301_v42 = vmul.f32 %v1299_v41, %v3229_v25 }
 0x7a2   :  { %v1303_v43 = vsub.f32 %v3506_v27, %v1301_v42 }
 0x7a4   :  { %v1305_v16 = vmul.f32 %v1303_v43, %v1303_v43 }
 0x7a6   :  { %v1309_v44 = vsel %vm124_vm3, %v1305_v16, 0.0 }
 0x7a7   :  { %1310 = vadd.xlane.f32.xlu0 %v1309_v44 }
 0x812   :  { %v1308_v51 = vpop.xlane.xlu2 %1307 }
 0x813   :  { %v1312_v61 = vmul.f32 %v1308_v51, %v3229_v25 }
 0x815   :  { %v1314_v4 = vadd.f32 1e-05, %v1312_v61 }
 0x817   :  { %3030 = vrsqrt.f32 %v1314_v4  ;;  %vm1322_vm13 = vweird.f32 %v1314_v4 }
 0x81a   :  { %v1311_v52 = vpop.xlane.xlu0 %1310 }
 0x81b   :  { %v1313_v54 = vmul.f32 %v1311_v52, %v3229_v25 }
 0x81d   :  { %v3031_v23 = vpop.eup %3030  ;;  %v1315_v48 = vadd.f32 1e-05, %v1313_v54 }
 0x81e   :  { %v1317_v53 = vmul.f32 %v3031_v23, %v1314_v4  ;;  %vm1323_vm12 = vweird.f32 %v3031_v23 }
 0x81f   :  { %3032 = vrsqrt.f32 %v1315_v48  ;;  %vm1324_vm14 = vmor %vm1322_vm13, %vm1323_vm12  ;;  %vm1332_vm0 = vweird.f32 %v1315_v48 }
 0x820   :  { %v1318_v55 = vmul.f32 %v3031_v23, %v1317_v53 }
 0x822   :  { %v1319_v56 = vmul.f32 0.5, %v1318_v55 }
 0x824   :  { %v1320_v57 = vsub.f32 1.5, %v1319_v56 }
 0x825   :  { %v3033_v2 = vpop.eup %3032 }
 0x826   :  { %v1321_v22 = vmul.f32 %v3031_v23, %v1320_v57  ;;  %v1327_v59 = vmul.f32 %v3033_v2, %v1315_v48  ;;  %vm1333_vm15 = vweird.f32 %v3033_v2 }
 0x827   :  { %vm1334_vm1 = vmor %vm1332_vm0, %vm1333_vm15 }
 0x828   :  { %v1325_v9 = vsel %vm1324_vm14, %v3031_v23, %v1321_v22  ;;  %v1328_v8 = vmul.f32 %v3033_v2, %v1327_v59 }
 0x829   :  { %v1336_v38 = vmul.f32 %v1325_v9, %v1302_v39  ;;  %v1553_v9 = vld [vmem:[#allocation2 + $0x500] sm:$0xff] }
 0x82a   :  { %v1329_v0 = vmul.f32 0.5, %v1328_v8  ;;  %v1554_v8 = vld [vmem:[#allocation2 + $0x508] sm:$0xff]  ;;  %1644 = vmatpush.msrb.mxu0 %v1553_v9  ;;  %v1564_v9 = vld [vmem:[#allocation2 + $0x558] sm:$0xff] }
 0x82b   :  { %v1339_v3 = vmul.f32 %v2978_v63, %v1336_v38  ;;  %v1555_v38 = vld [vmem:[#allocation2 + $0x510] sm:$0xff]  ;;  %1667 = vmatpush.msra.mxu1 %v1554_v8  ;;  %v1541_v8 = vld [vmem:[#allocation2 + $0x4a0] sm:$0xff] }
 0x82c   :  { %v1330_v26 = vsub.f32 1.5, %v1329_v0  ;;  %1690 = vmatpush.msrb.mxu2 %v1555_v38  ;;  %v1533_v0 = vld [vmem:[#allocation2 + $0x460] sm:$0xff]  ;;  %v1542_v38 = vld [vmem:[#allocation2 + $0x4a8] sm:$0xff] }
 0x82d   :  { %v1342_v5 = vadd.f32 %v2979_v49, %v1339_v3  ;;  %v1534_v3 = vld [vmem:[#allocation2 + $0x468] sm:$0xff]  ;;  %1645 = vmatpush.msrb.mxu0 %v1533_v0  ;;  %v1543_v0 = vld [vmem:[#allocation2 + $0x4b0] sm:$0xff] }
 0x82e   :  { %v1331_v6 = vmul.f32 %v3033_v2, %v1330_v26  ;;  %v1535_v26 = vld [vmem:[#allocation2 + $0x470] sm:$0xff]  ;;  %1668 = vmatpush.msra.mxu1 %v1534_v3  ;;  %v1544_v3 = vld [vmem:[#allocation2 + $0x4b8] sm:$0xff] }
 0x82f   :  { %2898 = vmatmul.msk.f32.vlgmr.msrb.gmra.mxu1 %vm124_vm3, %v1342_v5  ;;  %v1536_v5 = vld [vmem:[#allocation2 + $0x478] sm:$0xff]  ;;  %1691 = vmatpush.msrb.mxu2 %v1535_v26  ;;  %v1521_v26 = vld [vmem:[#allocation2 + $0x400] sm:$0xff] }
 0x830   :  { %v1335_v7 = vsel %vm1334_vm1, %v3033_v2, %v1331_v6  ;;  %v1513_v6 = vld [vmem:[#allocation2 + $0x3c0] sm:$0xff] }
 0x831   :  { %v1337_v11 = vmul.f32 %v1335_v7, %v1303_v43  ;;  %v1514_v7 = vld [vmem:[#allocation2 + $0x3c8] sm:$0xff]  ;;  %1646 = vmatpush.msrb.mxu0 %v1513_v6 }
 0x832   :  { %1669 = vmatpush.msra.mxu1 %v1514_v7  ;;  %v1523_v7 = vld [vmem:[#allocation2 + $0x410] sm:$0xff] }
 0x833   :  { %v1340_v12 = vmul.f32 %v2978_v63, %v1337_v11  ;;  %v1515_v11 = vld [vmem:[#allocation2 + $0x3d0] sm:$0xff] }
 0x834   :  { %1692 = vmatpush.msrb.mxu2 %v1515_v11  ;;  %1670 = vmatpush.msra.mxu1 %v1494_v13  ;;  %v1524_v11 = vld [vmem:[#allocation2 + $0x418] sm:$0xff]  ;;  %v1503_v13 = vld [vmem:[#allocation2 + $0x370] sm:$0xff] }
 0x835   :  { %v1343_v62 = vadd.f32 %v2979_v49, %v1340_v12  ;;  %v1556_v49 = vld [vmem:[#allocation2 + $0x518] sm:$0xff] }
 0x836   :  { %1713 = vmatpush.msrb.mxu3 %v1556_v49  ;;  %v1516_v12 = vld [vmem:[#allocation2 + $0x3d8] sm:$0xff]  ;;  %1693 = vmatpush.msrb.mxu2 %v1495_v32 }
 0x837   :  { %2899 = vmatmul.msk.f32.gmra.mxu1 %vm124_vm3, %v1343_v62  ;;  %v1493_v62 = vld [vmem:[#allocation2 + $0x320] sm:$0xff]  ;;  %v1504_v32 = vld [vmem:[#allocation2 + $0x378] sm:$0xff] }
 0x838   :  { %1714 = vmatpush.msrb.mxu3 %v1536_v5  ;;  %1647 = vmatpush.msrb.mxu0 %v1493_v62  ;;  %v1522_v5 = vld [vmem:[#allocation2 + $0x408] sm:$0xff] }
 0x839   :  { %1759 = vmatpush.msrb.mxu1 %v1558_v17  ;;  %v1502_v62 = vld [vmem:[#allocation2 + $0x368] sm:$0xff] }
 0x83a   :  { %1715 = vmatpush.msrb.mxu3 %v1516_v12  ;;  %1736 = vmatpush.msra.mxu0 %v1557_v10  ;;  %v1545_v10 = vld [vmem:[#allocation2 + $0x4c0] sm:$0xff]  ;;  %v1546_v17 = vld [vmem:[#allocation2 + $0x4c8] sm:$0xff] }
 0x83c   :  { %1716 = vmatpush.msrb.mxu3 %v1496_v60  ;;  %v1565_v60 = vld [vmem:[#allocation2 + $0x560] sm:$0xff] }
 0x8ac   :  { %v1373_v21 = vpop.f32.mrf.mxu1 }
 0x8ad   :  { %v1374_v35 = vadd.f32 %v2980_v19, %v1373_v21  ;;  %v1560_v21 = vld [vmem:[#allocation2 + $0x538] sm:$0xff] }
 0x8ae   :  { %1805 = vmatpush.msra.mxu3 %v1560_v21  ;;  %v1548_v21 = vld [vmem:[#allocation2 + $0x4d8] sm:$0xff] }
 0x8af   :  { %v1379_v29 = vmul.f32 %v1374_v35, %v1374_v35 }
 0x8b1   :  { %v1381_v58 = vmul.f32 %v1379_v29, %v1374_v35  ;;  %v1538_v29 = vld [vmem:[#allocation2 + $0x488] sm:$0xff] }
 0x8b2   :  { %1760 = vmatpush.msrb.mxu1 %v1538_v29  ;;  %v1526_v29 = vld [vmem:[#allocation2 + $0x428] sm:$0xff] }
 0x8b3   :  { %v1383_v30 = vmul.f32 0.044715, %v1381_v58 }
 0x8b4   :  { %v1376_v34 = vpop.f32.mrf.mxu1 }
 0x8b5   :  { %v1385_v20 = vadd.f32 %v1383_v30, %v1374_v35  ;;  %v1377_v24 = vadd.f32 %v2980_v19, %v1376_v34  ;;  %v1559_v19 = vld [vmem:[#allocation2 + $0x530] sm:$0xff]  ;;  %v1540_v34 = vld [vmem:[#allocation2 + $0x498] sm:$0xff] }
 0x8b6   :  { %v1539_v30 = vld [vmem:[#allocation2 + $0x490] sm:$0xff]  ;;  %1806 = vmatpush.msra.mxu3 %v1540_v34  ;;  %v1505_v34 = vld [vmem:[#allocation2 + $0x380] sm:$0xff] }
 0x8b7   :  { %v1387_v18 = vmul.f32 0.7978846, %v1385_v20  ;;  %v1380_v37 = vmul.f32 %v1377_v24, %v1377_v24  ;;  %v1517_v20 = vld [vmem:[#allocation2 + $0x3e0] sm:$0xff] }
 0x8b9   :  { %3034 = vtanh.f32 %v1387_v18  ;;  %v1382_v33 = vmul.f32 %v1380_v37, %v1377_v24  ;;  %v1518_v18 = vld [vmem:[#allocation2 + $0x3e8] sm:$0xff]  ;;  %v1519_v37 = vld [vmem:[#allocation2 + $0x3f0] sm:$0xff] }
 0x8ba   :  { %1761 = vmatpush.msrb.mxu1 %v1518_v18  ;;  %v1508_v18 = vld [vmem:[#allocation2 + $0x398] sm:$0xff] }
 0x8bb   :  { %v1384_v15 = vmul.f32 0.044715, %v1382_v33  ;;  %v1520_v33 = vld [vmem:[#allocation2 + $0x3f8] sm:$0xff] }
 0x8bc   :  { %1807 = vmatpush.msra.mxu3 %v1520_v33  ;;  %v1570_v33 = vld [vmem:[#allocation2 + $0x588] sm:$0xff] }
 0x8bd   :  { %v1386_v39 = vadd.f32 %v1384_v15, %v1377_v24  ;;  %v1497_v15 = vld [vmem:[#allocation2 + $0x340] sm:$0xff] }
 0x8bf   :  { %v3035_v28 = vpop.eup %3034  ;;  %v1388_v40 = vmul.f32 0.7978846, %v1386_v39  ;;  %v1498_v39 = vld [vmem:[#allocation2 + $0x348] sm:$0xff] }
 0x8c0   :  { %v1391_v41 = vadd.f32 1.0, %v3035_v28  ;;  %1762 = vmatpush.msrb.mxu1 %v1498_v39  ;;  %v1572_v39 = vld [vmem:[#allocation2 + $0x598] sm:$0xff] }
 0x8c1   :  { %3036 = vtanh.f32 %v1388_v40 }
 0x8c2   :  { %v1393_v42 = vmul.f32 0.5, %v1391_v41  ;;  %v1499_v41 = vld [vmem:[#allocation2 + $0x350] sm:$0xff] }
 0x8c4   :  { %v1395_v43 = vmul.f32 %v1393_v42, %v1374_v35  ;;  %v1537_v35 = vld [vmem:[#allocation2 + $0x480] sm:$0xff]  ;;  %v1500_v42 = vld [vmem:[#allocation2 + $0x358] sm:$0xff] }
 0x8c5   :  { %1737 = vmatpush.msra.mxu0 %v1537_v35  ;;  %1808 = vmatpush.msra.mxu3 %v1500_v42  ;;  %v1525_v35 = vld [vmem:[#allocation2 + $0x420] sm:$0xff]  ;;  %v1552_v42 = vld [vmem:[#allocation2 + $0x4f8] sm:$0xff] }
 0x8c6   :  { %2900 = vmatmul.msk.f32.vlgmr.msra.gmra.mxu2 %vm1407_vm2, %v1395_v43 }
 0x8c7   :  { %v3037_v16 = vpop.eup %3036  ;;  %1782 = vmatpush.msra.mxu2 %v1559_v19  ;;  %1738 = vmatpush.msra.mxu0 %v1517_v20  ;;  %v1547_v19 = vld [vmem:[#allocation2 + $0x4d0] sm:$0xff]  ;;  %v1506_v20 = vld [vmem:[#allocation2 + $0x388] sm:$0xff] }
 0x8c8   :  { %v1392_v44 = vadd.f32 1.0, %v3037_v16 }
 0x8c9   :  { %1783 = vmatpush.msra.mxu2 %v1539_v30  ;;  %1739 = vmatpush.msra.mxu0 %v1497_v15  ;;  %v1528_v30 = vld [vmem:[#allocation2 + $0x438] sm:$0xff]  ;;  %v1571_v15 = vld [vmem:[#allocation2 + $0x590] sm:$0xff] }
 0x8ca   :  { %v1394_v45 = vmul.f32 0.5, %v1392_v44 }
 0x8cb   :  { %1784 = vmatpush.msra.mxu2 %v1519_v37  ;;  %v1569_v37 = vld [vmem:[#allocation2 + $0x580] sm:$0xff] }
 0x8cc   :  { %v1396_v46 = vmul.f32 %v1394_v45, %v1377_v24 }
 0x8cd   :  { %1785 = vmatpush.msra.mxu2 %v1499_v41  ;;  %v1551_v41 = vld [vmem:[#allocation2 + $0x4f0] sm:$0xff] }
 0x8ce   :  { %2901 = vmatmul.msk.f32.gmra.mxu2 %vm1407_vm2, %v1396_v46 }
 0x949   :  { %v1431_v47 = vpop.f32.mrf.mxu2 }
 0x94a   :  { %v1432_v51 = vadd.f32 %v2981_v36, %v1431_v47 }
 0x94c   :  { %v3523_v61 = vadd.f32 %v1432_v51, %v3501_v31  ;;  %v2982_v51 = vld [vmem:[#allocation4 + $0x4c8] ss:$0 sm:$0xff] }
 0x94e   :  { %v1442_v4 = vsel %vm124_vm3, %v3523_v61, 0.0 }
 0x94f   :  { %1443 = vadd.xlane.f32.xlu1 %v1442_v4 }
 0x951   :  { %v1434_v52 = vpop.f32.mrf.mxu2 }
 0x952   :  { %v1435_v54 = vadd.f32 %v2981_v36, %v1434_v52 }
 0x954   :  { %v3528_v23 = vadd.f32 %v1435_v54, %v3506_v27  ;;  %v2983_v54 = vld [vmem:[#allocation4 + $0x4c9] ss:$0 sm:$0xff] }
 0x956   :  { %v1445_v48 = vsel %vm124_vm3, %v3528_v23, 0.0 }
 0x957   :  { %1446 = vadd.xlane.f32.xlu2 %v1445_v48 }
 0x9c2   :  { %v1444_v53 = vpop.xlane.xlu1 %1443 }
 0x9c3   :  { %v1448_v55 = vmul.f32 %v1444_v53, %v3229_v25 }
 0x9c5   :  { %v3534_v56 = vsub.f32 %v3523_v61, %v1448_v55 }
 0x9c7   :  { %v1452_v31 = vmul.f32 %v3534_v56, %v3534_v56 }
 0x9c9   :  { %v1454_v57 = vsel %vm124_vm3, %v1452_v31, 0.0 }
 0x9ca   :  { %v1447_v2 = vpop.xlane.xlu2 %1446  ;;  %1455 = vadd.xlane.f32.xlu0 %v1454_v57 }
 0x9cb   :  { %v1449_v27 = vmul.f32 %v1447_v2, %v3229_v25 }
 0x9cd   :  { %v3541_v22 = vsub.f32 %v3528_v23, %v1449_v27  ;;  %v1561_v27 = vld [vmem:[#allocation2 + $0x540] sm:$0xff] }
 0x9cf   :  { %v1453_v59 = vmul.f32 %v3541_v22, %v3541_v22 }
 0x9d1   :  { %v1457_v63 = vsel %vm124_vm3, %v1453_v59, 0.0  ;;  %v1562_v59 = vld [vmem:[#allocation2 + $0x548] sm:$0xff] }
 0x9d2   :  { %1458 = vadd.xlane.f32.xlu1 %v1457_v63  ;;  %v1563_v63 = vld [vmem:[#allocation2 + $0x550] sm:$0xff] }
 0xa3d   :  { %v1456_v14 = vpop.xlane.xlu0 %1455 }
 0xa3e   :  { %v1460_v50 = vmul.f32 %v1456_v14, %v3229_v25  ;;  %v1566_v14 = vld [vmem:[#allocation2 + $0x568] sm:$0xff] }
 0xa40   :  { %v1462_v1 = vadd.f32 1e-05, %v1460_v50  ;;  %v1567_v50 = vld [vmem:[#allocation2 + $0x570] sm:$0xff] }
 0xa42   :  { %3038 = vrsqrt.f32 %v1462_v1  ;;  %vm1470_vm5 = vweird.f32 %v1462_v1 }
 0xa45   :  { %v1459_v58 = vpop.xlane.xlu1 %1458 }
 0xa46   :  { %v1461_v24 = vmul.f32 %v1459_v58, %v3229_v25  ;;  %v1527_v58 = vld [vmem:[#allocation2 + $0x430] sm:$0xff] }
 0xa48   :  { %v3039_v28 = vpop.eup %3038  ;;  %v1463_v40 = vadd.f32 1e-05, %v1461_v24  ;;  %v1507_v24 = vld [vmem:[#allocation2 + $0x390] sm:$0xff] }
 0xa49   :  { %v1465_v43 = vmul.f32 %v3039_v28, %v1462_v1  ;;  %vm1471_vm4 = vweird.f32 %v3039_v28  ;;  %v1568_v1 = vld [vmem:[#allocation2 + $0x578] sm:$0xff] }
 0xa4a   :  { %3040 = vrsqrt.f32 %v1463_v40  ;;  %vm1472_vm6 = vmor %vm1470_vm5, %vm1471_vm4  ;;  %vm1480_vm8 = vweird.f32 %v1463_v40 }
 0xa4b   :  { %v1466_v16 = vmul.f32 %v3039_v28, %v1465_v43  ;;  %v1529_v43 = vld [vmem:[#allocation2 + $0x440] sm:$0xff] }
 0xa4d   :  { %v1467_v44 = vmul.f32 0.5, %v1466_v16  ;;  %v1530_v16 = vld [vmem:[#allocation2 + $0x448] sm:$0xff] }
 0xa4f   :  { %v1468_v45 = vsub.f32 1.5, %v1467_v44  ;;  %v1531_v44 = vld [vmem:[#allocation2 + $0x450] sm:$0xff] }
 0xa50   :  { %v3041_v46 = vpop.eup %3040 }
 0xa51   :  { %v1469_v36 = vmul.f32 %v3039_v28, %v1468_v45  ;;  %v1475_v47 = vmul.f32 %v3041_v46, %v1463_v40  ;;  %vm1481_vm7 = vweird.f32 %v3041_v46  ;;  %v1550_v40 = vld [vmem:[#allocation2 + $0x4e8] sm:$0xff]  ;;  %v1532_v45 = vld [vmem:[#allocation2 + $0x458] sm:$0xff] }
 0xa52   :  { %vm1482_vm9 = vmor %vm1480_vm8, %vm1481_vm7 }
 0xa53   :  { %v1473_v4 = vsel %vm1472_vm6, %v3039_v28, %v1469_v36  ;;  %v1476_v52 = vmul.f32 %v3041_v46, %v1475_v47  ;;  %v1549_v28 = vld [vmem:[#allocation2 + $0x4e0] sm:$0xff]  ;;  %v1510_v36 = vld [vmem:[#allocation2 + $0x3a8] sm:$0xff]  ;;  %v1511_v47 = vld [vmem:[#allocation2 + $0x3b0] sm:$0xff] }
 0xa54   :  { %v1484_v48 = vmul.f32 %v1473_v4, %v3534_v56 }
 0xa55   :  { %v1477_v53 = vmul.f32 0.5, %v1476_v52 }
 0xa56   :  { %v1487_v55 = vmul.f32 %v2982_v51, %v1484_v48 }
 0xa57   :  { %v1478_v31 = vsub.f32 1.5, %v1477_v53 }
 0xa58   :  { %v3549_v57 = vadd.f32 %v2983_v54, %v1487_v55 }
 0xa59   :  { %v1479_v2 = vmul.f32 %v3041_v46, %v1478_v31 }
 0xa5a   :  { %2902 = vmatmul.msk.f32.vlgmr.msrb.gmra.mxu0 %vm124_vm3, %v3549_v57  ;;  %2904 = vmatmul.msk.f32.vlgmr.msra.gmra.mxu1 %vm124_vm3, %v3549_v57 }
 0xa5b   :  { %v1483_v56 = vsel %vm1482_vm9, %v3041_v46, %v1479_v2  ;;  %2906 = vmatmul.msk.f32.vlgmr.msrb.gmra.mxu2 %vm124_vm3, %v3549_v57  ;;  %2908 = vmatmul.msk.f32.vlgmr.msrb.gmra.mxu3 %vm124_vm3, %v3549_v57  ;;  %v1509_v46 = vld [vmem:[#allocation2 + $0x3a0] sm:$0xff] }
 0xa5c   :  { %v1485_v49 = vmul.f32 %v1483_v56, %v3541_v22  ;;  %1828 = vmatpush.msrb.mxu0 %v1561_v27  ;;  %1851 = vmatpush.msra.mxu1 %v1562_v59  ;;  %v1501_v22 = vld [vmem:[#allocation2 + $0x360] sm:$0xff] }
 0xa5d   :  { %1874 = vmatpush.msrb.mxu2 %v1563_v63  ;;  %1897 = vmatpush.msrb.mxu3 %v1564_v9 }
 0xa5e   :  { %v1488_v6 = vmul.f32 %v2982_v51, %v1485_v49  ;;  %1829 = vmatpush.msrb.mxu0 %v1541_v8  ;;  %1852 = vmatpush.msra.mxu1 %v1542_v38  ;;  %v1512_v51 = vld [vmem:[#allocation2 + $0x3b8] sm:$0xff] }
 0xa5f   :  { %1875 = vmatpush.msrb.mxu2 %v1543_v0  ;;  %1898 = vmatpush.msrb.mxu3 %v1544_v3  ;;  %v1578_v49 = vld [vmem:[#allocation2 + $0x5e0] ss:$8 sm:$0xf] }
 0xa60   :  { %v3560_v12 = vadd.f32 %v2983_v54, %v1488_v6  ;;  %1830 = vmatpush.msrb.mxu0 %v1521_v26  ;;  %1853 = vmatpush.msra.mxu1 %v1522_v5  ;;  %v1579_v0 = vld [vmem:[#allocation2 + $0x5e0] ss:$8 sm:$0xf0] }
 0xa61   :  { %1876 = vmatpush.msrb.mxu2 %v1523_v7  ;;  %1899 = vmatpush.msrb.mxu3 %v1524_v11  ;;  %v3662_v5 = vor.u32 %v1579_v0, %v1578_v49  ;;  %v1582_v0 = vld [vmem:[#allocation2 + $0x620] ss:$8 sm:$0xf] }
 0xa62   :  { %2903 = vmatmul.msk.f32.gmra.mxu0 %vm124_vm3, %v3560_v12  ;;  %2905 = vmatmul.msk.f32.gmra.mxu1 %vm124_vm3, %v3560_v12 }
 0xa63   :  { %2907 = vmatmul.msk.f32.gmra.mxu2 %vm124_vm3, %v3560_v12  ;;  %2909 = vmatmul.msk.f32.gmra.mxu3 %vm124_vm3, %v3560_v12  ;;  %v1594_v6 = vperm.slane %v3662_v5, 0  ;;  %v1595_v7 = vperm.slane %v3662_v5, 1 }
 0xa64   :  { %1831 = vmatpush.msrb.mxu0 %v1501_v22  ;;  %1854 = vmatpush.msra.mxu1 %v1502_v62 }
 0xa65   :  { %1877 = vmatpush.msrb.mxu2 %v1503_v13  ;;  %1900 = vmatpush.msrb.mxu3 %v1504_v32 }
 0xa6a   :  { %2910 = vmatmul.msk.f32.vlgmr.msra.gmra.mxu0 %vm124_vm3, %v3549_v57  ;;  %2912 = vmatmul.msk.f32.vlgmr.msrb.gmra.mxu1 %vm124_vm3, %v3549_v57 }
 0xa6b   :  { %2914 = vmatmul.msk.f32.vlgmr.msra.gmra.mxu2 %vm124_vm3, %v3549_v57  ;;  %2916 = vmatmul.msk.f32.vlgmr.msra.gmra.mxu3 %vm124_vm3, %v3549_v57 }
 0xa6c   :  { %1920 = vmatpush.msra.mxu0 %v1565_v60  ;;  %1943 = vmatpush.msrb.mxu1 %v1566_v14 }
 0xa6d   :  { %1966 = vmatpush.msra.mxu2 %v1567_v50  ;;  %1989 = vmatpush.msra.mxu3 %v1568_v1  ;;  %v1574_v50 = vld [vmem:[#allocation2 + $0x5a0] ss:$8 sm:$0xf] }
 0xa6e   :  { %1921 = vmatpush.msra.mxu0 %v1545_v10  ;;  %1944 = vmatpush.msrb.mxu1 %v1546_v17  ;;  %v1575_v1 = vld [vmem:[#allocation2 + $0x5a0] ss:$8 sm:$0xf0]  ;;  %v1596_v10 = vperm.slane %v3662_v5, 2 }
 0xa6f   :  { %1967 = vmatpush.msra.mxu2 %v1547_v19  ;;  %1990 = vmatpush.msra.mxu3 %v1548_v21  ;;  %v3671_v21 = vor.u32 %v1575_v1, %v1574_v50 }
 0xa70   :  { %1922 = vmatpush.msra.mxu0 %v1525_v35  ;;  %1945 = vmatpush.msrb.mxu1 %v1526_v29 }
 0xa71   :  { %1968 = vmatpush.msra.mxu2 %v1527_v58  ;;  %1991 = vmatpush.msra.mxu3 %v1528_v30  ;;  %v1589_v30 = vperm.slane %v3671_v21, 3 }
 0xa72   :  { %2911 = vmatmul.msk.f32.gmra.mxu0 %vm124_vm3, %v3560_v12  ;;  %2913 = vmatmul.msk.f32.gmra.mxu1 %vm124_vm3, %v3560_v12 }
 0xa73   :  { %2915 = vmatmul.msk.f32.gmra.mxu2 %vm124_vm3, %v3560_v12  ;;  %2917 = vmatmul.msk.f32.gmra.mxu3 %vm124_vm3, %v3560_v12 }
 0xa74   :  { %1923 = vmatpush.msra.mxu0 %v1505_v34  ;;  %1946 = vmatpush.msrb.mxu1 %v1506_v20  ;;  %v1601_v20 = vperm.slane %v3662_v5, 7 }
 0xa75   :  { %1969 = vmatpush.msra.mxu2 %v1507_v24  ;;  %1992 = vmatpush.msra.mxu3 %v1508_v18 }
 0xa7a   :  { %2918 = vmatmul.msk.f32.vlgmr.msrb.gmra.mxu0 %vm124_vm3, %v3549_v57  ;;  %2920 = vmatmul.msk.f32.vlgmr.msra.gmra.mxu1 %vm124_vm3, %v3549_v57 }
 0xa7b   :  { %2922 = vmatmul.msk.f32.vlgmr.msrb.gmra.mxu2 %vm124_vm3, %v3549_v57  ;;  %2924 = vmatmul.msk.f32.vlgmr.msrb.gmra.mxu3 %vm124_vm3, %v3549_v57 }
 0xa7c   :  { %2012 = vmatpush.msrb.mxu0 %v1569_v37  ;;  %2035 = vmatpush.msra.mxu1 %v1570_v33 }
 0xa7d   :  { %2058 = vmatpush.msrb.mxu2 %v1571_v15  ;;  %2081 = vmatpush.msrb.mxu3 %v1572_v39 }
 0xa7e   :  { %2013 = vmatpush.msrb.mxu0 %v1549_v28  ;;  %2036 = vmatpush.msra.mxu1 %v1550_v40  ;;  %v3681_v28 = vld [vmem:[#allocation6 + $0x28] sm:$0xff] }
 0xa7f   :  { %2059 = vmatpush.msrb.mxu2 %v1551_v41  ;;  %2082 = vmatpush.msrb.mxu3 %v1552_v42  ;;  %v3684_v41 = vld [vmem:[#allocation6 + $0x30] sm:$0xff] }
 0xa80   :  { %2014 = vmatpush.msrb.mxu0 %v1529_v43  ;;  %2037 = vmatpush.msra.mxu1 %v1530_v16 }
 0xa81   :  { %2060 = vmatpush.msrb.mxu2 %v1531_v44  ;;  %2083 = vmatpush.msrb.mxu3 %v1532_v45 }
 0xa82   :  { %2919 = vmatmul.msk.f32.gmra.mxu0 %vm124_vm3, %v3560_v12  ;;  %2921 = vmatmul.msk.f32.gmra.mxu1 %vm124_vm3, %v3560_v12 }
 0xa83   :  { %2923 = vmatmul.msk.f32.gmra.mxu2 %vm124_vm3, %v3560_v12  ;;  %2925 = vmatmul.msk.f32.gmra.mxu3 %vm124_vm3, %v3560_v12 }
 0xa84   :  { %2015 = vmatpush.msrb.mxu0 %v1509_v46  ;;  %2038 = vmatpush.msra.mxu1 %v1510_v36 }
 0xa85   :  { %2061 = vmatpush.msrb.mxu2 %v1511_v47  ;;  %2084 = vmatpush.msrb.mxu3 %v1512_v51 }
 0xa8a   :  { %2926 = vmatmul.msk.f32.vlgmr.msra.gmra.mxu0 %vm124_vm3, %v3549_v57  ;;  %2928 = vmatmul.msk.f32.vlgmr.msrb.gmra.mxu1 %vm124_vm3, %v3549_v57 }
 0xa8b   :  { %2930 = vmatmul.msk.f32.vlgmr.msra.gmra.mxu2 %vm124_vm3, %v3549_v57  ;;  %2932 = vmatmul.msk.f32.vlgmr.msra.gmra.mxu3 %vm124_vm3, %v3549_v57 }
 0xa92   :  { %2927 = vmatmul.msk.f32.gmra.mxu0 %vm124_vm3, %v3560_v12  ;;  %2929 = vmatmul.msk.f32.gmra.mxu1 %vm124_vm3, %v3560_v12 }
 0xa93   :  { %2931 = vmatmul.msk.f32.gmra.mxu2 %vm124_vm3, %v3560_v12  ;;  %2933 = vmatmul.msk.f32.gmra.mxu3 %vm124_vm3, %v3560_v12 }
 0xa9a   :  { %2934 = vmatmul.msk.f32.vlgmr.msrb.gmra.mxu0 %vm124_vm3, %v3549_v57  ;;  %2936 = vmatmul.msk.f32.vlgmr.msra.gmra.mxu1 %vm124_vm3, %v3549_v57 }
 0xa9b   :  { %2938 = vmatmul.msk.f32.vlgmr.msrb.gmra.mxu2 %vm124_vm3, %v3549_v57  ;;  %2940 = vmatmul.msk.f32.vlgmr.msrb.gmra.mxu3 %vm124_vm3, %v3549_v57 }
 0xaa2   :  { %2935 = vmatmul.msk.f32.gmra.mxu0 %vm124_vm3, %v3560_v12  ;;  %2937 = vmatmul.msk.f32.gmra.mxu1 %vm124_vm3, %v3560_v12 }
 0xaa3   :  { %2939 = vmatmul.msk.f32.gmra.mxu2 %vm124_vm3, %v3560_v12  ;;  %2941 = vmatmul.msk.f32.gmra.mxu3 %vm124_vm3, %v3560_v12 }
 0xad7   :  { %v3634_v4 = vpop.f32.mrf.mxu0  ;;  %v3636_v52 = vpop.f32.mrf.mxu1 }
 0xade   :  { %v3638_v54 = vpop.f32.mrf.mxu2  ;;  %v1718_v48 = vpop.f32.mrf.mxu3 }
 0xadf   :  { %v3640_v53 = vpop.f32.mrf.mxu0  ;;  %v3642_v55 = vpop.f32.mrf.mxu1  ;;  %v1719_v24 = vadd.f32 %v1718_v48, %v1589_v30  ;;  %v1593_v48 = vperm.slane %v3671_v21, 7 }
 0xae1   :  { %v2469_v40 = vmul.f32 %v3681_v28, %v1719_v24 }
 0xae6   :  { %v3644_v31 = vpop.f32.mrf.mxu2  ;;  %v1721_v57 = vpop.f32.mrf.mxu3 }
 0xae7   :  { %v3646_v2 = vpop.f32.mrf.mxu0  ;;  %v3648_v27 = vpop.f32.mrf.mxu1  ;;  %v1722_v16 = vadd.f32 %v1721_v57, %v1589_v30  ;;  %v1591_v57 = vperm.slane %v3671_v21, 5 }
 0xae9   :  { %v2470_v51 = vmul.f32 %v3681_v28, %v1722_v16 }
 0xaee   :  { %v3650_v59 = vpop.f32.mrf.mxu2  ;;  %v3652_v63 = vpop.f32.mrf.mxu3 }
 0xaef   :  { %v3654_v9 = vpop.f32.mrf.mxu0  ;;  %v3656_v56 = vpop.f32.mrf.mxu1 }
 0xaf6   :  { %v3658_v8 = vpop.f32.mrf.mxu2  ;;  %v3660_v38 = vpop.f32.mrf.mxu3 }
 0xaf7   :  { %v1833_v3 = vpop.f32.mrf.mxu0  ;;  %v1856_v26 = vpop.f32.mrf.mxu1 }
 0xaf8   :  { %v1834_v60 = vadd.f32 %v1833_v3, %v1594_v6  ;;  %v1857_v14 = vadd.f32 %v1856_v26, %v1595_v7  ;;  %v1590_v3 = vperm.slane %v3671_v21, 4  ;;  %v1605_v26 = vperm.slane %v1582_v0, 3 }
 0xafe   :  { %v1879_v11 = vpop.f32.mrf.mxu2  ;;  %v3666_v12 = vpop.f32.mrf.mxu3 }
 0xaff   :  { %v1836_v22 = vpop.f32.mrf.mxu0  ;;  %v1859_v62 = vpop.f32.mrf.mxu1  ;;  %v1880_v34 = vadd.f32 %v1879_v11, %v1596_v10  ;;  %v1603_v11 = vperm.slane %v1582_v0, 1 }
 0xb00   :  { %v1837_v13 = vadd.f32 %v1836_v22, %v1594_v6  ;;  %v1860_v32 = vadd.f32 %v1859_v62, %v1595_v7  ;;  %v1602_v7 = vperm.slane %v1582_v0, 0  ;;  %v1811_v22 = vadd.f32 %v3652_v63, %v1593_v48 }
 0xb01   :  { %v1745_v62 = vadd.f32 %v3654_v9, %v1590_v3 }
 0xb02   :  { %2169 = vmatpush.msrb.mxu1 %v1837_v13  ;;  %2271 = vmatpush.msra.mxu3 %v1860_v32  ;;  %v1586_v13 = vperm.slane %v3671_v21, 0  ;;  %v1587_v32 = vperm.slane %v3671_v21, 1 }
 0xb04   :  { %2170 = vmatpush.msrb.mxu1 %v1834_v60  ;;  %2272 = vmatpush.msra.mxu3 %v1857_v14  ;;  %v1768_v60 = vadd.f32 %v3656_v56, %v1591_v57  ;;  %v1598_v14 = vperm.slane %v3662_v5, 4  ;;  %v2475_v56 = vmul.f32 %v3681_v28, %v1811_v22  ;;  %v1814_v22 = vadd.f32 %v3660_v38, %v1593_v48 }
 0xb06   :  { %v1882_v17 = vpop.f32.mrf.mxu2  ;;  %v3669_v19 = vpop.f32.mrf.mxu3 }
 0xb07   :  { %v1883_v35 = vadd.f32 %v1882_v17, %v1596_v10  ;;  %v1925_v29 = vpop.f32.mrf.mxu0  ;;  %v1948_v58 = vpop.f32.mrf.mxu1  ;;  %v1742_v10 = vadd.f32 %v3646_v2, %v1590_v3  ;;  %v1592_v17 = vperm.slane %v3671_v21, 6  ;;  %v2201_v2 = vmul.f32 %v3681_v28, %v1768_v60 }
 0xb08   :  { %v1926_v16 = vadd.f32 %v1925_v29, %v1598_v14  ;;  %v1673_v29 = vadd.f32 %v3636_v52, %v1587_v32 }
 0xb09   :  { %2419 = vmatpush.msrb.mxu3 %v1883_v35  ;;  %v1599_v35 = vperm.slane %v3662_v5, 5  ;;  %v1788_v52 = vadd.f32 %v3650_v59, %v1592_v17 }
 0xb0b   :  { %2420 = vmatpush.msrb.mxu3 %v1880_v34 }
 0xb0e   :  { %v3675_v18 = vpop.f32.mrf.mxu2  ;;  %v1994_v37 = vpop.f32.mrf.mxu3 }
 0xb0f   :  { %v1995_v33 = vadd.f32 %v1994_v37, %v1601_v20  ;;  %v3677_v15 = vpop.f32.mrf.mxu0  ;;  %v3679_v39 = vpop.f32.mrf.mxu1 }
 0xb10   :  { %v1929_v59 = vadd.f32 %v3677_v15, %v1598_v14  ;;  %v1676_v15 = vadd.f32 %v3642_v55, %v1587_v32  ;;  %v2290_v32 = vld [vmem:[#allocation4 + $0x338] sm:$0xff] }
 0xb11   :  { %v2471_v42 = vmul.f32 %v3684_v41, %v1995_v33  ;;  %v1765_v33 = vadd.f32 %v3648_v27, %v1591_v57 }
 0xb12   :  { %v2095_v14 = vmul.f32 %v3684_v41, %v1929_v59 }
 0xb13   :  { %v3687_v43 = vadd.f32 %v2471_v42, %v2469_v40  ;;  %v2099_v40 = vmul.f32 %v3681_v28, %v1745_v62 }
 0xb16   :  { %v3689_v44 = vpop.f32.mrf.mxu2  ;;  %v1997_v45 = vpop.f32.mrf.mxu3 }
 0xb17   :  { %v1998_v46 = vadd.f32 %v1997_v45, %v1601_v20  ;;  %v2017_v36 = vpop.f32.mrf.mxu0  ;;  %v2040_v47 = vpop.f32.mrf.mxu1 }
 0xb18   :  { %v2018_v9 = vadd.f32 %v2017_v36, %v1602_v7  ;;  %v2041_v20 = vadd.f32 %v2040_v47, %v1603_v11  ;;  %v1650_v36 = vadd.f32 %v3634_v4, %v1586_v13  ;;  %v1949_v47 = vadd.f32 %v1948_v58, %v1599_v35 }
 0xb19   :  { %v2472_v49 = vmul.f32 %v3684_v41, %v1998_v46  ;;  %v2098_v4 = vmul.f32 %v3681_v28, %v1742_v10  ;;  %v2200_v58 = vmul.f32 %v3681_v28, %v1765_v33  ;;  %v2295_v10 = vld [vmem:[#allocation4 + $0x360] sm:$0xff]  ;;  %v2194_v33 = vmul.f32 %v3681_v28, %v1673_v29 }
 0xb1a   :  { %v2202_v3 = vmul.f32 %v3684_v41, %v2041_v20  ;;  %v2476_v20 = vmul.f32 %v3681_v28, %v1814_v22 }
 0xb1b   :  { %v3695_v6 = vadd.f32 %v2472_v49, %v2470_v51  ;;  %v1604_v51 = vperm.slane %v1582_v0, 2  ;;  %v2100_v49 = vmul.f32 %v3684_v41, %v2018_v9  ;;  %v2094_v0 = vmul.f32 %v3684_v41, %v1926_v16 }
 0xb1c   :  { %v2204_v48 = vadd.f32 %v2202_v3, %v2200_v58  ;;  %v1653_v16 = vadd.f32 %v3640_v53, %v1586_v13  ;;  %v2291_v13 = vld [vmem:[#allocation4 + $0x340] sm:$0xff]  ;;  %v2286_v58 = vld [vmem:[#allocation4 + $0x318] sm:$0xff] }
 0xb1d   :  { %v2102_v38 = vadd.f32 %v2100_v49, %v2098_v4  ;;  %v2195_v49 = vmul.f32 %v3681_v28, %v1676_v15 }
 0xb1e   :  { %v2063_v50 = vpop.f32.mrf.mxu2  ;;  %v2086_v1 = vpop.f32.mrf.mxu3  ;;  %v2093_v53 = vmul.f32 %v3681_v28, %v1653_v16 }
 0xb1f   :  { %v2087_v30 = vadd.f32 %v2086_v1, %v1605_v26  ;;  %v2020_v63 = vpop.f32.mrf.mxu0  ;;  %v2043_v34 = vpop.f32.mrf.mxu1  ;;  %v2092_v1 = vmul.f32 %v3681_v28, %v1650_v36 }
 0xb20   :  { %v2021_v24 = vadd.f32 %v2020_v63, %v1602_v7  ;;  %v2044_v37 = vadd.f32 %v2043_v34, %v1603_v11  ;;  %v1791_v11 = vadd.f32 %v3658_v8, %v1592_v17  ;;  %v2196_v8 = vmul.f32 %v3684_v41, %v1949_v47  ;;  %v2292_v47 = vld [vmem:[#allocation4 + $0x348] sm:$0xff] }
 0xb21   :  { %v2477_v42 = vmul.f32 %v3684_v41, %v2087_v30  ;;  %v2064_v30 = vadd.f32 %v2063_v50, %v1604_v51  ;;  %v2096_v50 = vadd.f32 %v2094_v0, %v2092_v1  ;;  %v2097_v55 = vadd.f32 %v2095_v14, %v2093_v53 }
 0xb22   :  { %v2101_v45 = vmul.f32 %v3684_v41, %v2021_v24  ;;  %v2203_v46 = vmul.f32 %v3684_v41, %v2044_v37  ;;  %v2349_v9 = vmul.f32 %v3681_v28, %v1791_v11  ;;  %v2288_v11 = vld [vmem:[#allocation4 + $0x328] sm:$0xff] }
 0xb23   :  { %v3717_v27 = vadd.f32 %v2477_v42, %v2475_v56  ;;  %v2198_v42 = vadd.f32 %v2196_v8, %v2194_v33  ;;  %v2281_v8 = vld [vmem:[#allocation4 + $0x2f0] sm:$0xff] }
 0xb24   :  { %v2103_v57 = vadd.f32 %v2101_v45, %v2099_v40  ;;  %v2205_v7 = vadd.f32 %v2203_v46, %v2201_v2  ;;  %v2294_v40 = vld [vmem:[#allocation4 + $0x358] sm:$0xff]  ;;  %v1952_v2 = vadd.f32 %v3679_v39, %v1599_v35  ;;  %v2348_v45 = vmul.f32 %v3681_v28, %v1788_v52  ;;  %v2293_v46 = vld [vmem:[#allocation4 + $0x350] sm:$0xff] }
 0xb25   :  { %v1600_v39 = vperm.slane %v3662_v5, 6 }
 0xb26   :  { %v2066_v62 = vpop.f32.mrf.mxu2  ;;  %v2089_v60 = vpop.f32.mrf.mxu3  ;;  %2118 = vmatpush.xpose.msra.mxu0 %v2103_v57  ;;  %2220 = vmatpush.xpose.msra.mxu2 %v2205_v7  ;;  %v2197_v35 = vmul.f32 %v3684_v41, %v1952_v2  ;;  %v2289_v7 = vld [vmem:[#allocation4 + $0x330] sm:$0xff] }
 0xb27   :  { %v2067_v63 = vadd.f32 %v2066_v62, %v1604_v51  ;;  %v2090_v34 = vadd.f32 %v2089_v60, %v1605_v26  ;;  %v2350_v26 = vmul.f32 %v3684_v41, %v2064_v30  ;;  %v1588_v51 = vperm.slane %v3671_v21, 2  ;;  %v2287_v21 = vld [vmem:[#allocation4 + $0x320] sm:$0xff]  ;;  %v2285_v62 = vld [vmem:[#allocation4 + $0x310] sm:$0xff] }
 0xb28   :  { %v1972_v3 = vadd.f32 %v3675_v18, %v1600_v39  ;;  %v2199_v57 = vadd.f32 %v2197_v35, %v2195_v49  ;;  %v1975_v18 = vadd.f32 %v3689_v44, %v1600_v39  ;;  %v2283_v30 = vld [vmem:[#allocation4 + $0x300] sm:$0xff]  ;;  %v1597_v44 = vperm.slane %v3662_v5, 3 }
 0xb29   :  { %v2351_v24 = vmul.f32 %v3684_v41, %v2067_v63  ;;  %v2478_v37 = vmul.f32 %v3684_v41, %v2090_v34  ;;  %v2352_v36 = vadd.f32 %v2350_v26, %v2348_v45  ;;  %v1696_v29 = vadd.f32 %v3638_v54, %v1588_v51  ;;  %v2284_v54 = vld [vmem:[#allocation4 + $0x308] sm:$0xff]  ;;  %v2282_v34 = vld [vmem:[#allocation4 + $0x2f8] sm:$0xff] }
 0xb2a   :  { %2119 = vmatpush.xpose.msra.mxu0 %v2102_v38  ;;  %2221 = vmatpush.xpose.msra.mxu2 %v2204_v48  ;;  %v2344_v22 = vmul.f32 %v3684_v41, %v1972_v3  ;;  %v1699_v60 = vadd.f32 %v3644_v31, %v1588_v51  ;;  %v2345_v1 = vmul.f32 %v3684_v41, %v1975_v18  ;;  %v2280_v38 = vld [vmem:[#allocation4 + $0x2e8] sm:$0xff] }
 0xb2b   :  { %v2353_v17 = vadd.f32 %v2351_v24, %v2349_v9  ;;  %v3739_v56 = vadd.f32 %v2478_v37, %v2476_v20  ;;  %v2342_v4 = vmul.f32 %v3681_v28, %v1696_v29  ;;  %v1906_v31 = vadd.f32 %v3669_v19, %v1597_v44  ;;  %v3776_v19 = vld [vmem:[%s3857_s1 + $0x8] sm:$0xff] }
 0xb2c   :  { %v2343_v63 = vmul.f32 %v3681_v28, %v1699_v60  ;;  %v1903_v41 = vadd.f32 %v3666_v12, %v1597_v44  ;;  %v3769_v28 = vld [vmem:[%s3857_s1] sm:$0xff]  ;;  %v2440_v44 = vld [vmem:[#allocation4 + $0x3c8] sm:$0xff] }
 0xb2d   :  { %2120 = vmatmul.f32.vlgmr.msra.gmra.mxu0 %v2096_v50  ;;  %2222 = vmatmul.f32.vlgmr.msra.gmra.mxu2 %v2198_v42  ;;  %v2346_v0 = vadd.f32 %v2344_v22, %v2342_v4 }
 0xb2e   :  { %2296 = vmatpush.msrb.mxu0 %v2295_v10  ;;  %2368 = vmatpush.xpose.msrb.mxu2 %v2353_v17  ;;  %v2347_v52 = vadd.f32 %v2345_v1, %v2343_v63  ;;  %v2443_v63 = vld [vmem:[#allocation4 + $0x3e0] sm:$0xff] }
 0xb30   :  { %2297 = vmatpush.msrb.mxu0 %v2294_v40 }
 0xb32   :  { %2298 = vmatpush.msrb.mxu0 %v2293_v46  ;;  %2369 = vmatpush.xpose.msrb.mxu2 %v2352_v36 }
 0xb34   :  { %2299 = vmatpush.msrb.mxu0 %v2292_v47 }
 0xb35   :  { %2123 = vmatmul.f32.gmra.mxu0 %v2097_v55  ;;  %2225 = vmatmul.f32.gmra.mxu2 %v2199_v57 }
 0xb36   :  { %2300 = vmatpush.msrb.mxu0 %v2291_v13  ;;  %2444 = vmatpush.msra.mxu2 %v2443_v63 }
 0xb38   :  { %2301 = vmatpush.msrb.mxu0 %v2290_v32 }
 0xb3a   :  { %2302 = vmatpush.msrb.mxu0 %v2289_v7 }
 0xb3c   :  { %2303 = vmatpush.msrb.mxu0 %v2288_v11 }
 0xb3d   :  { %2370 = vmatmul.f32.vlgmr.msrb.gmra.mxu2 %v2346_v0 }
 0xb3e   :  { %2304 = vmatpush.msrb.mxu0 %v2287_v21 }
 0xb40   :  { %2305 = vmatpush.msrb.mxu0 %v2286_v58 }
 0xb42   :  { %2306 = vmatpush.msrb.mxu0 %v2285_v62 }
 0xb44   :  { %2307 = vmatpush.msrb.mxu0 %v2284_v54 }
 0xb45   :  { %2373 = vmatmul.f32.gmra.mxu2 %v2347_v52 }
 0xb46   :  { %2308 = vmatpush.msrb.mxu0 %v2283_v30 }
 0xb48   :  { %2309 = vmatpush.msrb.mxu0 %v2282_v34  ;;  %v2442_v34 = vld [vmem:[#allocation4 + $0x3d8] sm:$0xff] }
 0xb49   :  { %2445 = vmatpush.msra.mxu2 %v2442_v34 }
 0xb4a   :  { %2310 = vmatpush.msrb.mxu0 %v2281_v8  ;;  %v2441_v8 = vld [vmem:[#allocation4 + $0x3d0] sm:$0xff] }
 0xb4b   :  { %2446 = vmatpush.msra.mxu2 %v2441_v8 }
 0xb4c   :  { %2311 = vmatpush.msrb.mxu0 %v2280_v38 }
 0xb4d   :  { %2447 = vmatpush.msra.mxu2 %v2440_v44 }
 0xb4e   :  { %2546 = vmatpush.msra.mxu0 %v1906_v31 }
 0xb50   :  { %2547 = vmatpush.msra.mxu0 %v1903_v41  ;;  %v2438_v41 = vld [vmem:[#allocation4 + $0x3b8] sm:$0xff] }
 0xbaa   :  { %v2121_v39 = vpop.f32.mrf.mxu0 }
 0xbab   :  { %v2122_v13 = vadd.f32 %v3769_v28, %v2121_v39 }
 0xbad   :  { %v2127_v57 = vsel %vm816_vm11, %v2122_v13, -inf }
 0xbb0   :  { %v2223_v48 = vpop.f32.mrf.mxu2 }
 0xbb1   :  { %v2224_v10 = vadd.f32 %v3769_v28, %v2223_v48 }
 0xbb2   :  { %v2124_v7 = vpop.f32.mrf.mxu0 }
 0xbb3   :  { %v2229_v9 = vsel %vm816_vm11, %v2224_v10, -inf  ;;  %v3790_v29 = vadd.f32 %v3776_v19, %v2124_v7  ;;  %v2189_v7 = vld [vmem:[#allocation4 + $0x2c0] sm:$0xff] }
 0xbb4   :  { %2230 = vmax.xlane.f32.xlu2 %v2229_v9  ;;  %v2437_v9 = vld [vmem:[#allocation4 + $0x3b0] sm:$0xff] }
 0xbb5   :  { %v2130_v21 = vsel %vm816_vm11, %v3790_v29, -inf }
 0xbb8   :  { %v2226_v5 = vpop.f32.mrf.mxu2 }
 0xbb9   :  { %v2227_v12 = vadd.f32 %v3776_v19, %v2226_v5 }
 0xbbb   :  { %v2232_v20 = vsel %vm816_vm11, %v2227_v12, -inf }
 0xbbc   :  { %2233 = vmax.xlane.f32.xlu0 %v2232_v20  ;;  %v2436_v20 = vld [vmem:[#allocation4 + $0x3a8] sm:$0xff] }
 0xbc0   :  { %v2371_v24 = vpop.f32.mrf.mxu2 }
 0xbc1   :  { %v2372_v37 = vadd.f32 %v3769_v28, %v2371_v24  ;;  %v2435_v24 = vld [vmem:[#allocation4 + $0x3a0] sm:$0xff] }
 0xbc3   :  { %v2377_v33 = vsel %vm816_vm11, %v2372_v37, -inf }
 0xbc4   :  { %2378 = vmax.xlane.f32.xlu1 %v2377_v33  ;;  %v2433_v33 = vld [vmem:[#allocation4 + $0x390] sm:$0xff] }
 0xbc8   :  { %v2374_v50 = vpop.f32.mrf.mxu2 }
 0xbc9   :  { %v2375_v59 = vadd.f32 %v3776_v19, %v2374_v50  ;;  %v2432_v50 = vld [vmem:[#allocation4 + $0x388] sm:$0xff] }
 0xbcb   :  { %v2380_v26 = vsel %vm816_vm11, %v2375_v59, -inf }
 0xbcc   :  { %2381 = vmax.xlane.f32.xlu2 %v2380_v26  ;;  %v2430_v26 = vld [vmem:[#allocation4 + $0x378] sm:$0xff] }
 0xc27   :  { %v2231_v17 = vpop.xlane.xlu2 %2230 }
 0xc28   :  { %v2235_v40 = vsub.f32 %v2224_v10, %v2231_v17  ;;  %v2429_v17 = vld [vmem:[#allocation4 + $0x370] sm:$0xff] }
 0xc2a   :  { %v2237_v42 = vmul.f32 1.442695, %v2235_v40  ;;  %v2428_v40 = vld [vmem:[#allocation4 + $0x368] sm:$0xff] }
 0xc2c   :  { %3042 = vpow2.f32 %v2237_v42 }
 0xc2f   :  { %v2234_v2 = vpop.xlane.xlu0 %2233 }
 0xc30   :  { %v2236_v16 = vsub.f32 %v2227_v12, %v2234_v2 }
 0xc32   :  { %v3043_v45 = vpop.eup %3042  ;;  %v2239_v46 = vmul.f32 1.442695, %v2236_v16 }
 0xc33   :  { %v2241_v15 = vsel %vm816_vm11, %v3043_v45, 0.0 }
 0xc34   :  { %3044 = vpow2.f32 %v2239_v46  ;;  %2242 = vadd.xlane.f32.xlu0 %v2241_v15 }
 0xc37   :  { %v2379_v14 = vpop.xlane.xlu1 %2378 }
 0xc38   :  { %v2383_v36 = vsub.f32 %v2372_v37, %v2379_v14  ;;  %v2434_v37 = vld [vmem:[#allocation4 + $0x398] sm:$0xff] }
 0xc3a   :  { %v3045_v47 = vpop.eup %3044  ;;  %v2385_v35 = vmul.f32 1.442695, %v2383_v36 }
 0xc3b   :  { %v2244_v53 = vsel %vm816_vm11, %v3045_v47, 0.0 }
 0xc3c   :  { %3046 = vpow2.f32 %v2385_v35  ;;  %2245 = vadd.xlane.f32.xlu1 %v2244_v53 }
 0xc3f   :  { %v2382_v51 = vpop.xlane.xlu2 %2381 }
 0xc40   :  { %v2384_v49 = vsub.f32 %v2375_v59, %v2382_v51  ;;  %v2431_v59 = vld [vmem:[#allocation4 + $0x380] sm:$0xff] }
 0xc42   :  { %v3047_v55 = vpop.eup %3046  ;;  %v2387_v32 = vmul.f32 1.442695, %v2384_v49 }
 0xc43   :  { %v2389_v3 = vsel %vm816_vm11, %v3047_v55, 0.0 }
 0xc44   :  { %3048 = vpow2.f32 %v2387_v32  ;;  %2390 = vadd.xlane.f32.xlu2 %v2389_v3  ;;  %2128 = vmax.xlane.f32.xlu1 %v2127_v57  ;;  %v2193_v32 = vld [vmem:[#allocation4 + $0x2e0] sm:$0xff]  ;;  %v2192_v3 = vld [vmem:[#allocation4 + $0x2d8] sm:$0xff]  ;;  %v2191_v57 = vld [vmem:[#allocation4 + $0x2d0] sm:$0xff] }
 0xc45   :  { %2319 = vmatpush.msra.mxu1 %v2193_v32 }
 0xc47   :  { %2320 = vmatpush.msra.mxu1 %v2192_v3  ;;  %v2984_v3 = vld [vmem:[#allocation4 + $0x4cc] ss:$0 sm:$0xff] }
 0xc49   :  { %2321 = vmatpush.msra.mxu1 %v2191_v57 }
 0xc4a   :  { %v3049_v11 = vpop.eup %3048 }
 0xc4b   :  { %v2392_v22 = vsel %vm816_vm11, %v3049_v11, 0.0 }
 0xc4c   :  { %2393 = vadd.xlane.f32.xlu0 %v2392_v22  ;;  %2131 = vmax.xlane.f32.xlu2 %v2130_v21  ;;  %v2185_v22 = vld [vmem:[#allocation4 + $0x2a0] sm:$0xff]  ;;  %v2184_v21 = vld [vmem:[#allocation4 + $0x298] sm:$0xff] }
 0xca7   :  { %v2243_v4 = vpop.xlane.xlu0 %2242 }
 0xca8   :  { %3050 = vrcp.f32 %v2243_v4  ;;  %v2183_v4 = vld [vmem:[#allocation4 + $0x290] sm:$0xff] }
 0xcae   :  { %v3051_v58 = vpop.eup %3050 }
 0xcaf   :  { %v2249_v0 = vmul.f32 %v3051_v58, %v3043_v45  ;;  %v2246_v18 = vpop.xlane.xlu1 %2245  ;;  %v2182_v58 = vld [vmem:[#allocation4 + $0x288] sm:$0xff] }
 0xcb0   :  { %3052 = vrcp.f32 %v2246_v18  ;;  %v2180_v18 = vld [vmem:[#allocation4 + $0x278] sm:$0xff] }
 0xcb1   :  { %2944 = vmatmul.msk.f32.vlgmr.msra.gmra.mxu3 %vm816_vm11, %v2249_v0  ;;  %v2181_v0 = vld [vmem:[#allocation4 + $0x280] sm:$0xff] }
 0xcb2   :  { %2495 = vmatpush.xpose.msra.mxu3 %v3739_v56 }
 0xcb6   :  { %v3053_v62 = vpop.eup %3052  ;;  %2496 = vmatpush.xpose.msra.mxu3 %v3717_v27  ;;  %v2439_v27 = vld [vmem:[#allocation4 + $0x3c0] sm:$0xff] }
 0xcb7   :  { %v2391_v60 = vpop.xlane.xlu2 %2390  ;;  %v2129_v54 = vpop.xlane.xlu1 %2128  ;;  %v2250_v1 = vmul.f32 %v3053_v62, %v3045_v47  ;;  %2448 = vmatpush.msra.mxu2 %v2439_v27  ;;  %v2179_v62 = vld [vmem:[#allocation4 + $0x270] sm:$0xff] }
 0xcb8   :  { %3054 = vrcp.f32 %v2391_v60  ;;  %v2133_v30 = vsub.f32 %v2122_v13, %v2129_v54  ;;  %v2178_v60 = vld [vmem:[#allocation4 + $0x268] sm:$0xff] }
 0xcb9   :  { %2945 = vmatmul.msk.f32.gmra.mxu3 %vm816_vm11, %v2250_v1  ;;  %2449 = vmatpush.msra.mxu2 %v2438_v41 }
 0xcba   :  { %v2135_v52 = vmul.f32 1.442695, %v2133_v30 }
 0xcbb   :  { %2450 = vmatpush.msra.mxu2 %v2437_v9  ;;  %v2569_v9 = vld [vmem:[#allocation4 + $0x458] sm:$0xff] }
 0xcbc   :  { %3056 = vpow2.f32 %v2135_v52 }
 0xcbd   :  { %2451 = vmatpush.msra.mxu2 %v2436_v20  ;;  %v2566_v20 = vld [vmem:[#allocation4 + $0x440] sm:$0xff] }
 0xcbe   :  { %v3055_v38 = vpop.eup %3054 }
 0xcbf   :  { %v2397_v56 = vmul.f32 %v3055_v38, %v3047_v55  ;;  %v2394_v31 = vpop.xlane.xlu0 %2393  ;;  %2452 = vmatpush.msra.mxu2 %v2435_v24 }
 0xcc0   :  { %3058 = vrcp.f32 %v2394_v31 }
 0xcc1   :  { %2946 = vmatmul.msk.f32.vlgmr.msrb.gmra.mxu3 %vm816_vm11, %v2397_v56  ;;  %2453 = vmatpush.msra.mxu2 %v2434_v37  ;;  %v2565_v37 = vld [vmem:[#allocation4 + $0x438] sm:$0xff] }
 0xcc2   :  { %v3057_v48 = vpop.eup %3056 }
 0xcc3   :  { %v2139_v10 = vsel %vm816_vm11, %v3057_v48, 0.0  ;;  %2454 = vmatpush.msra.mxu2 %v2433_v33  ;;  %v2564_v33 = vld [vmem:[#allocation4 + $0x430] sm:$0xff] }
 0xcc4   :  { %2140 = vadd.xlane.f32.xlu2 %v2139_v10  ;;  %v2570_v10 = vld [vmem:[#allocation4 + $0x460] sm:$0xff] }
 0xcc5   :  { %2455 = vmatpush.msra.mxu2 %v2432_v50  ;;  %v2563_v50 = vld [vmem:[#allocation4 + $0x428] sm:$0xff] }
 0xcc6   :  { %v3059_v5 = vpop.eup %3058 }
 0xcc7   :  { %v2398_v12 = vmul.f32 %v3059_v5, %v3049_v11  ;;  %2456 = vmatpush.msra.mxu2 %v2431_v59  ;;  %v2187_v11 = vld [vmem:[#allocation4 + $0x2b0] sm:$0xff]  ;;  %v2562_v59 = vld [vmem:[#allocation4 + $0x420] sm:$0xff] }
 0xcc8   :  { %v2568_v5 = vld [vmem:[#allocation4 + $0x450] sm:$0xff] }
 0xcc9   :  { %2947 = vmatmul.msk.f32.gmra.mxu3 %vm816_vm11, %v2398_v12  ;;  %2457 = vmatpush.msra.mxu2 %v2430_v26  ;;  %v2567_v12 = vld [vmem:[#allocation4 + $0x448] sm:$0xff] }
 0xccb   :  { %2458 = vmatpush.msra.mxu2 %v2429_v17 }
 0xccd   :  { %2459 = vmatpush.msra.mxu2 %v2428_v40 }
 0xcd1   :  { %2497 = vmatmul.f32.vlgmr.msra.gmra.mxu3 %v3687_v43  ;;  %v2132_v43 = vpop.xlane.xlu2 %2131 }
 0xcd2   :  { %v2134_v14 = vsub.f32 %v3790_v29, %v2132_v43  ;;  %v2188_v29 = vld [vmem:[#allocation4 + $0x2b8] sm:$0xff] }
 0xcd3   :  { %v2561_v43 = vld [vmem:[#allocation4 + $0x418] sm:$0xff] }
 0xcd4   :  { %v2137_v36 = vmul.f32 1.442695, %v2134_v14  ;;  %v2556_v14 = vld [vmem:[#allocation4 + $0x3f0] sm:$0xff] }
 0xcd9   :  { %2500 = vmatmul.f32.gmra.mxu3 %v3695_v6 }
 0xd34   :  { %v2274_v6 = vpop.f32.mrf.mxu3 }
 0xd35   :  { %2312 = vmatmul.f32.vlgmr.msrb.gmra.mxu0 %v2274_v6  ;;  %v2560_v6 = vld [vmem:[#allocation4 + $0x410] sm:$0xff] }
 0xd37   :  { %v2141_v42 = vpop.xlane.xlu2 %2140 }
 0xd38   :  { %3060 = vrcp.f32 %v2141_v42  ;;  %v2559_v42 = vld [vmem:[#allocation4 + $0x408] sm:$0xff] }
 0xd39   :  { %3062 = vpow2.f32 %v2137_v36  ;;  %v2555_v36 = vld [vmem:[#allocation4 + $0x3e8] sm:$0xff] }
 0xd3c   :  { %v2277_v2 = vpop.f32.mrf.mxu3 }
 0xd3d   :  { %2315 = vmatmul.f32.gmra.mxu0 %v2277_v2  ;;  %v2558_v2 = vld [vmem:[#allocation4 + $0x400] sm:$0xff] }
 0xd3e   :  { %v3061_v16 = vpop.eup %3060 }
 0xd3f   :  { %v2147_v45 = vmul.f32 %v3061_v16, %v3057_v48  ;;  %v3063_v53 = vpop.eup %3062 }
 0xd40   :  { %v2142_v55 = vsel %vm816_vm11, %v3063_v53, 0.0 }
 0xd41   :  { %2942 = vmatmul.msk.f32.vlgmr.msrb.gmra.mxu1 %vm816_vm11, %v2147_v45 }
 0xd44   :  { %v2422_v46 = vpop.f32.mrf.mxu3 }
 0xd45   :  { %2460 = vmatmul.f32.vlgmr.msra.gmra.mxu2 %v2422_v46 }
 0xd4c   :  { %v2425_v15 = vpop.f32.mrf.mxu3 }
 0xd4d   :  { %2463 = vmatmul.f32.gmra.mxu2 %v2425_v15  ;;  %v2557_v15 = vld [vmem:[#allocation4 + $0x3f8] sm:$0xff] }
 0xd54   :  { %v2498_v47 = vpop.f32.mrf.mxu3 }
 0xd55   :  { %v2499_v39 = vadd.f32 %v3769_v28, %v2498_v47  ;;  %v2190_v28 = vld [vmem:[#allocation4 + $0x2c8] sm:$0xff] }
 0xd56   :  { %2322 = vmatpush.msra.mxu1 %v2190_v28 }
 0xd57   :  { %v2504_v35 = vsel %vm816_vm11, %v2499_v39, -inf }
 0xd58   :  { %2505 = vmax.xlane.f32.xlu0 %v2504_v35  ;;  %2323 = vmatpush.msra.mxu1 %v2189_v7 }
 0xd5a   :  { %2324 = vmatpush.msra.mxu1 %v2188_v29 }
 0xd5c   :  { %v2501_v13 = vpop.f32.mrf.mxu3  ;;  %2325 = vmatpush.msra.mxu1 %v2187_v11 }
 0xd5d   :  { %v2502_v51 = vadd.f32 %v3776_v19, %v2501_v13  ;;  %v2186_v19 = vld [vmem:[#allocation4 + $0x2a8] sm:$0xff] }
 0xd5e   :  { %2326 = vmatpush.msra.mxu1 %v2186_v19 }
 0xd5f   :  { %v2507_v49 = vsel %vm816_vm11, %v2502_v51, -inf }
 0xd60   :  { %2508 = vmax.xlane.f32.xlu1 %v2507_v49  ;;  %2143 = vadd.xlane.f32.xlu0 %v2142_v55 }
 0xd61   :  { %2327 = vmatpush.msra.mxu1 %v2185_v22 }
 0xd63   :  { %2328 = vmatpush.msra.mxu1 %v2184_v21 }
 0xd65   :  { %2329 = vmatpush.msra.mxu1 %v2183_v4 }
 0xd67   :  { %2330 = vmatpush.msra.mxu1 %v2182_v58 }
 0xd69   :  { %2331 = vmatpush.msra.mxu1 %v2181_v0 }
 0xd6b   :  { %2332 = vmatpush.msra.mxu1 %v2180_v18 }
 0xd6d   :  { %2333 = vmatpush.msra.mxu1 %v2179_v62 }
 0xd6f   :  { %2334 = vmatpush.msra.mxu1 %v2178_v60 }
 0xd71   :  { %2571 = vmatpush.msrb.mxu1 %v2570_v10 }
 0xd73   :  { %2572 = vmatpush.msrb.mxu1 %v2569_v9 }
 0xd75   :  { %2573 = vmatpush.msrb.mxu1 %v2568_v5 }
 0xd77   :  { %2574 = vmatpush.msrb.mxu1 %v2567_v12 }
 0xd79   :  { %2575 = vmatpush.msrb.mxu1 %v2566_v20 }
 0xd7b   :  { %2576 = vmatpush.msrb.mxu1 %v2565_v37 }
 0xd7d   :  { %2577 = vmatpush.msrb.mxu1 %v2564_v33 }
 0xd7f   :  { %2578 = vmatpush.msrb.mxu1 %v2563_v50 }
 0xd81   :  { %2579 = vmatpush.msrb.mxu1 %v2562_v59 }
 0xd83   :  { %2580 = vmatpush.msrb.mxu1 %v2561_v43 }
 0xd85   :  { %2581 = vmatpush.msrb.mxu1 %v2560_v6  ;;  %v2986_v6 = vld [vmem:[#allocation4 + $0x4cb] ss:$0 sm:$0xff] }
 0xd87   :  { %2582 = vmatpush.msrb.mxu1 %v2559_v42 }
 0xd89   :  { %2583 = vmatpush.msrb.mxu1 %v2558_v2 }
 0xd8b   :  { %2584 = vmatpush.msrb.mxu1 %v2557_v15 }
 0xd8d   :  { %2585 = vmatpush.msrb.mxu1 %v2556_v14 }
 0xd8f   :  { %2586 = vmatpush.msrb.mxu1 %v2555_v36 }
 0xdb2   :  { %v2313_v47 = vpop.f32.mrf.mxu0 }
 0xdbe   :  { %v2172_v48 = vpop.f32.mrf.mxu1 }
 0xdc8   :  { %v2461_v55 = vpop.f32.mrf.mxu2 }
 0xdcb   :  { %v2506_v54 = vpop.xlane.xlu0 %2505 }
 0xdcc   :  { %v2510_v1 = vsub.f32 %v2499_v39, %v2506_v54  ;;  %v2316_v39 = vpop.f32.mrf.mxu0 }
 0xdce   :  { %v2512_v30 = vmul.f32 1.442695, %v2510_v1 }
 0xdd0   :  { %3064 = vpow2.f32 %v2512_v30  ;;  %v2464_v19 = vpop.f32.mrf.mxu2 }
 0xdd3   :  { %v2509_v63 = vpop.xlane.xlu1 %2508  ;;  %v2144_v34 = vpop.xlane.xlu0 %2143 }
 0xdd4   :  { %v2511_v52 = vsub.f32 %v2502_v51, %v2509_v63  ;;  %3066 = vrcp.f32 %v2144_v34 }
 0xdd6   :  { %v3065_v8 = vpop.eup %3064  ;;  %v2514_v44 = vmul.f32 1.442695, %v2511_v52 }
 0xdd7   :  { %v2516_v38 = vsel %vm816_vm11, %v3065_v8, 0.0 }
 0xdd8   :  { %3068 = vpow2.f32 %v2514_v44  ;;  %2517 = vadd.xlane.f32.xlu1 %v2516_v38  ;;  %v2657_v44 = vld [vmem:[#allocation4 + $0x480] sm:$0xff]  ;;  %v2656_v38 = vld [vmem:[#allocation4 + $0x478] sm:$0xff] }
 0xdd9   :  { %2678 = vmatpush.msrb.mxu3 %v2657_v44 }
 0xdda   :  { %v3067_v56 = vpop.eup %3066 }
 0xddb   :  { %v2148_v31 = vmul.f32 %v3067_v56, %v3063_v53  ;;  %2679 = vmatpush.msrb.mxu3 %v2656_v38  ;;  %v2655_v56 = vld [vmem:[#allocation4 + $0x470] sm:$0xff] }
 0xddd   :  { %2943 = vmatmul.msk.f32.gmra.mxu1 %vm816_vm11, %v2148_v31  ;;  %2680 = vmatpush.msrb.mxu3 %v2655_v56  ;;  %v2654_v31 = vld [vmem:[#allocation4 + $0x468] sm:$0xff] }
 0xdde   :  { %v3069_v27 = vpop.eup %3068  ;;  %v2988_v56 = vld [vmem:[#allocation4 + $0x4ce] ss:$0 sm:$0xff] }
 0xddf   :  { %v2519_v41 = vsel %vm816_vm11, %v3069_v27, 0.0  ;;  %2681 = vmatpush.msrb.mxu3 %v2654_v31 }
 0xde0   :  { %2520 = vadd.xlane.f32.xlu2 %v2519_v41 }
 0xde5   :  { %2335 = vmatmul.f32.vlgmr.msra.gmra.mxu1 %v2172_v48 }
 0xe4b   :  { %v2518_v24 = vpop.xlane.xlu1 %2517 }
 0xe4c   :  { %3070 = vrcp.f32 %v2518_v24 }
 0xe52   :  { %v3071_v26 = vpop.eup %3070 }
 0xe53   :  { %v2524_v17 = vmul.f32 %v3071_v26, %v3065_v8  ;;  %v2521_v40 = vpop.xlane.xlu2 %2520 }
 0xe54   :  { %3072 = vrcp.f32 %v2521_v40 }
 0xe55   :  { %2948 = vmatmul.msk.f32.vlgmr.msra.gmra.mxu0 %vm816_vm11, %v2524_v17  ;;  %v2985_v17 = vld [vmem:[#allocation4 + $0x4ca] ss:$0 sm:$0xff] }
 0xe5a   :  { %v3073_v16 = vpop.eup %3072  ;;  %v2175_v45 = vpop.f32.mrf.mxu1 }
 0xe5b   :  { %2338 = vmatmul.f32.gmra.mxu1 %v2175_v45  ;;  %v2525_v46 = vmul.f32 %v3073_v16, %v3069_v27 }
 0xe5d   :  { %2949 = vmatmul.msk.f32.gmra.mxu0 %vm816_vm11, %v2525_v46 }
 0xe62   :  { %v2336_v13 = vpop.f32.mrf.mxu1 }
 0xe63   :  { %v2337_v49 = vadd.f32 %v2336_v13, %v2313_v47  ;;  %v2712_v13 = vld [vmem:[#allocation4 + $0x4b0] sm:$0xff] }
 0xe65   :  { %v2467_v32 = vadd.f32 %v2461_v55, %v2337_v49  ;;  %v2710_v49 = vld [vmem:[#allocation4 + $0x4a0] sm:$0xff]  ;;  %v2709_v55 = vld [vmem:[#allocation4 + $0x498] sm:$0xff] }
 0xed2   :  { %v2549_v35 = vpop.f32.mrf.mxu0 }
 0xed3   :  { %2587 = vmatmul.f32.vlgmr.msrb.gmra.mxu1 %v2549_v35  ;;  %v2714_v35 = vld [vmem:[#allocation4 + $0x4c0] sm:$0xff] }
 0xed4   :  { %2731 = vmatpush.msrb.mxu0 %v2714_v35 }
 0xed8   :  { %v2339_v51 = vpop.f32.mrf.mxu1 }
 0xed9   :  { %v2340_v7 = vadd.f32 %v2339_v51, %v2316_v39  ;;  %v2711_v51 = vld [vmem:[#allocation4 + $0x4a8] sm:$0xff] }
 0xeda   :  { %v2552_v53 = vpop.f32.mrf.mxu0 }
 0xedb   :  { %2590 = vmatmul.f32.gmra.mxu1 %v2552_v53  ;;  %v2468_v21 = vadd.f32 %v2464_v19, %v2340_v7  ;;  %v2713_v53 = vld [vmem:[#allocation4 + $0x4b8] sm:$0xff] }
 0xedc   :  { %2732 = vmatpush.msrb.mxu0 %v2713_v53 }
 0xede   :  { %2733 = vmatpush.msrb.mxu0 %v2712_v13 }
 0xee0   :  { %2734 = vmatpush.msrb.mxu0 %v2711_v51 }
 0xee2   :  { %2735 = vmatpush.msrb.mxu0 %v2710_v49 }
 0xee4   :  { %2736 = vmatpush.msrb.mxu0 %v2709_v55  ;;  %v2989_v55 = vld [vmem:[#allocation6 + $0x38] ss:$0 sm:$0xff] }
 0xf50   :  { %v2588_v57 = vpop.f32.mrf.mxu1 }
 0xf51   :  { %v2594_v28 = vadd.f32 %v2588_v57, %v2467_v32  ;;  %v2708_v32 = vld [vmem:[#allocation4 + $0x490] sm:$0xff]  ;;  %v2987_v57 = vld [vmem:[#allocation4 + $0x4cd] ss:$0 sm:$0xff] }
 0xf52   :  { %2737 = vmatpush.msrb.mxu0 %v2708_v32 }
 0xf53   :  { %v2598_v29 = vadd.f32 %v2984_v3, %v2594_v28 }
 0xf55   :  { %v3817_v11 = vadd.f32 %v2598_v29, %v3523_v61 }
 0xf57   :  { %v2604_v22 = vsel %vm124_vm3, %v3817_v11, 0.0 }
 0xf58   :  { %2605 = vadd.xlane.f32.xlu0 %v2604_v22  ;;  %v2591_v4 = vpop.f32.mrf.mxu1 }
 0xf59   :  { %v2595_v58 = vadd.f32 %v2591_v4, %v2468_v21 }
 0xf5b   :  { %v2599_v0 = vadd.f32 %v2984_v3, %v2595_v58  ;;  %v2707_v3 = vld [vmem:[#allocation4 + $0x488] sm:$0xff] }
 0xf5c   :  { %2738 = vmatpush.msrb.mxu0 %v2707_v3 }
 0xf5d   :  { %v3822_v18 = vadd.f32 %v2599_v0, %v3528_v23 }
 0xf5f   :  { %v2607_v62 = vsel %vm124_vm3, %v3822_v18, 0.0 }
 0xf60   :  { %2608 = vadd.xlane.f32.xlu1 %v2607_v62 }
 0xfcb   :  { %v2606_v60 = vpop.xlane.xlu0 %2605 }
 0xfcc   :  { %v2610_v61 = vmul.f32 %v2606_v60, %v3229_v25 }
 0xfce   :  { %v2612_v54 = vsub.f32 %v3817_v11, %v2610_v61 }
 0xfd0   :  { %v2614_v1 = vmul.f32 %v2612_v54, %v2612_v54 }
 0xfd2   :  { %v2616_v30 = vsel %vm124_vm3, %v2614_v1, 0.0 }
 0xfd3   :  { %2617 = vadd.xlane.f32.xlu2 %v2616_v30  ;;  %v2609_v63 = vpop.xlane.xlu1 %2608 }
 0xfd4   :  { %v2611_v34 = vmul.f32 %v2609_v63, %v3229_v25 }
 0xfd6   :  { %v2613_v52 = vsub.f32 %v3822_v18, %v2611_v34 }
 0xfd8   :  { %v2615_v23 = vmul.f32 %v2613_v52, %v2613_v52 }
 0xfda   :  { %v2619_v8 = vsel %vm124_vm3, %v2615_v23, 0.0 }
 0xfdb   :  { %2620 = vadd.xlane.f32.xlu0 %v2619_v8 }
0x1046   :  { %v2618_v27 = vpop.xlane.xlu2 %2617 }
0x1047   :  { %v2622_v41 = vmul.f32 %v2618_v27, %v3229_v25 }
0x1049   :  { %v2624_v48 = vadd.f32 1e-05, %v2622_v41 }
0x104b   :  { %3074 = vrsqrt.f32 %v2624_v48  ;;  %vm2632_vm11 = vweird.f32 %v2624_v48 }
0x104e   :  { %v2621_v10 = vpop.xlane.xlu0 %2620 }
0x104f   :  { %v2623_v9 = vmul.f32 %v2621_v10, %v3229_v25 }
0x1051   :  { %v3075_v5 = vpop.eup %3074  ;;  %v2625_v12 = vadd.f32 1e-05, %v2623_v9 }
0x1052   :  { %v2627_v20 = vmul.f32 %v3075_v5, %v2624_v48  ;;  %vm2633_vm10 = vweird.f32 %v3075_v5 }
0x1053   :  { %3076 = vrsqrt.f32 %v2625_v12  ;;  %vm2634_vm12 = vmor %vm2632_vm11, %vm2633_vm10  ;;  %vm2642_vm14 = vweird.f32 %v2625_v12 }
0x1054   :  { %v2628_v24 = vmul.f32 %v3075_v5, %v2627_v20 }
0x1056   :  { %v2629_v37 = vmul.f32 0.5, %v2628_v24 }
0x1058   :  { %v2630_v33 = vsub.f32 1.5, %v2629_v37 }
0x1059   :  { %v3077_v50 = vpop.eup %3076 }
0x105a   :  { %v2631_v59 = vmul.f32 %v3075_v5, %v2630_v33  ;;  %v2637_v26 = vmul.f32 %v3077_v50, %v2625_v12  ;;  %vm2643_vm13 = vweird.f32 %v3077_v50 }
0x105b   :  { %vm2644_vm15 = vmor %vm2642_vm14, %vm2643_vm13 }
0x105c   :  { %v2635_v40 = vsel %vm2634_vm12, %v3075_v5, %v2631_v59  ;;  %v2638_v43 = vmul.f32 %v3077_v50, %v2637_v26 }
0x105d   :  { %v2646_v42 = vmul.f32 %v2635_v40, %v2612_v54 }
0x105e   :  { %v2639_v2 = vmul.f32 0.5, %v2638_v43  ;;  %v2802_v43 = vld [vmem:[#allocation6 + $0x4a] sm:$0xff] }
0x105f   :  { %v2649_v16 = vmul.f32 %v2985_v17, %v2646_v42  ;;  %v2800_v42 = vld [vmem:[#allocation6 + $0x3a] sm:$0xff] }
0x1060   :  { %v2640_v45 = vsub.f32 1.5, %v2639_v2 }
0x1061   :  { %v2652_v46 = vadd.f32 %v2986_v6, %v2649_v16 }
0x1062   :  { %v2641_v15 = vmul.f32 %v3077_v50, %v2640_v45 }
0x1063   :  { %2950 = vmatmul.msk.f32.vlgmr.msrb.gmra.mxu3 %vm124_vm3, %v2652_v46 }
0x1064   :  { %v2645_v14 = vsel %vm2644_vm15, %v3077_v50, %v2641_v15 }
0x1065   :  { %v2647_v36 = vmul.f32 %v2645_v14, %v2613_v52 }
0x1067   :  { %v2650_v47 = vmul.f32 %v2985_v17, %v2647_v36 }
0x1069   :  { %v2653_v39 = vadd.f32 %v2986_v6, %v2650_v47  ;;  %v2801_v6 = vld [vmem:[#allocation6 + $0x42] sm:$0xff] }
0x106b   :  { %2951 = vmatmul.msk.f32.gmra.mxu3 %vm124_vm3, %v2653_v39 }
0x10e6   :  { %v2683_v28 = vpop.f32.mrf.mxu3 }
0x10e7   :  { %v2684_v7 = vadd.f32 %v2987_v57, %v2683_v28 }
0x10e9   :  { %v2689_v29 = vmul.f32 %v2684_v7, %v2684_v7 }
0x10eb   :  { %v2691_v19 = vmul.f32 %v2689_v29, %v2684_v7 }
0x10ed   :  { %v2693_v22 = vmul.f32 0.044715, %v2691_v19 }
0x10ee   :  { %v2686_v21 = vpop.f32.mrf.mxu3 }
0x10ef   :  { %v2695_v4 = vadd.f32 %v2693_v22, %v2684_v7  ;;  %v2687_v58 = vadd.f32 %v2987_v57, %v2686_v21  ;;  %v2990_v57 = vld [vmem:[#allocation6 + $0x39] ss:$0 sm:$0xff] }
0x10f1   :  { %v2697_v0 = vmul.f32 0.7978846, %v2695_v4  ;;  %v2690_v62 = vmul.f32 %v2687_v58, %v2687_v58 }
0x10f3   :  { %3078 = vtanh.f32 %v2697_v0  ;;  %v2692_v60 = vmul.f32 %v2690_v62, %v2687_v58  ;;  %v2991_v62 = vld [vmem:[#allocation6 + $0x5a] ss:$0 sm:$0xff] }
0x10f5   :  { %v2694_v61 = vmul.f32 0.044715, %v2692_v60 }
0x10f7   :  { %v2696_v54 = vadd.f32 %v2694_v61, %v2687_v58 }
0x10f9   :  { %v3079_v1 = vpop.eup %3078  ;;  %v2698_v30 = vmul.f32 0.7978846, %v2696_v54 }
0x10fa   :  { %v2701_v63 = vadd.f32 1.0, %v3079_v1 }
0x10fb   :  { %3080 = vtanh.f32 %v2698_v30 }
0x10fc   :  { %v2703_v34 = vmul.f32 0.5, %v2701_v63 }
0x10fe   :  { %v2705_v52 = vmul.f32 %v2703_v34, %v2684_v7 }
0x1100   :  { %2952 = vmatmul.msk.f32.vlgmr.msrb.gmra.mxu0 %vm1407_vm2, %v2705_v52 }
0x1101   :  { %v3081_v23 = vpop.eup %3080 }
0x1102   :  { %v2702_v8 = vadd.f32 1.0, %v3081_v23 }
0x1104   :  { %v2704_v44 = vmul.f32 0.5, %v2702_v8 }
0x1106   :  { %v2706_v38 = vmul.f32 %v2704_v44, %v2687_v58 }
0x1108   :  { %2953 = vmatmul.msk.f32.gmra.mxu0 %vm1407_vm2, %v2706_v38 }
0x117d   :  { %v2740_v31 = vpop.f32.mrf.mxu0 }
0x117e   :  { %v2741_v27 = vadd.f32 %v2988_v56, %v2740_v31 }
0x1180   :  { %v2746_v41 = vadd.f32 %v2741_v27, %v3817_v11 }
0x1182   :  { %v2750_v48 = vsel %vm124_vm3, %v2746_v41, 0.0 }
0x1183   :  { %2751 = vadd.xlane.f32.xlu1 %v2750_v48 }
0x1185   :  { %v2743_v10 = vpop.f32.mrf.mxu0 }
0x1186   :  { %v2744_v9 = vadd.f32 %v2988_v56, %v2743_v10 }
0x1188   :  { %v2747_v5 = vadd.f32 %v2744_v9, %v3822_v18  ;;  %v2803_v18 = vld [vmem:[#allocation6 + $0x52] sm:$0xff] }
0x1189   :  { %2824 = vmatpush.msrb.mxu2 %v2803_v18 }
0x118a   :  { %v2753_v12 = vsel %vm124_vm3, %v2747_v5, 0.0 }
0x118b   :  { %2754 = vadd.xlane.f32.xlu2 %v2753_v12  ;;  %2825 = vmatpush.msrb.mxu2 %v2802_v43 }
0x118d   :  { %2826 = vmatpush.msrb.mxu2 %v2801_v6 }
0x118f   :  { %2827 = vmatpush.msrb.mxu2 %v2800_v42 }
0x11f6   :  { %v2752_v20 = vpop.xlane.xlu1 %2751 }
0x11f7   :  { %v2756_v24 = vmul.f32 %v2752_v20, %v3229_v25 }
0x11f9   :  { %v2758_v37 = vsub.f32 %v2746_v41, %v2756_v24 }
0x11fb   :  { %v2760_v33 = vmul.f32 %v2758_v37, %v2758_v37 }
0x11fd   :  { %v2762_v50 = vsel %vm124_vm3, %v2760_v33, 0.0 }
0x11fe   :  { %v2755_v59 = vpop.xlane.xlu2 %2754  ;;  %2763 = vadd.xlane.f32.xlu0 %v2762_v50 }
0x11ff   :  { %v2757_v11 = vmul.f32 %v2755_v59, %v3229_v25 }
0x1201   :  { %v2759_v26 = vsub.f32 %v2747_v5, %v2757_v11 }
0x1203   :  { %v2761_v17 = vmul.f32 %v2759_v26, %v2759_v26 }
0x1205   :  { %v2765_v40 = vsel %vm124_vm3, %v2761_v17, 0.0 }
0x1206   :  { %2766 = vadd.xlane.f32.xlu1 %v2765_v40 }
0x1271   :  { %v2764_v2 = vpop.xlane.xlu0 %2763 }
0x1272   :  { %v2768_v16 = vmul.f32 %v2764_v2, %v3229_v25 }
0x1274   :  { %v2770_v45 = vadd.f32 1e-05, %v2768_v16 }
0x1276   :  { %3082 = vrsqrt.f32 %v2770_v45  ;;  %vm2778_vm1 = vweird.f32 %v2770_v45 }
0x1279   :  { %v2767_v46 = vpop.xlane.xlu1 %2766 }
0x127a   :  { %v2769_v15 = vmul.f32 %v2767_v46, %v3229_v25 }
0x127c   :  { %v3083_v14 = vpop.eup %3082  ;;  %v2771_v36 = vadd.f32 1e-05, %v2769_v15 }
0x127d   :  { %v2773_v47 = vmul.f32 %v3083_v14, %v2770_v45  ;;  %vm2779_vm0 = vweird.f32 %v3083_v14 }
0x127e   :  { %3084 = vrsqrt.f32 %v2771_v36  ;;  %vm2780_vm2 = vmor %vm2778_vm1, %vm2779_vm0  ;;  %vm2788_vm5 = vweird.f32 %v2771_v36 }
0x127f   :  { %v2774_v39 = vmul.f32 %v3083_v14, %v2773_v47 }
0x1281   :  { %v2775_v35 = vmul.f32 0.5, %v2774_v39 }
0x1283   :  { %v2776_v53 = vsub.f32 1.5, %v2775_v35 }
0x1284   :  { %v3085_v13 = vpop.eup %3084 }
0x1285   :  { %v2777_v51 = vmul.f32 %v3083_v14, %v2776_v53  ;;  %v2783_v49 = vmul.f32 %v3085_v13, %v2771_v36  ;;  %vm2789_vm4 = vweird.f32 %v3085_v13 }
0x1286   :  { %vm2790_vm6 = vmor %vm2788_vm5, %vm2789_vm4 }
0x1287   :  { %v2781_v32 = vsel %vm2780_vm2, %v3083_v14, %v2777_v51  ;;  %v2784_v3 = vmul.f32 %v3085_v13, %v2783_v49 }
0x1288   :  { %v2792_v28 = vmul.f32 %v2781_v32, %v2758_v37 }
0x1289   :  { %v2785_v7 = vmul.f32 0.5, %v2784_v3 }
0x128a   :  { %v2795_v25 = vmul.f32 %v2989_v55, %v2792_v28 }
0x128b   :  { %v2786_v29 = vsub.f32 1.5, %v2785_v7 }
0x128c   :  { %v2798_v19 = vadd.f32 %v2990_v57, %v2795_v25 }
0x128d   :  { %v2787_v22 = vmul.f32 %v3085_v13, %v2786_v29 }
0x128e   :  { %2954 = vmatmul.msk.f32.vlgmr.msrb.gmra.mxu2 %vm124_vm3, %v2798_v19 }
0x128f   :  { %v2791_v21 = vsel %vm2790_vm6, %v3085_v13, %v2787_v22 }
0x1290   :  { %v2793_v4 = vmul.f32 %v2791_v21, %v2759_v26 }
0x1292   :  { %v2796_v58 = vmul.f32 %v2989_v55, %v2793_v4 }
0x1294   :  { %v2799_v0 = vadd.f32 %v2990_v57, %v2796_v58 }
0x1296   :  { %2955 = vmatmul.msk.f32.gmra.mxu2 %vm124_vm3, %v2799_v0 }
0x1311   :  { %v2829_v60 = vpop.f32.mrf.mxu2 }
0x1312   :  { %v2830_v61 = vadd.f32 %v2991_v62, %v2829_v60 }
0x1314   :  { %2835 = vst [vmem:[%s3861_s5] sm:$0xff] %v2830_v61 }
0x1319   :  { %v2832_v54 = vpop.f32.mrf.mxu2 }
0x131a   :  { %v2833_v1 = vadd.f32 %v2991_v62, %v2832_v54 }
0x131c   :  { %2836 = vst [vmem:[%s3861_s5 + $0x8] sm:$0xff] %v2833_v1 }
0x131d   :  { %2841 = vsyncpa [#allocation3], 1 }
0x131e   :  { %2842 = vsyncpa [#allocation5], 1 }

</bundles_post_ra>
